<compile_context>
chip_gen: v7x
topology: tpu7x:2x2x1
jax: 0.10.0
libtpu: 0.0.40
codegen_flags: <defaults>
</compile_context>

<pallas_src>
import functools

import jax
import jax.numpy as jnp
from jax import lax
from jax.experimental import pallas as pl
from jax.experimental.pallas import tpu as pltpu

BN_EPS = 1e-5
LANE = 128


def _round_up(n, m):
    return ((n + m - 1) // m) * m


def _choose_tm(M):
    """Pick a sublane-aligned M tile giving >= 2 grid steps where possible."""
    for tm in (128, 64, 32, 16, 8):
        if M % tm == 0 and M // tm >= 2:
            return tm, M
    tm = max(8, _round_up(M, 16) // 2)
    return tm, _round_up(M, tm)


def _pad2(a, rows, cols):
    return jnp.pad(a, ((0, rows - a.shape[0]), (0, cols - a.shape[1])))


# ----------------------------- Pallas kernels ------------------------------ #

def gemm_bias_kernel(x_ref, w_ref, b_ref, o_ref, *, relu):
    """out = x @ w + bias (+ReLU).  BN scale is pre-folded into w."""
    out = jnp.dot(x_ref[...], w_ref[...], preferred_element_type=jnp.float32) + b_ref[...]
    if relu:
        out = jnp.maximum(out, 0.0)
    o_ref[...] = out.astype(o_ref.dtype)


def gemm_bias_res_kernel(x_ref, w_ref, b_ref, r_ref, o_ref, *, relu):
    """out = x @ w + bias + residual (+ReLU)."""
    out = (jnp.dot(x_ref[...], w_ref[...], preferred_element_type=jnp.float32)
           + b_ref[...] + r_ref[...])
    if relu:
        out = jnp.maximum(out, 0.0)
    o_ref[...] = out.astype(o_ref.dtype)


def gemm_dual_kernel(x_ref, w_ref, b_ref, xs_ref, ws_ref, bs_ref, o_ref, *, relu):
    """out = (x @ w + bias) + (xs @ ws + bs) (+ReLU): conv2 + fused 1x1 shortcut conv."""
    main = jnp.dot(x_ref[...], w_ref[...], preferred_element_type=jnp.float32) + b_ref[...]
    sc = jnp.dot(xs_ref[...], ws_ref[...], preferred_element_type=jnp.float32) + bs_ref[...]
    out = main + sc
    if relu:
        out = jnp.maximum(out, 0.0)
    o_ref[...] = out.astype(o_ref.dtype)


def pool_fc_kernel(p_ref, x_ref, w_ref, b_ref, o_ref):
    """Global average pool as a matmul (pool-matrix @ x) followed by the Linear layer."""
    pooled = jnp.dot(p_ref[...], x_ref[...], preferred_element_type=jnp.float32)   # (N, Cp)
    out = jnp.dot(pooled.astype(jnp.bfloat16), w_ref[...],
                  preferred_element_type=jnp.float32) + b_ref[...]
    o_ref[...] = out.astype(o_ref.dtype)


# --------------------------- Pallas call wrappers --------------------------- #

def fused_gemm(cols, w_mat, bias, tm, relu, res=None, sc=None):
    """cols: (Mp, Kp) bf16, w_mat: (Kp, Cp) bf16, bias: (1, Cp) f32 -> (Mp, Cp) f32."""
    Mp, Kp = cols.shape
    Cp = w_mat.shape[1]
    grid = (Mp // tm,)

    in_arrays = [cols, w_mat, bias]
    in_specs = [
        pl.BlockSpec((tm, Kp), lambda i: (i, 0)),
        pl.BlockSpec((Kp, Cp), lambda i: (0, 0)),
        pl.BlockSpec((1, Cp), lambda i: (0, 0)),
    ]
    if sc is not None:
        sc_cols, sc_w, sc_b = sc
        sKp = sc_cols.shape[1]
        kernel = functools.partial(gemm_dual_kernel, relu=relu)
        in_arrays += [sc_cols, sc_w, sc_b]
        in_specs += [
            pl.BlockSpec((tm, sKp), lambda i: (i, 0)),
            pl.BlockSpec((sKp, Cp), lambda i: (0, 0)),
            pl.BlockSpec((1, Cp), lambda i: (0, 0)),
        ]
    elif res is not None:
        kernel = functools.partial(gemm_bias_res_kernel, relu=relu)
        in_arrays.append(res)
        in_specs.append(pl.BlockSpec((tm, Cp), lambda i: (i, 0)))
    else:
        kernel = functools.partial(gemm_bias_kernel, relu=relu)

    return pl.pallas_call(
        kernel,
        out_shape=jax.ShapeDtypeStruct((Mp, Cp), jnp.float32),
        grid=grid,
        in_specs=in_specs,
        out_specs=pl.BlockSpec((tm, Cp), lambda i: (i, 0)),
        compiler_params=pltpu.CompilerParams(dimension_semantics=("parallel",)),
    )(*in_arrays)


def pool_fc_pallas(x, fc_w, fc_b):
    """x: (N, H, W, Cp) NHWC (zero-padded channels allowed); fc_w: (num_out, cin); fc_b: (num_out,)."""
    N, H, W, Cp = x.shape
    HW = H * W
    num_out, cin = fc_w.shape
    NOp = _round_up(num_out, LANE)

    x_flat = x.reshape(N * HW, Cp).astype(jnp.bfloat16)
    # Pooling matrix: row n averages the HW rows belonging to image n. 1/HW is exact in bf16
    # for power-of-two HW; accumulation happens in f32 on the MXU.
    pool = (jnp.kron(jnp.eye(N, dtype=jnp.float32),
                     jnp.ones((1, HW), jnp.float32)) / HW).astype(jnp.bfloat16)
    wt = jnp.pad(jnp.transpose(fc_w), ((0, Cp - cin), (0, NOp - num_out))).astype(jnp.bfloat16)
    b = jnp.pad(fc_b, (0, NOp - num_out)).reshape(1, NOp).astype(jnp.float32)

    out = pl.pallas_call(
        pool_fc_kernel,
        out_shape=jax.ShapeDtypeStruct((N, NOp), jnp.float32),
        grid=(1,),
        in_specs=[
            pl.BlockSpec((N, N * HW), lambda i: (0, 0)),
            pl.BlockSpec((N * HW, Cp), lambda i: (0, 0)),
            pl.BlockSpec((Cp, NOp), lambda i: (0, 0)),
            pl.BlockSpec((1, NOp), lambda i: (0, 0)),
        ],
        out_specs=pl.BlockSpec((N, NOp), lambda i: (0, 0)),
    )(pool, x_flat, wt, b)
    return out[:, :num_out]


# ------------------------------- JAX glue ---------------------------------- #

def im2col(x, kh, kw, stride, padding):
    """x: (N, H, W, C) NHWC -> (N*Ho*Wo, kh*kw*C), plus output spatial dims."""
    N, H, W, C = x.shape
    xp = jnp.pad(x, ((0, 0), (padding, padding), (padding, padding), (0, 0)))
    Ho = (H + 2 * padding - kh) // stride + 1
    Wo = (W + 2 * padding - kw) // stride + 1
    patches = []
    for i in range(kh):
        for j in range(kw):
            patches.append(xp[:, i:i + stride * Ho:stride, j:j + stride * Wo:stride, :])
    cols = jnp.stack(patches, axis=3)                          # (N, Ho, Wo, kh*kw, C)
    return cols.reshape(N * Ho * Wo, kh * kw * C), (N, Ho, Wo)


def prep_weight(w, bn, cin_act, cout_pad):
    """Fold the BN scale into the conv weights and pad to (Kp, cout_pad) bf16; bias f32."""
    cout, cin, kh, kw = w.shape
    scale = bn["gamma"] / jnp.sqrt(bn["var"] + BN_EPS)
    bias = bn["beta"] - bn["mean"] * scale
    w_hwio = jnp.transpose(w, (2, 3, 1, 0)) * scale            # (kh, kw, cin, cout), scale folded
    w_hwio = jnp.pad(w_hwio, ((0, 0), (0, 0), (0, cin_act - cin), (0, cout_pad - cout)))
    K = kh * kw * cin_act
    Kp = _round_up(K, LANE)
    w_mat = jnp.pad(w_hwio.reshape(K, cout_pad), ((0, Kp - K), (0, 0))).astype(jnp.bfloat16)
    bias = jnp.pad(bias, (0, cout_pad - cout)).reshape(1, cout_pad).astype(jnp.float32)
    return w_mat, bias


def conv_bn_pallas(x, w, bn, stride, padding, relu, residual=None, shortcut=None):
    """Conv2d(bias=False)+BN (+identity residual | +fused 1x1 shortcut conv) (+ReLU).

    x: (N, H, W, Cp_in) NHWC; channels beyond the real cin are exact-zero padding.
    w: (cout, cin, kh, kw) in PyTorch layout. Returns (N, Ho, Wo, Cp_out) f32 with
    Cp_out = round_up(cout, 128); padded output channels are exact zeros."""
    N, H, W, Cp_in = x.shape
    cout, cin, kh, kw = w.shape
    Cp_out = _round_up(cout, LANE)

    w_mat, bias = prep_weight(w, bn, Cp_in, Cp_out)
    cols, (N, Ho, Wo) = im2col(x, kh, kw, stride, padding)
    M = N * Ho * Wo
    tm, Mp = _choose_tm(M)
    cols = _pad2(cols, Mp, w_mat.shape[0]).astype(jnp.bfloat16)

    res = None
    sc = None
    if residual is not None:
        res = _pad2(residual.reshape(M, Cp_out), Mp, Cp_out)
    if shortcut is not None:
        sc_x, sc_w, sc_bn, sc_stride = shortcut
        sc_wmat, sc_bias = prep_weight(sc_w, sc_bn, sc_x.shape[-1], Cp_out)
        sc_cols, _ = im2col(sc_x, 1, 1, sc_stride, 0)
        sc_cols = _pad2(sc_cols, Mp, sc_wmat.shape[0]).astype(jnp.bfloat16)
        sc = (sc_cols, sc_wmat, sc_bias)

    out = fused_gemm(cols, w_mat, bias, tm, relu, res=res, sc=sc)
    return out[:M].reshape(N, Ho, Wo, Cp_out)


def forward_pallas(params, x):
    """Mirrors ResNet.forward: conv1 -> bn1 -> relu -> BasicBlock layers -> head."""
    out = conv_bn_pallas(x, params["conv1"], params["bn1"], 2, 3, True)
    for layer in params["layers"]:
        for blk in layer:
            block_in = out
            y = conv_bn_pallas(block_in, blk["conv1"], blk["bn1"], blk["stride"], 1, True)
            if blk["sc_conv"] is not None:
                out = conv_bn_pallas(
                    y, blk["conv2"], blk["bn2"], 1, 1, True,
                    shortcut=(block_in, blk["sc_conv"], blk["sc_bn"], blk["stride"]))
            else:
                out = conv_bn_pallas(y, blk["conv2"], blk["bn2"], 1, 1, True,
                                     residual=block_in)
    return pool_fc_pallas(out, params["fc_w"], params["fc_b"])


# --------------------- pure-JAX reference (correctness) --------------------- #

def conv_bn_ref(x, w, bn, stride, padding, relu, residual=None):
    w_hwio = jnp.transpose(w, (2, 3, 1, 0))
    out = lax.conv_general_dilated(
        x, w_hwio, (stride, stride), [(padding, padding), (padding, padding)],
        dimension_numbers=("NHWC", "HWIO", "NHWC"))
    scale = bn["gamma"] / jnp.sqrt(bn["var"] + BN_EPS)
    bias = bn["beta"] - bn["mean"] * scale
    out = out * scale + bias
    if residual is not None:
        out = out + residual
    if relu:
        out = jnp.maximum(out, 0.0)
    return out


def pool_fc_ref(x, fc_w, fc_b):
    pooled = jnp.mean(x, axis=(1, 2))
    return pooled @ fc_w.T + fc_b


def forward_ref(params, x):
    out = conv_bn_ref(x, params["conv1"], params["bn1"], 2, 3, True)
    for layer in params["layers"]:
        for blk in layer:
            residual = out
            y = conv_bn_ref(out, blk["conv1"], blk["bn1"], blk["stride"], 1, True)
            if blk["sc_conv"] is not None:
                shortcut = conv_bn_ref(residual, blk["sc_conv"], blk["sc_bn"],
                                       blk["stride"], 0, False)
            else:
                shortcut = residual
            out = conv_bn_ref(y, blk["conv2"], blk["bn2"], 1, 1, True, residual=shortcut)
    return pool_fc_ref(out, params["fc_w"], params["fc_b"])


# ---------------------------- parameter setup ------------------------------ #

def make_conv(key, cout, cin, k):
    return 0.05 * jax.random.normal(key, (cout, cin, k, k), jnp.float32)


def make_bn(key, c):
    k1, k2, k3, k4 = jax.random.split(key, 4)
    return {
        "gamma": 1.0 + 0.1 * jax.random.normal(k1, (c,), jnp.float32),
        "beta": 0.1 * jax.random.normal(k2, (c,), jnp.float32),
        "mean": 0.1 * jax.random.normal(k3, (c,), jnp.float32),
        "var": 0.5 + jax.random.uniform(k4, (c,), jnp.float32),
    }


def init_params(key, num_layers, num_output):
    keys = iter(jax.random.split(key, 256))
    params = {"conv1": make_conv(next(keys), 64, 3, 7), "bn1": make_bn(next(keys), 64)}
    in_c = 64
    layers = []
    for idx, num_blocks in enumerate(num_layers):
        stride = 1 if idx == 0 else 2
        out_c = 64 * (2 ** idx)
        blocks = []
        for s in [stride] + [1] * (num_blocks - 1):
            blk = {
                "stride": s,
                "conv1": make_conv(next(keys), out_c, in_c, 3),
                "bn1": make_bn(next(keys), out_c),
                "conv2": make_conv(next(keys), out_c, out_c, 3),
                "bn2": make_bn(next(keys), out_c),
                "sc_conv": None,
                "sc_bn": None,
            }
            if s != 1 or in_c != out_c:
                blk["sc_conv"] = make_conv(next(keys), out_c, in_c, 1)
                blk["sc_bn"] = make_bn(next(keys), out_c)
            blocks.append(blk)
            in_c = out_c
        layers.append(blocks)
    params["layers"] = layers
    params["fc_w"] = 0.05 * jax.random.normal(next(keys), (num_output, in_c), jnp.float32)
    params["fc_b"] = 0.05 * jax.random.normal(next(keys), (num_output,), jnp.float32)
    return params


# ---------------------------------- main ------------------------------------ #

if __name__ == "__main__":
    key = jax.random.PRNGKey(0)
    pkey, xkey = jax.random.split(key)

    num_layers = [1, 1]    # ResNet([1, 1], num_output=10)
    num_output = 10
    params = init_params(pkey, num_layers, num_output)

    # PyTorch-convention NCHW input, transposed to NHWC for the kernels.
    x_nchw = jax.random.normal(xkey, (2, 3, 32, 32), jnp.float32)
    x = jnp.transpose(x_nchw, (0, 2, 3, 1))

    fwd = jax.jit(lambda xin: forward_pallas(params, xin))
    out = jax.block_until_ready(fwd(x))

    ref = jax.block_until_ready(forward_ref(params, x))

    assert out.shape == (2, num_output), out.shape
    err = float(jnp.max(jnp.abs(out - ref)))
    scale = float(jnp.max(jnp.abs(ref)))
    tol = 5e-2 * max(1.0, scale)   # headroom for bf16 MXU operands vs f32 reference
    if err > tol:
        raise AssertionError(f"Pallas output mismatch vs reference, max abs err = {err}")

    print("KERNEL_OK")
</pallas_src>

<mosaic_0001>
module attributes {stable_mosaic.version = 11 : i64} {
  func.func @gemm_bias_kernel(%arg0: i32, %arg1: memref<128x256xbf16, #tpu.memory_space<vmem>>, %arg2: memref<256x128xbf16, #tpu.memory_space<vmem>>, %arg3: memref<1x128xf32, #tpu.memory_space<vmem>>, %arg4: memref<128x128xf32, #tpu.memory_space<vmem>>) attributes {dimension_semantics = [#tpu.dimension_semantics<parallel>], iteration_bounds = array<i64: 4>, scalar_prefetch = 0 : i64, scratch_operands = 0 : i64, tpu.core_type = #tpu.core_type<tc>, window_params = [{transform_indices = @transform_0, window_bounds = array<i64: 128, 256>}, {pipeline_mode = #tpu.pipeline_mode<synchronous>, transform_indices = @transform_1, window_bounds = array<i64: 256, 128>}, {pipeline_mode = #tpu.pipeline_mode<synchronous>, transform_indices = @transform_2, window_bounds = array<i64: 1, 128>}, {transform_indices = @transform_3, window_bounds = array<i64: 128, 128>}]} {
    %c0 = arith.constant 0 : index
    %c0_0 = arith.constant 0 : index
    %0 = vector.load %arg1[%c0, %c0_0] : memref<128x256xbf16, #tpu.memory_space<vmem>>, vector<128x256xbf16>
    %c0_1 = arith.constant 0 : index
    %c0_2 = arith.constant 0 : index
    %1 = vector.load %arg2[%c0_1, %c0_2] : memref<256x128xbf16, #tpu.memory_space<vmem>>, vector<256x128xbf16>
    %cst = arith.constant dense<0.000000e+00> : vector<128x128xf32>
    %2 = tpu.matmul %0, %1, %cst {dimension_numbers = #tpu.dot_dimension_numbers<[1], [0], [0], [1], [0, 0, 1, 1], [], []>} : vector<128x256xbf16>, vector<256x128xbf16>, vector<128x128xf32> -> vector<128x128xf32>
    %c0_3 = arith.constant 0 : index
    %c0_4 = arith.constant 0 : index
    %3 = vector.load %arg3[%c0_3, %c0_4] : memref<1x128xf32, #tpu.memory_space<vmem>>, vector<1x128xf32>
    %4 = vector.broadcast %3 : vector<1x128xf32> to vector<128x128xf32>
    %5 = arith.addf %2, %4 : vector<128x128xf32>
    %cst_5 = arith.constant 0.000000e+00 : f32
    %6 = vector.broadcast %cst_5 : f32 to vector<128x128xf32>
    %7 = arith.maximumf %5, %6 : vector<128x128xf32>
    %c0_6 = arith.constant 0 : index
    %c0_7 = arith.constant 0 : index
    %8 = vector.load %arg4[%c0_6, %c0_7] : memref<128x128xf32, #tpu.memory_space<vmem>>, vector<128x128xf32>
    tpu.vector_store %arg4[%c0_6, %c0_7], %7 {strides = array<i32>} : memref<128x128xf32, #tpu.memory_space<vmem>>, vector<128x128xf32>,
    return
  }
  func.func @transform_0(%arg0: i32) -> (i32, i32) {
    %c0_i32 = arith.constant 0 : i32
    %c0_i32_0 = arith.constant 0 : i32
    return %arg0, %c0_i32 : i32, i32
  }
  func.func @transform_1(%arg0: i32) -> (i32, i32) {
    %c0_i32 = arith.constant 0 : i32
    %c0_i32_0 = arith.constant 0 : i32
    %c0_i32_1 = arith.constant 0 : i32
    return %c0_i32, %c0_i32_0 : i32, i32
  }
  func.func @transform_2(%arg0: i32) -> (i32, i32) {
    %c0_i32 = arith.constant 0 : i32
    %c0_i32_0 = arith.constant 0 : i32
    %c0_i32_1 = arith.constant 0 : i32
    return %c0_i32, %c0_i32_0 : i32, i32
  }
  func.func @transform_3(%arg0: i32) -> (i32, i32) {
    %c0_i32 = arith.constant 0 : i32
    %c0_i32_0 = arith.constant 0 : i32
    return %arg0, %c0_i32 : i32, i32
  }
}

module attributes {stable_mosaic.version = 11 : i64} {
  func.func @gemm_bias_kernel(%arg0: i32, %arg1: memref<128x1152xbf16, #tpu.memory_space<vmem>>, %arg2: memref<1152x128xbf16, #tpu.memory_space<vmem>>, %arg3: memref<1x128xf32, #tpu.memory_space<vmem>>, %arg4: memref<128x128xf32, #tpu.memory_space<vmem>>) attributes {dimension_semantics = [#tpu.dimension_semantics<parallel>], iteration_bounds = array<i64: 4>, scalar_prefetch = 0 : i64, scratch_operands = 0 : i64, tpu.core_type = #tpu.core_type<tc>, window_params = [{transform_indices = @transform_0, window_bounds = array<i64: 128, 1152>}, {pipeline_mode = #tpu.pipeline_mode<synchronous>, transform_indices = @transform_1, window_bounds = array<i64: 1152, 128>}, {pipeline_mode = #tpu.pipeline_mode<synchronous>, transform_indices = @transform_2, window_bounds = array<i64: 1, 128>}, {transform_indices = @transform_3, window_bounds = array<i64: 128, 128>}]} {
    %c0 = arith.constant 0 : index
    %c0_0 = arith.constant 0 : index
    %0 = vector.load %arg1[%c0, %c0_0] : memref<128x1152xbf16, #tpu.memory_space<vmem>>, vector<128x1152xbf16>
    %c0_1 = arith.constant 0 : index
    %c0_2 = arith.constant 0 : index
    %1 = vector.load %arg2[%c0_1, %c0_2] : memref<1152x128xbf16, #tpu.memory_space<vmem>>, vector<1152x128xbf16>
    %cst = arith.constant dense<0.000000e+00> : vector<128x128xf32>
    %2 = tpu.matmul %0, %1, %cst {dimension_numbers = #tpu.dot_dimension_numbers<[1], [0], [0], [1], [0, 0, 1, 1], [], []>} : vector<128x1152xbf16>, vector<1152x128xbf16>, vector<128x128xf32> -> vector<128x128xf32>
    %c0_3 = arith.constant 0 : index
    %c0_4 = arith.constant 0 : index
    %3 = vector.load %arg3[%c0_3, %c0_4] : memref<1x128xf32, #tpu.memory_space<vmem>>, vector<1x128xf32>
    %4 = vector.broadcast %3 : vector<1x128xf32> to vector<128x128xf32>
    %5 = arith.addf %2, %4 : vector<128x128xf32>
    %cst_5 = arith.constant 0.000000e+00 : f32
    %6 = vector.broadcast %cst_5 : f32 to vector<128x128xf32>
    %7 = arith.maximumf %5, %6 : vector<128x128xf32>
    %c0_6 = arith.constant 0 : index
    %c0_7 = arith.constant 0 : index
    %8 = vector.load %arg4[%c0_6, %c0_7] : memref<128x128xf32, #tpu.memory_space<vmem>>, vector<128x128xf32>
    tpu.vector_store %arg4[%c0_6, %c0_7], %7 {strides = array<i32>} : memref<128x128xf32, #tpu.memory_space<vmem>>, vector<128x128xf32>,
    return
  }
  func.func @transform_0(%arg0: i32) -> (i32, i32) {
    %c0_i32 = arith.constant 0 : i32
    %c0_i32_0 = arith.constant 0 : i32
    return %arg0, %c0_i32 : i32, i32
  }
  func.func @transform_1(%arg0: i32) -> (i32, i32) {
    %c0_i32 = arith.constant 0 : i32
    %c0_i32_0 = arith.constant 0 : i32
    %c0_i32_1 = arith.constant 0 : i32
    return %c0_i32, %c0_i32_0 : i32, i32
  }
  func.func @transform_2(%arg0: i32) -> (i32, i32) {
    %c0_i32 = arith.constant 0 : i32
    %c0_i32_0 = arith.constant 0 : i32
    %c0_i32_1 = arith.constant 0 : i32
    return %c0_i32, %c0_i32_0 : i32, i32
  }
  func.func @transform_3(%arg0: i32) -> (i32, i32) {
    %c0_i32 = arith.constant 0 : i32
    %c0_i32_0 = arith.constant 0 : i32
    return %arg0, %c0_i32 : i32, i32
  }
}

module attributes {stable_mosaic.version = 11 : i64} {
  func.func @gemm_bias_res_kernel(%arg0: i32, %arg1: memref<128x1152xbf16, #tpu.memory_space<vmem>>, %arg2: memref<1152x128xbf16, #tpu.memory_space<vmem>>, %arg3: memref<1x128xf32, #tpu.memory_space<vmem>>, %arg4: memref<128x128xf32, #tpu.memory_space<vmem>>, %arg5: memref<128x128xf32, #tpu.memory_space<vmem>>) attributes {dimension_semantics = [#tpu.dimension_semantics<parallel>], iteration_bounds = array<i64: 4>, scalar_prefetch = 0 : i64, scratch_operands = 0 : i64, tpu.core_type = #tpu.core_type<tc>, window_params = [{transform_indices = @transform_0, window_bounds = array<i64: 128, 1152>}, {pipeline_mode = #tpu.pipeline_mode<synchronous>, transform_indices = @transform_1, window_bounds = array<i64: 1152, 128>}, {pipeline_mode = #tpu.pipeline_mode<synchronous>, transform_indices = @transform_2, window_bounds = array<i64: 1, 128>}, {transform_indices = @transform_3, window_bounds = array<i64: 128, 128>}, {transform_indices = @transform_4, window_bounds = array<i64: 128, 128>}]} {
    %c0 = arith.constant 0 : index
    %c0_0 = arith.constant 0 : index
    %0 = vector.load %arg1[%c0, %c0_0] : memref<128x1152xbf16, #tpu.memory_space<vmem>>, vector<128x1152xbf16>
    %c0_1 = arith.constant 0 : index
    %c0_2 = arith.constant 0 : index
    %1 = vector.load %arg2[%c0_1, %c0_2] : memref<1152x128xbf16, #tpu.memory_space<vmem>>, vector<1152x128xbf16>
    %cst = arith.constant dense<0.000000e+00> : vector<128x128xf32>
    %2 = tpu.matmul %0, %1, %cst {dimension_numbers = #tpu.dot_dimension_numbers<[1], [0], [0], [1], [0, 0, 1, 1], [], []>} : vector<128x1152xbf16>, vector<1152x128xbf16>, vector<128x128xf32> -> vector<128x128xf32>
    %c0_3 = arith.constant 0 : index
    %c0_4 = arith.constant 0 : index
    %3 = vector.load %arg3[%c0_3, %c0_4] : memref<1x128xf32, #tpu.memory_space<vmem>>, vector<1x128xf32>
    %4 = vector.broadcast %3 : vector<1x128xf32> to vector<128x128xf32>
    %5 = arith.addf %2, %4 : vector<128x128xf32>
    %c0_5 = arith.constant 0 : index
    %c0_6 = arith.constant 0 : index
    %6 = vector.load %arg4[%c0_5, %c0_6] : memref<128x128xf32, #tpu.memory_space<vmem>>, vector<128x128xf32>
    %7 = arith.addf %5, %6 : vector<128x128xf32>
    %cst_7 = arith.constant 0.000000e+00 : f32
    %8 = vector.broadcast %cst_7 : f32 to vector<128x128xf32>
    %9 = arith.maximumf %7, %8 : vector<128x128xf32>
    %c0_8 = arith.constant 0 : index
    %c0_9 = arith.constant 0 : index
    %10 = vector.load %arg5[%c0_8, %c0_9] : memref<128x128xf32, #tpu.memory_space<vmem>>, vector<128x128xf32>
    tpu.vector_store %arg5[%c0_8, %c0_9], %9 {strides = array<i32>} : memref<128x128xf32, #tpu.memory_space<vmem>>, vector<128x128xf32>,
    return
  }
  func.func @transform_0(%arg0: i32) -> (i32, i32) {
    %c0_i32 = arith.constant 0 : i32
    %c0_i32_0 = arith.constant 0 : i32
    return %arg0, %c0_i32 : i32, i32
  }
  func.func @transform_1(%arg0: i32) -> (i32, i32) {
    %c0_i32 = arith.constant 0 : i32
    %c0_i32_0 = arith.constant 0 : i32
    %c0_i32_1 = arith.constant 0 : i32
    return %c0_i32, %c0_i32_0 : i32, i32
  }
  func.func @transform_2(%arg0: i32) -> (i32, i32) {
    %c0_i32 = arith.constant 0 : i32
    %c0_i32_0 = arith.constant 0 : i32
    %c0_i32_1 = arith.constant 0 : i32
    return %c0_i32, %c0_i32_0 : i32, i32
  }
  func.func @transform_3(%arg0: i32) -> (i32, i32) {
    %c0_i32 = arith.constant 0 : i32
    %c0_i32_0 = arith.constant 0 : i32
    return %arg0, %c0_i32 : i32, i32
  }
  func.func @transform_4(%arg0: i32) -> (i32, i32) {
    %c0_i32 = arith.constant 0 : i32
    %c0_i32_0 = arith.constant 0 : i32
    return %arg0, %c0_i32 : i32, i32
  }
}

module attributes {stable_mosaic.version = 11 : i64} {
  func.func @gemm_bias_kernel(%arg0: i32, %arg1: memref<64x1152xbf16, #tpu.memory_space<vmem>>, %arg2: memref<1152x128xbf16, #tpu.memory_space<vmem>>, %arg3: memref<1x128xf32, #tpu.memory_space<vmem>>, %arg4: memref<64x128xf32, #tpu.memory_space<vmem>>) attributes {dimension_semantics = [#tpu.dimension_semantics<parallel>], iteration_bounds = array<i64: 2>, scalar_prefetch = 0 : i64, scratch_operands = 0 : i64, tpu.core_type = #tpu.core_type<tc>, window_params = [{transform_indices = @transform_0, window_bounds = array<i64: 64, 1152>}, {pipeline_mode = #tpu.pipeline_mode<synchronous>, transform_indices = @transform_1, window_bounds = array<i64: 1152, 128>}, {pipeline_mode = #tpu.pipeline_mode<synchronous>, transform_indices = @transform_2, window_bounds = array<i64: 1, 128>}, {transform_indices = @transform_3, window_bounds = array<i64: 64, 128>}]} {
    %c0 = arith.constant 0 : index
    %c0_0 = arith.constant 0 : index
    %0 = vector.load %arg1[%c0, %c0_0] : memref<64x1152xbf16, #tpu.memory_space<vmem>>, vector<64x1152xbf16>
    %c0_1 = arith.constant 0 : index
    %c0_2 = arith.constant 0 : index
    %1 = vector.load %arg2[%c0_1, %c0_2] : memref<1152x128xbf16, #tpu.memory_space<vmem>>, vector<1152x128xbf16>
    %cst = arith.constant dense<0.000000e+00> : vector<64x128xf32>
    %2 = tpu.matmul %0, %1, %cst {dimension_numbers = #tpu.dot_dimension_numbers<[1], [0], [0], [1], [0, 0, 1, 1], [], []>} : vector<64x1152xbf16>, vector<1152x128xbf16>, vector<64x128xf32> -> vector<64x128xf32>
    %c0_3 = arith.constant 0 : index
    %c0_4 = arith.constant 0 : index
    %3 = vector.load %arg3[%c0_3, %c0_4] : memref<1x128xf32, #tpu.memory_space<vmem>>, vector<1x128xf32>
    %4 = vector.broadcast %3 : vector<1x128xf32> to vector<64x128xf32>
    %5 = arith.addf %2, %4 : vector<64x128xf32>
    %cst_5 = arith.constant 0.000000e+00 : f32
    %6 = vector.broadcast %cst_5 : f32 to vector<64x128xf32>
    %7 = arith.maximumf %5, %6 : vector<64x128xf32>
    %c0_6 = arith.constant 0 : index
    %c0_7 = arith.constant 0 : index
    %8 = vector.load %arg4[%c0_6, %c0_7] : memref<64x128xf32, #tpu.memory_space<vmem>>, vector<64x128xf32>
    tpu.vector_store %arg4[%c0_6, %c0_7], %7 {strides = array<i32>} : memref<64x128xf32, #tpu.memory_space<vmem>>, vector<64x128xf32>,
    return
  }
  func.func @transform_0(%arg0: i32) -> (i32, i32) {
    %c0_i32 = arith.constant 0 : i32
    %c0_i32_0 = arith.constant 0 : i32
    return %arg0, %c0_i32 : i32, i32
  }
  func.func @transform_1(%arg0: i32) -> (i32, i32) {
    %c0_i32 = arith.constant 0 : i32
    %c0_i32_0 = arith.constant 0 : i32
    %c0_i32_1 = arith.constant 0 : i32
    return %c0_i32, %c0_i32_0 : i32, i32
  }
  func.func @transform_2(%arg0: i32) -> (i32, i32) {
    %c0_i32 = arith.constant 0 : i32
    %c0_i32_0 = arith.constant 0 : i32
    %c0_i32_1 = arith.constant 0 : i32
    return %c0_i32, %c0_i32_0 : i32, i32
  }
  func.func @transform_3(%arg0: i32) -> (i32, i32) {
    %c0_i32 = arith.constant 0 : i32
    %c0_i32_0 = arith.constant 0 : i32
    return %arg0, %c0_i32 : i32, i32
  }
}

module attributes {stable_mosaic.version = 11 : i64} {
  func.func @pool_fc_kernel(%arg0: i32, %arg1: memref<2x128xbf16, #tpu.memory_space<vmem>>, %arg2: memref<128x128xbf16, #tpu.memory_space<vmem>>, %arg3: memref<128x128xbf16, #tpu.memory_space<vmem>>, %arg4: memref<1x128xf32, #tpu.memory_space<vmem>>, %arg5: memref<2x128xf32, #tpu.memory_space<vmem>>) attributes {dimension_semantics = [#tpu.dimension_semantics<arbitrary>], iteration_bounds = array<i64: 1>, scalar_prefetch = 0 : i64, scratch_operands = 0 : i64, tpu.core_type = #tpu.core_type<tc>, window_params = [{pipeline_mode = #tpu.pipeline_mode<synchronous>, transform_indices = @transform_0, window_bounds = array<i64: 2, 128>}, {pipeline_mode = #tpu.pipeline_mode<synchronous>, transform_indices = @transform_1, window_bounds = array<i64: 128, 128>}, {pipeline_mode = #tpu.pipeline_mode<synchronous>, transform_indices = @transform_2, window_bounds = array<i64: 128, 128>}, {pipeline_mode = #tpu.pipeline_mode<synchronous>, transform_indices = @transform_3, window_bounds = array<i64: 1, 128>}, {pipeline_mode = #tpu.pipeline_mode<synchronous>, transform_indices = @transform_4, window_bounds = array<i64: 2, 128>}]} {
    %c0 = arith.constant 0 : index
    %c0_0 = arith.constant 0 : index
    %0 = vector.load %arg1[%c0, %c0_0] : memref<2x128xbf16, #tpu.memory_space<vmem>>, vector<2x128xbf16>
    %c0_1 = arith.constant 0 : index
    %c0_2 = arith.constant 0 : index
    %1 = vector.load %arg2[%c0_1, %c0_2] : memref<128x128xbf16, #tpu.memory_space<vmem>>, vector<128x128xbf16>
    %cst = arith.constant dense<0.000000e+00> : vector<2x128xf32>
    %2 = tpu.matmul %0, %1, %cst {dimension_numbers = #tpu.dot_dimension_numbers<[1], [0], [0], [1], [0, 0, 1, 1], [], []>} : vector<2x128xbf16>, vector<128x128xbf16>, vector<2x128xf32> -> vector<2x128xf32>
    %3 = arith.truncf %2 : vector<2x128xf32> to vector<2x128xbf16>
    %c0_3 = arith.constant 0 : index
    %c0_4 = arith.constant 0 : index
    %4 = vector.load %arg3[%c0_3, %c0_4] : memref<128x128xbf16, #tpu.memory_space<vmem>>, vector<128x128xbf16>
    %cst_5 = arith.constant dense<0.000000e+00> : vector<2x128xf32>
    %5 = tpu.matmul %3, %4, %cst_5 {dimension_numbers = #tpu.dot_dimension_numbers<[1], [0], [0], [1], [0, 0, 1, 1], [], []>} : vector<2x128xbf16>, vector<128x128xbf16>, vector<2x128xf32> -> vector<2x128xf32>
    %c0_6 = arith.constant 0 : index
    %c0_7 = arith.constant 0 : index
    %6 = vector.load %arg4[%c0_6, %c0_7] : memref<1x128xf32, #tpu.memory_space<vmem>>, vector<1x128xf32>
    %7 = vector.broadcast %6 : vector<1x128xf32> to vector<2x128xf32>
    %8 = arith.addf %5, %7 : vector<2x128xf32>
    %c0_8 = arith.constant 0 : index
    %c0_9 = arith.constant 0 : index
    %9 = vector.load %arg5[%c0_8, %c0_9] : memref<2x128xf32, #tpu.memory_space<vmem>>, vector<2x128xf32>
    tpu.vector_store %arg5[%c0_8, %c0_9], %8 {strides = array<i32>} : memref<2x128xf32, #tpu.memory_space<vmem>>, vector<2x128xf32>,
    return
  }
  func.func @transform_0(%arg0: i32) -> (i32, i32) {
    %c0_i32 = arith.constant 0 : i32
    %c0_i32_0 = arith.constant 0 : i32
    %c0_i32_1 = arith.constant 0 : i32
    return %c0_i32, %c0_i32_0 : i32, i32
  }
  func.func @transform_1(%arg0: i32) -> (i32, i32) {
    %c0_i32 = arith.constant 0 : i32
    %c0_i32_0 = arith.constant 0 : i32
    %c0_i32_1 = arith.constant 0 : i32
    return %c0_i32, %c0_i32_0 : i32, i32
  }
  func.func @transform_2(%arg0: i32) -> (i32, i32) {
    %c0_i32 = arith.constant 0 : i32
    %c0_i32_0 = arith.constant 0 : i32
    %c0_i32_1 = arith.constant 0 : i32
    return %c0_i32, %c0_i32_0 : i32, i32
  }
  func.func @transform_3(%arg0: i32) -> (i32, i32) {
    %c0_i32 = arith.constant 0 : i32
    %c0_i32_0 = arith.constant 0 : i32
    %c0_i32_1 = arith.constant 0 : i32
    return %c0_i32, %c0_i32_0 : i32, i32
  }
  func.func @transform_4(%arg0: i32) -> (i32, i32) {
    %c0_i32 = arith.constant 0 : i32
    %c0_i32_0 = arith.constant 0 : i32
    %c0_i32_1 = arith.constant 0 : i32
    return %c0_i32, %c0_i32_0 : i32, i32
  }
}

module attributes {stable_mosaic.version = 11 : i64} {
  func.func @gemm_dual_kernel(%arg0: i32, %arg1: memref<64x1152xbf16, #tpu.memory_space<vmem>>, %arg2: memref<1152x128xbf16, #tpu.memory_space<vmem>>, %arg3: memref<1x128xf32, #tpu.memory_space<vmem>>, %arg4: memref<64x128xbf16, #tpu.memory_space<vmem>>, %arg5: memref<128x128xbf16, #tpu.memory_space<vmem>>, %arg6: memref<1x128xf32, #tpu.memory_space<vmem>>, %arg7: memref<64x128xf32, #tpu.memory_space<vmem>>) attributes {dimension_semantics = [#tpu.dimension_semantics<parallel>], iteration_bounds = array<i64: 2>, scalar_prefetch = 0 : i64, scratch_operands = 0 : i64, tpu.core_type = #tpu.core_type<tc>, window_params = [{transform_indices = @transform_0, window_bounds = array<i64: 64, 1152>}, {pipeline_mode = #tpu.pipeline_mode<synchronous>, transform_indices = @transform_1, window_bounds = array<i64: 1152, 128>}, {pipeline_mode = #tpu.pipeline_mode<synchronous>, transform_indices = @transform_2, window_bounds = array<i64: 1, 128>}, {transform_indices = @transform_3, window_bounds = array<i64: 64, 128>}, {pipeline_mode = #tpu.pipeline_mode<synchronous>, transform_indices = @transform_4, window_bounds = array<i64: 128, 128>}, {pipeline_mode = #tpu.pipeline_mode<synchronous>, transform_indices = @transform_5, window_bounds = array<i64: 1, 128>}, {transform_indices = @transform_6, window_bounds = array<i64: 64, 128>}]} {
    %c0 = arith.constant 0 : index
    %c0_0 = arith.constant 0 : index
    %0 = vector.load %arg1[%c0, %c0_0] : memref<64x1152xbf16, #tpu.memory_space<vmem>>, vector<64x1152xbf16>
    %c0_1 = arith.constant 0 : index
    %c0_2 = arith.constant 0 : index
    %1 = vector.load %arg2[%c0_1, %c0_2] : memref<1152x128xbf16, #tpu.memory_space<vmem>>, vector<1152x128xbf16>
    %cst = arith.constant dense<0.000000e+00> : vector<64x128xf32>
    %2 = tpu.matmul %0, %1, %cst {dimension_numbers = #tpu.dot_dimension_numbers<[1], [0], [0], [1], [0, 0, 1, 1], [], []>} : vector<64x1152xbf16>, vector<1152x128xbf16>, vector<64x128xf32> -> vector<64x128xf32>
    %c0_3 = arith.constant 0 : index
    %c0_4 = arith.constant 0 : index
    %3 = vector.load %arg3[%c0_3, %c0_4] : memref<1x128xf32, #tpu.memory_space<vmem>>, vector<1x128xf32>
    %4 = vector.broadcast %3 : vector<1x128xf32> to vector<64x128xf32>
    %5 = arith.addf %2, %4 : vector<64x128xf32>
    %c0_5 = arith.constant 0 : index
    %c0_6 = arith.constant 0 : index
    %6 = vector.load %arg4[%c0_5, %c0_6] : memref<64x128xbf16, #tpu.memory_space<vmem>>, vector<64x128xbf16>
    %c0_7 = arith.constant 0 : index
    %c0_8 = arith.constant 0 : index
    %7 = vector.load %arg5[%c0_7, %c0_8] : memref<128x128xbf16, #tpu.memory_space<vmem>>, vector<128x128xbf16>
    %cst_9 = arith.constant dense<0.000000e+00> : vector<64x128xf32>
    %8 = tpu.matmul %6, %7, %cst_9 {dimension_numbers = #tpu.dot_dimension_numbers<[1], [0], [0], [1], [0, 0, 1, 1], [], []>} : vector<64x128xbf16>, vector<128x128xbf16>, vector<64x128xf32> -> vector<64x128xf32>
    %c0_10 = arith.constant 0 : index
    %c0_11 = arith.constant 0 : index
    %9 = vector.load %arg6[%c0_10, %c0_11] : memref<1x128xf32, #tpu.memory_space<vmem>>, vector<1x128xf32>
    %10 = vector.broadcast %9 : vector<1x128xf32> to vector<64x128xf32>
    %11 = arith.addf %8, %10 : vector<64x128xf32>
    %12 = arith.addf %5, %11 : vector<64x128xf32>
    %cst_12 = arith.constant 0.000000e+00 : f32
    %13 = vector.broadcast %cst_12 : f32 to vector<64x128xf32>
    %14 = arith.maximumf %12, %13 : vector<64x128xf32>
    %c0_13 = arith.constant 0 : index
    %c0_14 = arith.constant 0 : index
    %15 = vector.load %arg7[%c0_13, %c0_14] : memref<64x128xf32, #tpu.memory_space<vmem>>, vector<64x128xf32>
    tpu.vector_store %arg7[%c0_13, %c0_14], %14 {strides = array<i32>} : memref<64x128xf32, #tpu.memory_space<vmem>>, vector<64x128xf32>,
    return
  }
  func.func @transform_0(%arg0: i32) -> (i32, i32) {
    %c0_i32 = arith.constant 0 : i32
    %c0_i32_0 = arith.constant 0 : i32
    return %arg0, %c0_i32 : i32, i32
  }
  func.func @transform_1(%arg0: i32) -> (i32, i32) {
    %c0_i32 = arith.constant 0 : i32
    %c0_i32_0 = arith.constant 0 : i32
    %c0_i32_1 = arith.constant 0 : i32
    return %c0_i32, %c0_i32_0 : i32, i32
  }
  func.func @transform_2(%arg0: i32) -> (i32, i32) {
    %c0_i32 = arith.constant 0 : i32
    %c0_i32_0 = arith.constant 0 : i32
    %c0_i32_1 = arith.constant 0 : i32
    return %c0_i32, %c0_i32_0 : i32, i32
  }
  func.func @transform_3(%arg0: i32) -> (i32, i32) {
    %c0_i32 = arith.constant 0 : i32
    %c0_i32_0 = arith.constant 0 : i32
    return %arg0, %c0_i32 : i32, i32
  }
  func.func @transform_4(%arg0: i32) -> (i32, i32) {
    %c0_i32 = arith.constant 0 : i32
    %c0_i32_0 = arith.constant 0 : i32
    %c0_i32_1 = arith.constant 0 : i32
    return %c0_i32, %c0_i32_0 : i32, i32
  }
  func.func @transform_5(%arg0: i32) -> (i32, i32) {
    %c0_i32 = arith.constant 0 : i32
    %c0_i32_0 = arith.constant 0 : i32
    %c0_i32_1 = arith.constant 0 : i32
    return %c0_i32, %c0_i32_0 : i32, i32
  }
  func.func @transform_6(%arg0: i32) -> (i32, i32) {
    %c0_i32 = arith.constant 0 : i32
    %c0_i32_0 = arith.constant 0 : i32
    return %arg0, %c0_i32 : i32, i32
  }
}

</mosaic_0001>

<bundles_post_ra>
// kernel: _lambda_.6
= control target key start
LH: loop header
LB: loop body
LE: loop exit
PB: predicated region body
PF: predicated region fallthrough
CT: control target
= control target key end

     0   :  { %s796_s12 = smov 0   ;;  %s925_s0 = inlined_call_operand.vmem [shape: bf16[512,256], index: 0, kind: input, shape index: {}]   ;;  %s926_s1 = inlined_call_operand.vmem [shape: bf16[256,128], index: 1, kind: input, shape index: {}]   ;;  %s927_s2 = inlined_call_operand.vmem [shape: f32[1,128], index: 2, kind: input, shape index: {}]   ;;  %s928_s3 = inlined_call_operand.vmem [shape: f32[512,128], index: 3, kind: output, shape index: {}]  }
   0x1 LB: > { %s594_s13 = sadd.s32 4294967295, %s774_s12   ;;  %p598_p0 = scmp.ge.s32.totalorder %s774_s12, 1  ;;  %s774_s12 = sphi %s796_s12, %s13_s12  }
   0x2   : > { %p139_p1 = scmp.lt.s32.totalorder %s774_s12, 5 }
   0x4   : > { %p140_p2 = pnand %p598_p0, %p139_p1 }
   0x5   : > { %v728_v0 = vld [vmem:[%s926_s1 + $0x40] sm:$0xff] (!%p140_p2)   ;;  %s599_s16 = sshll.u32 (!%p140_p2), %s594_s13, 4  ;;  %v730_v2 = vld [vmem:[%s926_s1 + $0x48] sm:$0xff] (!%p140_p2)   ;;  %v732_v4 = vld [vmem:[%s926_s1 + $0x50] sm:$0xff] (!%p140_p2)  }
   0x6   : > { %143 = sbr.rel (%p140_p2) target bundleno = 284 (0x11c), region = 32  ;;  %v729_v1 = vld [vmem:[%s926_s1] sm:$0xff] (!%p140_p2)   ;;  %640 = vmatprep.subr.bf16.mxu0 (!%p140_p2), %v728_v0  ;;  %704 = vmatprep.subr.bf16.mxu1 (!%p140_p2), %v728_v0  ;;  %v731_v3 = vld [vmem:[%s926_s1 + $0x8] sm:$0xff] (!%p140_p2)   ;;  %p165_p3 = scmp.lt.s32.totalorder (!%p140_p2), %s599_s16, 63  ;;  %v733_v5 = vld [vmem:[%s926_s1 + $0x10] sm:$0xff] (!%p140_p2)  }
   0x7   : > { %641 = vmatpush3.bf16.msra.mxu0 (!%p140_p2), %v729_v1  ;;  %712 = vmatpush3.bf16.msra.mxu1 (!%p140_p2), %v729_v1  ;;  %v734_v6 = vld [vmem:[%s926_s1 + $0x58] sm:$0xff] (!%p140_p2)   ;;  %v736_v8 = vld [vmem:[%s926_s1 + $0x60] sm:$0xff] (!%p140_p2)   ;;  %v738_v10 = vld [vmem:[%s926_s1 + $0x68] sm:$0xff] (!%p140_p2)  }
   0x8   : > { %642 = vmatprep.subr.bf16.mxu0 (!%p140_p2), %v730_v2  ;;  %705 = vmatprep.subr.bf16.mxu1 (!%p140_p2), %v730_v2  ;;  %v735_v7 = vld [vmem:[%s926_s1 + $0x18] sm:$0xff] (!%p140_p2)   ;;  %v737_v9 = vld [vmem:[%s926_s1 + $0x20] sm:$0xff] (!%p140_p2)   ;;  %v739_v13 = vld [vmem:[%s926_s1 + $0x28] sm:$0xff] (!%p140_p2)  }
   0x9   : > { %v740_v14 = vld [vmem:[%s926_s1 + $0x70] sm:$0xff] (!%p140_p2)   ;;  %v742_v16 = vld [vmem:[%s926_s1 + $0x78] sm:$0xff] (!%p140_p2)   ;;  %v881_v34 = vld [vmem:[%s927_s2] ss:$0 sm:$0xff] (!%p140_p2) }
   0xa   : > { %v741_v15 = vld [vmem:[%s926_s1 + $0x30] sm:$0xff] (!%p140_p2)   ;;  %v743_v17 = vld [vmem:[%s926_s1 + $0x38] sm:$0xff] (!%p140_p2)  }
   0xb   : > { %643 = vmatpush3.bf16.msra.mxu0 (!%p140_p2), %v731_v3  ;;  %713 = vmatpush3.bf16.msra.mxu1 (!%p140_p2), %v731_v3 }
   0xc   : > { %644 = vmatprep.subr.bf16.mxu0 (!%p140_p2), %v732_v4  ;;  %706 = vmatprep.subr.bf16.mxu1 (!%p140_p2), %v732_v4 }
   0xd   : > { %s930_s16 = smov (!%p165_p3, %s599_s16), 63 }
   0xe   : > { %s639_s4 = sshll.u32 %s930_s16, 3 }
   0xf   : > { %645 = vmatpush3.bf16.msra.mxu0 %v733_v5  ;;  %714 = vmatpush3.bf16.msra.mxu1 %v733_v5  ;;  %s839_s9 = scalar_lea.vmem %s925_s0, %s639_s4  ;;  %s890_s30 = scalar_lea.vmem %s928_s3, %s639_s4 }
  0x10   : > { %646 = vmatprep.subr.bf16.mxu0 %v734_v6  ;;  %707 = vmatprep.subr.bf16.mxu1 %v734_v6  ;;  %v746_v11 = vld [vmem:[%s839_s9 + $0x4] ss:$8 sps:$4 sm:$0xff]   ;;  %v744_v18 = vld [vmem:[%s839_s9] ss:$8 sps:$4 sm:$0xff]   ;;  %v750_v20 = vld [vmem:[%s839_s9 + $0x14] ss:$8 sps:$4 sm:$0xff]  }
  0x11   : > { %v749_v12 = vld [vmem:[%s839_s9 + $0x44] ss:$8 sps:$4 sm:$0xff]   ;;  %441 = vmatprep.mubr.bf16.mxu0 %v746_v11  ;;  %v747_v19 = vld [vmem:[%s839_s9 + $0x40] ss:$8 sps:$4 sm:$0xff]   ;;  %v752_v21 = vld [vmem:[%s839_s9 + $0x54] ss:$8 sps:$4 sm:$0xff]  }
  0x12   : > { %473 = vmatprep.mubr.bf16.mxu1 %v749_v12  ;;  %v754_v22 = vld [vmem:[%s839_s9 + $0x10] ss:$8 sps:$4 sm:$0xff]   ;;  %v756_v24 = vld [vmem:[%s839_s9 + $0x24] ss:$8 sps:$4 sm:$0xff]   ;;  %v760_v26 = vld [vmem:[%s839_s9 + $0x20] ss:$8 sps:$4 sm:$0xff]  }
  0x13   : > { %647 = vmatpush3.bf16.msra.mxu0 %v735_v7  ;;  %715 = vmatpush3.bf16.msra.mxu1 %v735_v7  ;;  %v755_v23 = vld [vmem:[%s839_s9 + $0x50] ss:$8 sps:$4 sm:$0xff]   ;;  %v758_v25 = vld [vmem:[%s839_s9 + $0x64] ss:$8 sps:$4 sm:$0xff]   ;;  %v761_v27 = vld [vmem:[%s839_s9 + $0x60] ss:$8 sps:$4 sm:$0xff]  }
  0x14   : > { %648 = vmatprep.subr.bf16.mxu0 %v736_v8  ;;  %708 = vmatprep.subr.bf16.mxu1 %v736_v8  ;;  %v762_v28 = vld [vmem:[%s839_s9 + $0x34] ss:$8 sps:$4 sm:$0xff]   ;;  %v766_v30 = vld [vmem:[%s839_s9 + $0x30] ss:$8 sps:$4 sm:$0xff]  }
  0x15   : > { %v764_v29 = vld [vmem:[%s839_s9 + $0x74] ss:$8 sps:$4 sm:$0xff]   ;;  %v767_v31 = vld [vmem:[%s839_s9 + $0x70] ss:$8 sps:$4 sm:$0xff]  }
  0x17   : > { %649 = vmatpush3.bf16.msra.mxu0 %v737_v9  ;;  %716 = vmatpush3.bf16.msra.mxu1 %v737_v9 }
  0x18   : > { %650 = vmatprep.subr.bf16.mxu0 %v738_v10  ;;  %709 = vmatprep.subr.bf16.mxu1 %v738_v10 }
  0x1b   : > { %651 = vmatpush3.bf16.msra.mxu0 %v739_v13  ;;  %717 = vmatpush3.bf16.msra.mxu1 %v739_v13 }
  0x1c   : > { %652 = vmatprep.subr.bf16.mxu0 %v740_v14  ;;  %710 = vmatprep.subr.bf16.mxu1 %v740_v14 }
  0x1f   : > { %653 = vmatpush3.bf16.msra.mxu0 %v741_v15  ;;  %718 = vmatpush3.bf16.msra.mxu1 %v741_v15 }
  0x20   : > { %654 = vmatprep.subr.bf16.mxu0 %v742_v16  ;;  %711 = vmatprep.subr.bf16.mxu1 %v742_v16 }
  0x23   : > { %655 = vmatpush3.bf16.msra.mxu0 %v743_v17  ;;  %719 = vmatpush3.bf16.msra.mxu1 %v743_v17 }
  0x26   : > { %442 = vmatmul.mubr.bf16.vlgmr.msra.gmra.mrb[0].mxu0 %v744_v18  ;;  %474 = vmatmul.mubr.bf16.vlgmr.msra.gmra.mrb[0].mxu1 %v747_v19 }
  0x27   : > { %449 = vmatprep.mubr.bf16.mxu0 %v750_v20  ;;  %481 = vmatprep.mubr.bf16.mxu1 %v752_v21 }
  0x2e   : > { %450 = vmatmul.mubr.bf16.gmra.mrb[4].mxu0 %v754_v22  ;;  %482 = vmatmul.mubr.bf16.gmra.mrb[4].mxu1 %v755_v23 }
  0x2f   : > { %457 = vmatprep.mubr.bf16.mxu0 %v756_v24  ;;  %489 = vmatprep.mubr.bf16.mxu1 %v758_v25 }
  0x36   : > { %458 = vmatmul.mubr.bf16.gmra.mrb[8].mxu0 %v760_v26  ;;  %490 = vmatmul.mubr.bf16.gmra.mrb[8].mxu1 %v761_v27 }
  0x37   : > { %465 = vmatprep.mubr.bf16.mxu0 %v762_v28  ;;  %497 = vmatprep.mubr.bf16.mxu1 %v764_v29 }
  0x3e   : > { %466 = vmatmul.mubr.bf16.gmra.mrb[12].mxu0 %v766_v30  ;;  %498 = vmatmul.mubr.bf16.gmra.mrb[12].mxu1 %v767_v31 }
  0xf9   : > { %v656_v32 = vpop.f32.mrb[0].mxu0  ;;  %v680_v33 = vpop.f32.mrb[0].mxu1 }
  0xfa   : > { %v657_v35 = vpop.f32.mrb[1].mxu0  ;;  %v681_v36 = vpop.f32.mrb[1].mxu1 }
  0xfb   : > { %v658_v37 = vadd.f32 %v657_v35, %v656_v32  ;;  %v682_v38 = vadd.f32 %v681_v36, %v680_v33  ;;  %v659_v39 = vpop.f32.mrb[2].mxu0  ;;  %v683_v40 = vpop.f32.mrb[2].mxu1 }
  0xfc   : > { %v660_v41 = vpop.f32.mrb[3].mxu0  ;;  %v684_v42 = vpop.f32.mrb[3].mxu1 }
  0xfd   : > { %v444_v43 = vadd.f32 %v658_v37, %v881_v34  ;;  %v476_v44 = vadd.f32 %v682_v38, %v881_v34  ;;  %v661_v45 = vadd.f32 %v660_v41, %v659_v39  ;;  %v685_v46 = vadd.f32 %v684_v42, %v683_v40 }
  0xff   : > { %v506_v47 = vmax.f32 %v444_v43, 0.0  ;;  %v514_v48 = vmax.f32 %v476_v44, 0.0  ;;  %v447_v49 = vadd.f32 %v661_v45, %v881_v34  ;;  %v479_v50 = vadd.f32 %v685_v46, %v881_v34 }
 0x101   : > { %522 = vst [vmem:[%s890_s30] sm:$0xff] %v506_v47  ;;  %530 = vst [vmem:[%s890_s30 + $0x40] sm:$0xff] %v514_v48  ;;  %v507_v51 = vmax.f32 %v447_v49, 0.0  ;;  %v515_v52 = vmax.f32 %v479_v50, 0.0  ;;  %v662_v53 = vpop.f32.mrb[4].mxu0  ;;  %v686_v54 = vpop.f32.mrb[4].mxu1 }
 0x102   : > { %v663_v55 = vpop.f32.mrb[5].mxu0  ;;  %v687_v56 = vpop.f32.mrb[5].mxu1 }
 0x103   : > { %523 = vst [vmem:[%s890_s30 + $0x8] sm:$0xff] %v507_v51  ;;  %531 = vst [vmem:[%s890_s30 + $0x48] sm:$0xff] %v515_v52  ;;  %v664_v57 = vadd.f32 %v663_v55, %v662_v53  ;;  %v688_v58 = vadd.f32 %v687_v56, %v686_v54  ;;  %v665_v59 = vpop.f32.mrb[6].mxu0  ;;  %v689_v60 = vpop.f32.mrb[6].mxu1 }
 0x104   : > { %v666_v61 = vpop.f32.mrb[7].mxu0  ;;  %v690_v62 = vpop.f32.mrb[7].mxu1 }
 0x105   : > { %v452_v63 = vadd.f32 %v664_v57, %v881_v34  ;;  %v484_v0 = vadd.f32 %v688_v58, %v881_v34  ;;  %v667_v1 = vadd.f32 %v666_v61, %v665_v59  ;;  %v691_v2 = vadd.f32 %v690_v62, %v689_v60 }
 0x107   : > { %v508_v3 = vmax.f32 %v452_v63, 0.0  ;;  %v516_v4 = vmax.f32 %v484_v0, 0.0  ;;  %v455_v5 = vadd.f32 %v667_v1, %v881_v34  ;;  %v487_v6 = vadd.f32 %v691_v2, %v881_v34 }
 0x109   : > { %524 = vst [vmem:[%s890_s30 + $0x10] sm:$0xff] %v508_v3  ;;  %532 = vst [vmem:[%s890_s30 + $0x50] sm:$0xff] %v516_v4  ;;  %v509_v7 = vmax.f32 %v455_v5, 0.0  ;;  %v517_v8 = vmax.f32 %v487_v6, 0.0  ;;  %v668_v9 = vpop.f32.mrb[8].mxu0  ;;  %v692_v10 = vpop.f32.mrb[8].mxu1 }
 0x10a   : > { %v669_v11 = vpop.f32.mrb[9].mxu0  ;;  %v693_v12 = vpop.f32.mrb[9].mxu1 }
 0x10b   : > { %525 = vst [vmem:[%s890_s30 + $0x18] sm:$0xff] %v509_v7  ;;  %533 = vst [vmem:[%s890_s30 + $0x58] sm:$0xff] %v517_v8  ;;  %v670_v13 = vadd.f32 %v669_v11, %v668_v9  ;;  %v694_v14 = vadd.f32 %v693_v12, %v692_v10  ;;  %v671_v15 = vpop.f32.mrb[10].mxu0  ;;  %v695_v16 = vpop.f32.mrb[10].mxu1 }
 0x10c   : > { %v672_v17 = vpop.f32.mrb[11].mxu0  ;;  %v696_v18 = vpop.f32.mrb[11].mxu1 }
 0x10d   : > { %v460_v19 = vadd.f32 %v670_v13, %v881_v34  ;;  %v492_v20 = vadd.f32 %v694_v14, %v881_v34  ;;  %v673_v21 = vadd.f32 %v672_v17, %v671_v15  ;;  %v697_v22 = vadd.f32 %v696_v18, %v695_v16 }
 0x10f   : > { %v510_v23 = vmax.f32 %v460_v19, 0.0  ;;  %v518_v24 = vmax.f32 %v492_v20, 0.0  ;;  %v463_v25 = vadd.f32 %v673_v21, %v881_v34  ;;  %v495_v26 = vadd.f32 %v697_v22, %v881_v34 }
 0x111   : > { %526 = vst [vmem:[%s890_s30 + $0x20] sm:$0xff] %v510_v23  ;;  %534 = vst [vmem:[%s890_s30 + $0x60] sm:$0xff] %v518_v24  ;;  %v511_v27 = vmax.f32 %v463_v25, 0.0  ;;  %v519_v28 = vmax.f32 %v495_v26, 0.0  ;;  %v674_v29 = vpop.f32.mrb[12].mxu0  ;;  %v698_v30 = vpop.f32.mrb[12].mxu1 }
 0x112   : > { %v675_v31 = vpop.f32.mrb[13].mxu0  ;;  %v699_v32 = vpop.f32.mrb[13].mxu1 }
 0x113   : > { %527 = vst [vmem:[%s890_s30 + $0x28] sm:$0xff] %v511_v27  ;;  %535 = vst [vmem:[%s890_s30 + $0x68] sm:$0xff] %v519_v28  ;;  %v676_v33 = vadd.f32 %v675_v31, %v674_v29  ;;  %v700_v35 = vadd.f32 %v699_v32, %v698_v30  ;;  %v677_v36 = vpop.f32.mrb[14].mxu0  ;;  %v701_v37 = vpop.f32.mrb[14].mxu1 }
 0x114   : > { %v678_v38 = vpop.f32.mrb[15].mxu0  ;;  %v702_v39 = vpop.f32.mrb[15].mxu1 }
 0x115   : > { %v468_v40 = vadd.f32 %v676_v33, %v881_v34  ;;  %v500_v41 = vadd.f32 %v700_v35, %v881_v34  ;;  %v679_v42 = vadd.f32 %v678_v38, %v677_v36  ;;  %v703_v43 = vadd.f32 %v702_v39, %v701_v37 }
 0x117   : > { %v512_v44 = vmax.f32 %v468_v40, 0.0  ;;  %v520_v45 = vmax.f32 %v500_v41, 0.0  ;;  %v471_v46 = vadd.f32 %v679_v42, %v881_v34  ;;  %v503_v47 = vadd.f32 %v703_v43, %v881_v34 }
 0x119   : > { %528 = vst [vmem:[%s890_s30 + $0x30] sm:$0xff] %v512_v44  ;;  %536 = vst [vmem:[%s890_s30 + $0x70] sm:$0xff] %v520_v45  ;;  %v513_v48 = vmax.f32 %v471_v46, 0.0  ;;  %v521_v49 = vmax.f32 %v503_v47, 0.0 }
 0x11b   : > { %529 = vst [vmem:[%s890_s30 + $0x38] sm:$0xff] %v513_v48  ;;  %537 = vst [vmem:[%s890_s30 + $0x78] sm:$0xff] %v521_v49 }
 0x11c PF: > { %s13_s12 = sadd.s32 1, %s774_s12  }
 0x11d   : > { %p10_p4 = scmp.ge.s32.totalorder %s13_s12, 6  }
 0x11f   :  { %12 = sbr.rel (!%p10_p4) target bundleno = 1 (0x1), region = 62 }

// kernel: _lambda_.7
= control target key start
LH: loop header
LB: loop body
LE: loop exit
PB: predicated region body
PF: predicated region fallthrough
CT: control target
= control target key end

     0   :  { %s2471_s12 = smov 0   ;;  %s2901_s0 = inlined_call_operand.vmem [shape: bf16[512,1152], index: 0, kind: input, shape index: {}]   ;;  %s2902_s1 = inlined_call_operand.vmem [shape: bf16[1152,128], index: 1, kind: input, shape index: {}]   ;;  %s2903_s2 = inlined_call_operand.vmem [shape: f32[1,128], index: 2, kind: input, shape index: {}]   ;;  %s2904_s3 = inlined_call_operand.vmem [shape: f32[512,128], index: 3, kind: output, shape index: {}]  }
   0x1 LB: > { %s1782_s13 = sadd.s32 4294967295, %s2449_s12   ;;  %p1786_p0 = scmp.ge.s32.totalorder %s2449_s12, 1  ;;  %s2449_s12 = sphi %s2471_s12, %s13_s12  }
   0x2   : > { %p139_p1 = scmp.lt.s32.totalorder %s2449_s12, 5 }
   0x4   : > { %p140_p2 = pnand %p1786_p0, %p139_p1 }
   0x5   : > { %v2267_v0 = vld [vmem:[%s2902_s1 + $0x40] sm:$0xff] (!%p140_p2)   ;;  %v2271_v4 = vld [vmem:[%s2902_s1 + $0x48] sm:$0xff] (!%p140_p2)   ;;  %v2275_v8 = vld [vmem:[%s2902_s1 + $0x50] sm:$0xff] (!%p140_p2)   ;;  %s1787_s19 = sshll.u32 (!%p140_p2), %s1782_s13, 4 }
   0x6   : > { %143 = sbr.rel (%p140_p2) target bundleno = 396 (0x18c), region = 32  ;;  %v2268_v1 = vld [vmem:[%s2902_s1 + $0xc0] sm:$0xff] (!%p140_p2)   ;;  %1938 = vmatprep.subr.bf16.mxu0 (!%p140_p2), %v2267_v0  ;;  %v2272_v5 = vld [vmem:[%s2902_s1 + $0xc8] sm:$0xff] (!%p140_p2)   ;;  %v2276_v9 = vld [vmem:[%s2902_s1 + $0xd0] sm:$0xff] (!%p140_p2)   ;;  %p165_p3 = scmp.lt.s32.totalorder (!%p140_p2), %s1787_s19, 63 }
   0x7   : > { %v2269_v2 = vld [vmem:[%s2902_s1] sm:$0xff] (!%p140_p2)   ;;  %2002 = vmatprep.subr.bf16.mxu1 (!%p140_p2), %v2268_v1  ;;  %v2273_v6 = vld [vmem:[%s2902_s1 + $0x8] sm:$0xff] (!%p140_p2)   ;;  %v2277_v10 = vld [vmem:[%s2902_s1 + $0x10] sm:$0xff] (!%p140_p2)  }
   0x8   : > { %v2270_v3 = vld [vmem:[%s2902_s1 + $0x80] sm:$0xff] (!%p140_p2)   ;;  %1939 = vmatpush3.bf16.msra.mxu0 (!%p140_p2), %v2269_v2  ;;  %v2274_v7 = vld [vmem:[%s2902_s1 + $0x88] sm:$0xff] (!%p140_p2)   ;;  %v2278_v11 = vld [vmem:[%s2902_s1 + $0x90] sm:$0xff] (!%p140_p2)  }
   0x9   : > { %2003 = vmatpush3.bf16.msra.mxu1 (!%p140_p2), %v2270_v3  ;;  %1940 = vmatprep.subr.bf16.mxu0 (!%p140_p2), %v2271_v4  ;;  %v2279_v12 = vld [vmem:[%s2902_s1 + $0x58] sm:$0xff] (!%p140_p2)   ;;  %v2283_v16 = vld [vmem:[%s2902_s1 + $0x60] sm:$0xff] (!%p140_p2)   ;;  %v2287_v20 = vld [vmem:[%s2902_s1 + $0x68] sm:$0xff] (!%p140_p2)  }
   0xa   : > { %2004 = vmatprep.subr.bf16.mxu1 (!%p140_p2), %v2272_v5  ;;  %v2280_v13 = vld [vmem:[%s2902_s1 + $0xd8] sm:$0xff] (!%p140_p2)   ;;  %v2284_v17 = vld [vmem:[%s2902_s1 + $0xe0] sm:$0xff] (!%p140_p2)   ;;  %v2288_v21 = vld [vmem:[%s2902_s1 + $0xe8] sm:$0xff] (!%p140_p2)  }
   0xb   : > { %v2281_v14 = vld [vmem:[%s2902_s1 + $0x18] sm:$0xff] (!%p140_p2)   ;;  %v2285_v18 = vld [vmem:[%s2902_s1 + $0x20] sm:$0xff] (!%p140_p2)   ;;  %v2289_v22 = vld [vmem:[%s2902_s1 + $0x28] sm:$0xff] (!%p140_p2)  }
   0xc   : > { %1941 = vmatpush3.bf16.msra.mxu0 (!%p140_p2), %v2273_v6  ;;  %v2282_v15 = vld [vmem:[%s2902_s1 + $0x98] sm:$0xff] (!%p140_p2)   ;;  %v2286_v19 = vld [vmem:[%s2902_s1 + $0xa0] sm:$0xff] (!%p140_p2)   ;;  %v2290_v23 = vld [vmem:[%s2902_s1 + $0xa8] sm:$0xff] (!%p140_p2)  }
   0xd   : > { %2005 = vmatpush3.bf16.msra.mxu1 %v2274_v7  ;;  %1942 = vmatprep.subr.bf16.mxu0 %v2275_v8  ;;  %s2906_s19 = smov (!%p165_p3, %s1787_s19), 63  ;;  %v2291_v24 = vld [vmem:[%s2902_s1 + $0x70] sm:$0xff]   ;;  %v2295_v28 = vld [vmem:[%s2902_s1 + $0x78] sm:$0xff]   ;;  %v2305_v36 = vld [vmem:[%s2902_s1 + $0x140] sm:$0xff]  }
   0xe   : > { %2006 = vmatprep.subr.bf16.mxu1 %v2276_v9  ;;  %v2292_v25 = vld [vmem:[%s2902_s1 + $0xf0] sm:$0xff]   ;;  %s2258_s16 = smul.u32 36, %s2906_s19  ;;  %v2296_v29 = vld [vmem:[%s2902_s1 + $0xf8] sm:$0xff]   ;;  %v2306_v37 = vld [vmem:[%s2902_s1 + $0x1c0] sm:$0xff]  }
   0xf   : > { %v2293_v26 = vld [vmem:[%s2902_s1 + $0x30] sm:$0xff]   ;;  %v2297_v30 = vld [vmem:[%s2902_s1 + $0x38] sm:$0xff]   ;;  %v2307_v38 = vld [vmem:[%s2902_s1 + $0x100] sm:$0xff]  }
  0x10   : > { %1943 = vmatpush3.bf16.msra.mxu0 %v2277_v10  ;;  %v2294_v27 = vld [vmem:[%s2902_s1 + $0xb0] sm:$0xff]   ;;  %s2577_s13 = scalar_lea.vmem %s2901_s0, %s2258_s16  ;;  %v2298_v31 = vld [vmem:[%s2902_s1 + $0xb8] sm:$0xff]   ;;  %v2308_v39 = vld [vmem:[%s2902_s1 + $0x180] sm:$0xff]  }
  0x11   : > { %2007 = vmatpush3.bf16.msra.mxu1 %v2278_v11  ;;  %1944 = vmatprep.subr.bf16.mxu0 %v2279_v12  ;;  %v2299_v32 = vld [vmem:[%s2577_s13] ss:$36 sps:$4 sm:$0xff]   ;;  %v2302_v34 = vld [vmem:[%s2577_s13 + $0x8] ss:$36 sps:$4 sm:$0xff]   ;;  %v2311_v41 = vld [vmem:[%s2577_s13 + $0x54] ss:$36 sps:$4 sm:$0xff]  }
  0x12   : > { %2008 = vmatprep.subr.bf16.mxu1 %v2280_v13  ;;  %v2301_v33 = vld [vmem:[%s2577_s13 + $0x4] ss:$36 sps:$4 sm:$0xff]   ;;  %v2304_v35 = vld [vmem:[%s2577_s13 + $0xc] ss:$36 sps:$4 sm:$0xff]   ;;  %v2319_v48 = vld [vmem:[%s2577_s13 + $0x94] ss:$36 sps:$4 sm:$0xff]  }
  0x13   : > { %1241 = vmatprep.mubr.bf16.mxu0 %v2301_v33  ;;  %1338 = vmatprep.mubr.bf16.mxu1 %v2304_v35  ;;  %v2309_v40 = vld [vmem:[%s2577_s13 + $0x4c] ss:$36 sps:$4 sm:$0xff]   ;;  %v2321_v49 = vld [vmem:[%s2577_s13 + $0x9c] ss:$36 sps:$4 sm:$0xff]   ;;  %v2331_v57 = vld [vmem:[%s2577_s13 + $0xe4] ss:$36 sps:$4 sm:$0xff]  }
  0x14   : > { %1945 = vmatpush3.bf16.msra.mxu0 %v2281_v14  ;;  %v2313_v42 = vld [vmem:[%s2577_s13 + $0x48] ss:$36 sps:$4 sm:$0xff]   ;;  %v2314_v43 = vld [vmem:[%s2577_s13 + $0x50] ss:$36 sps:$4 sm:$0xff]   ;;  %v2324_v51 = vld [vmem:[%s2577_s13 + $0x98] ss:$36 sps:$4 sm:$0xff]  }
  0x15   : > { %2009 = vmatpush3.bf16.msra.mxu1 %v2282_v15  ;;  %1946 = vmatprep.subr.bf16.mxu0 %v2283_v16  ;;  %v2315_v44 = vld [vmem:[%s2902_s1 + $0x148] sm:$0xff]   ;;  %v2323_v50 = vld [vmem:[%s2577_s13 + $0x90] ss:$36 sps:$4 sm:$0xff]   ;;  %v2329_v56 = vld [vmem:[%s2577_s13 + $0xdc] ss:$36 sps:$4 sm:$0xff]  }
  0x16   : > { %2010 = vmatprep.subr.bf16.mxu1 %v2284_v17  ;;  %v2316_v45 = vld [vmem:[%s2902_s1 + $0x1c8] sm:$0xff]   ;;  %v2325_v52 = vld [vmem:[%s2902_s1 + $0x150] sm:$0xff]   ;;  %v2333_v58 = vld [vmem:[%s2577_s13 + $0xd8] ss:$36 sps:$4 sm:$0xff]  }
  0x17   : > { %v2317_v46 = vld [vmem:[%s2902_s1 + $0x108] sm:$0xff]   ;;  %v2326_v53 = vld [vmem:[%s2902_s1 + $0x1d0] sm:$0xff]   ;;  %v2334_v59 = vld [vmem:[%s2577_s13 + $0xe0] ss:$36 sps:$4 sm:$0xff]  }
  0x18   : > { %1947 = vmatpush3.bf16.msra.mxu0 %v2285_v18  ;;  %v2318_v47 = vld [vmem:[%s2902_s1 + $0x188] sm:$0xff]   ;;  %v2327_v54 = vld [vmem:[%s2902_s1 + $0x110] sm:$0xff]   ;;  %v2335_v60 = vld [vmem:[%s2902_s1 + $0x158] sm:$0xff]  }
  0x19   : > { %2011 = vmatpush3.bf16.msra.mxu1 %v2286_v19  ;;  %1948 = vmatprep.subr.bf16.mxu0 %v2287_v20  ;;  %v2328_v55 = vld [vmem:[%s2902_s1 + $0x190] sm:$0xff]   ;;  %v2336_v61 = vld [vmem:[%s2902_s1 + $0x1d8] sm:$0xff]   ;;  %v2339_v0 = vld [vmem:[%s2577_s13 + $0x124] ss:$36 sps:$4 sm:$0xff]  }
  0x1a   : > { %2012 = vmatprep.subr.bf16.mxu1 %v2288_v21  ;;  %v2337_v62 = vld [vmem:[%s2902_s1 + $0x118] sm:$0xff]   ;;  %v2341_v1 = vld [vmem:[%s2577_s13 + $0x12c] ss:$36 sps:$4 sm:$0xff]   ;;  %v2343_v2 = vld [vmem:[%s2577_s13 + $0x120] ss:$36 sps:$4 sm:$0xff]  }
  0x1b   : > { %v2338_v63 = vld [vmem:[%s2902_s1 + $0x198] sm:$0xff]   ;;  %v2345_v3 = vld [vmem:[%s2902_s1 + $0x160] sm:$0xff]   ;;  %v2344_v4 = vld [vmem:[%s2577_s13 + $0x128] ss:$36 sps:$4 sm:$0xff]  }
  0x1c   : > { %1949 = vmatpush3.bf16.msra.mxu0 %v2289_v22  ;;  %v2346_v5 = vld [vmem:[%s2902_s1 + $0x1e0] sm:$0xff]   ;;  %v2349_v8 = vld [vmem:[%s2577_s13 + $0x16c] ss:$36 sps:$4 sm:$0xff]   ;;  %v2351_v9 = vld [vmem:[%s2577_s13 + $0x174] ss:$36 sps:$4 sm:$0xff]  }
  0x1d   : > { %2013 = vmatpush3.bf16.msra.mxu1 %v2290_v23  ;;  %1950 = vmatprep.subr.bf16.mxu0 %v2291_v24  ;;  %v2347_v6 = vld [vmem:[%s2902_s1 + $0x120] sm:$0xff]   ;;  %v2355_v10 = vld [vmem:[%s2902_s1 + $0x168] sm:$0xff]   ;;  %v2354_v15 = vld [vmem:[%s2577_s13 + $0x170] ss:$36 sps:$4 sm:$0xff]  }
  0x1e   : > { %2014 = vmatprep.subr.bf16.mxu1 %v2292_v25  ;;  %v2348_v7 = vld [vmem:[%s2902_s1 + $0x1a0] sm:$0xff]   ;;  %v2356_v11 = vld [vmem:[%s2902_s1 + $0x1e8] sm:$0xff]   ;;  %v2359_v16 = vld [vmem:[%s2577_s13 + $0x1b4] ss:$36 sps:$4 sm:$0xff]  }
  0x1f   : > { %v2353_v12 = vld [vmem:[%s2577_s13 + $0x168] ss:$36 sps:$4 sm:$0xff]   ;;  %v2361_v17 = vld [vmem:[%s2577_s13 + $0x1bc] ss:$36 sps:$4 sm:$0xff]   ;;  %v2365_v18 = vld [vmem:[%s2902_s1 + $0x170] sm:$0xff]  }
  0x20   : > { %1951 = vmatpush3.bf16.msra.mxu0 %v2293_v26  ;;  %v2357_v13 = vld [vmem:[%s2902_s1 + $0x128] sm:$0xff]   ;;  %v2366_v19 = vld [vmem:[%s2902_s1 + $0x1f0] sm:$0xff]   ;;  %v2364_v23 = vld [vmem:[%s2577_s13 + $0x1b8] ss:$36 sps:$4 sm:$0xff]  }
  0x21   : > { %2015 = vmatpush3.bf16.msra.mxu1 %v2294_v27  ;;  %1952 = vmatprep.subr.bf16.mxu0 %v2295_v28  ;;  %v2358_v14 = vld [vmem:[%s2902_s1 + $0x1a8] sm:$0xff]   ;;  %v2367_v20 = vld [vmem:[%s2902_s1 + $0x130] sm:$0xff]   ;;  %v2369_v24 = vld [vmem:[%s2577_s13 + $0x1fc] ss:$36 sps:$4 sm:$0xff]  }
  0x22   : > { %2016 = vmatprep.subr.bf16.mxu1 %v2296_v29  ;;  %v2368_v21 = vld [vmem:[%s2902_s1 + $0x1b0] sm:$0xff]   ;;  %v2371_v25 = vld [vmem:[%s2577_s13 + $0x204] ss:$36 sps:$4 sm:$0xff]   ;;  %v2375_v26 = vld [vmem:[%s2902_s1 + $0x178] sm:$0xff]  }
  0x23   : > { %v2363_v22 = vld [vmem:[%s2577_s13 + $0x1b0] ss:$36 sps:$4 sm:$0xff]   ;;  %v2376_v27 = vld [vmem:[%s2902_s1 + $0x1f8] sm:$0xff]  }
  0x24   : > { %1953 = vmatpush3.bf16.msra.mxu0 %v2297_v30  ;;  %v2377_v28 = vld [vmem:[%s2902_s1 + $0x138] sm:$0xff]   ;;  %v2379_v35 = vld [vmem:[%s2577_s13 + $0x10] ss:$36 sps:$4 sm:$0xff]  }
  0x25   : > { %2017 = vmatpush3.bf16.msra.mxu1 %v2298_v31  ;;  %2066 = vmatprep.subr.bf16.mxu0 %v2305_v36  ;;  %v2378_v29 = vld [vmem:[%s2902_s1 + $0x1b8] sm:$0xff]   ;;  %v2374_v31 = vld [vmem:[%s2577_s13 + $0x200] ss:$36 sps:$4 sm:$0xff]  }
  0x26   : > { %2130 = vmatprep.subr.bf16.mxu1 %v2306_v37  ;;  %v2373_v30 = vld [vmem:[%s2577_s13 + $0x1f8] ss:$36 sps:$4 sm:$0xff]  }
  0x27   : > { %1242 = vmatmul.mubr.bf16.vlgmr.msra.gmra.mrb[0].mxu0 %v2299_v32  ;;  %v2385_v32 = vld [vmem:[%s2902_s1 + $0x200] sm:$0xff]   ;;  %v2381_v33 = vld [vmem:[%s2577_s13 + $0x14] ss:$36 sps:$4 sm:$0xff]  }
  0x28   : > { %1339 = vmatmul.mubr.bf16.vlgmr.msra.gmra.mrb[0].mxu1 %v2302_v34  ;;  %2067 = vmatpush3.bf16.msra.mxu0 %v2307_v38  ;;  %v2384_v34 = vld [vmem:[%s2577_s13 + $0x1c] ss:$36 sps:$4 sm:$0xff]   ;;  %v2388_v38 = vld [vmem:[%s2577_s13 + $0x64] ss:$36 sps:$4 sm:$0xff]  }
  0x29   : > { %2131 = vmatpush3.bf16.msra.mxu1 %v2308_v39  ;;  %1249 = vmatprep.mubr.bf16.mxu0 %v2309_v40  ;;  %v2382_v36 = vld [vmem:[%s2577_s13 + $0x18] ss:$36 sps:$4 sm:$0xff]   ;;  %v2392_v39 = vld [vmem:[%s2902_s1 + $0x208] sm:$0xff]   ;;  %v2399_v40 = vld [vmem:[%s2902_s1 + $0x210] sm:$0xff]  }
  0x2a   : > { %1346 = vmatprep.mubr.bf16.mxu1 %v2311_v41  ;;  %2068 = vmatprep.subr.bf16.mxu0 %v2315_v44  ;;  %v2386_v37 = vld [vmem:[%s2577_s13 + $0x5c] ss:$36 sps:$4 sm:$0xff]   ;;  %v2395_v44 = vld [vmem:[%s2577_s13 + $0xac] ss:$36 sps:$4 sm:$0xff]  }
  0x2b   : > { %2132 = vmatprep.subr.bf16.mxu1 %v2316_v45  ;;  %v2390_v41 = vld [vmem:[%s2577_s13 + $0x58] ss:$36 sps:$4 sm:$0xff]  }
  0x2c   : > { %2069 = vmatpush3.bf16.msra.mxu0 %v2317_v46  ;;  %v2406_v45 = vld [vmem:[%s2902_s1 + $0x218] sm:$0xff]   ;;  %v2413_v46 = vld [vmem:[%s2902_s1 + $0x220] sm:$0xff]  }
  0x2d   : > { %2133 = vmatpush3.bf16.msra.mxu1 %v2318_v47  ;;  %2070 = vmatprep.subr.bf16.mxu0 %v2325_v52  ;;  %v2397_v47 = vld [vmem:[%s2577_s13 + $0xa0] ss:$36 sps:$4 sm:$0xff]   ;;  %v2404_v52 = vld [vmem:[%s2577_s13 + $0xe8] ss:$36 sps:$4 sm:$0xff]  }
  0x2e   : > { %2134 = vmatprep.subr.bf16.mxu1 %v2326_v53  ;;  %v2427_v53 = vld [vmem:[%s2902_s1 + $0x230] sm:$0xff]  }
  0x2f   : > { %1250 = vmatmul.mubr.bf16.gmra.mrb[4].mxu0 %v2313_v42  ;;  %v2391_v42 = vld [vmem:[%s2577_s13 + $0x60] ss:$36 sps:$4 sm:$0xff]  }
  0x30   : > { %1347 = vmatmul.mubr.bf16.gmra.mrb[4].mxu1 %v2314_v43  ;;  %1257 = vmatprep.mubr.bf16.mxu0 %v2319_v48  ;;  %v2393_v43 = vld [vmem:[%s2577_s13 + $0xa4] ss:$36 sps:$4 sm:$0xff]  }
  0x31   : > { %1354 = vmatprep.mubr.bf16.mxu1 %v2321_v49  ;;  %2071 = vmatpush3.bf16.msra.mxu0 %v2327_v54  ;;  %v2398_v48 = vld [vmem:[%s2577_s13 + $0xa8] ss:$36 sps:$4 sm:$0xff]   ;;  %v2405_v54 = vld [vmem:[%s2577_s13 + $0xf0] ss:$36 sps:$4 sm:$0xff]  }
  0x32   : > { %2135 = vmatpush3.bf16.msra.mxu1 %v2328_v55  ;;  %2072 = vmatprep.subr.bf16.mxu0 %v2335_v60  ;;  %v2400_v49 = vld [vmem:[%s2577_s13 + $0xec] ss:$36 sps:$4 sm:$0xff]   ;;  %v2407_v55 = vld [vmem:[%s2577_s13 + $0x134] ss:$36 sps:$4 sm:$0xff]   ;;  %v2414_v60 = vld [vmem:[%s2577_s13 + $0x17c] ss:$36 sps:$4 sm:$0xff]  }
  0x33   : > { %2136 = vmatprep.subr.bf16.mxu1 %v2336_v61  ;;  %v2416_v61 = vld [vmem:[%s2577_s13 + $0x184] ss:$36 sps:$4 sm:$0xff]  }
  0x35   : > { %2073 = vmatpush3.bf16.msra.mxu0 %v2337_v62  ;;  %v2418_v62 = vld [vmem:[%s2577_s13 + $0x178] ss:$36 sps:$4 sm:$0xff]  }
  0x36   : > { %2137 = vmatpush3.bf16.msra.mxu1 %v2338_v63  ;;  %2074 = vmatprep.subr.bf16.mxu0 %v2345_v3  ;;  %v2419_v63 = vld [vmem:[%s2577_s13 + $0x180] ss:$36 sps:$4 sm:$0xff]   ;;  %v2426_v3 = vld [vmem:[%s2577_s13 + $0x1c8] ss:$36 sps:$4 sm:$0xff]  }
  0x37   : > { %1258 = vmatmul.mubr.bf16.gmra.mrb[8].mxu0 %v2323_v50  ;;  %2138 = vmatprep.subr.bf16.mxu1 %v2346_v5  ;;  %v2402_v50 = vld [vmem:[%s2577_s13 + $0xf4] ss:$36 sps:$4 sm:$0xff]  }
  0x38   : > { %1355 = vmatmul.mubr.bf16.gmra.mrb[8].mxu1 %v2324_v51  ;;  %1265 = vmatprep.mubr.bf16.mxu0 %v2329_v56  ;;  %v2420_v51 = vld [vmem:[%s2902_s1 + $0x228] sm:$0xff]   ;;  %v2409_v56 = vld [vmem:[%s2577_s13 + $0x13c] ss:$36 sps:$4 sm:$0xff]   ;;  %v2430_v5 = vld [vmem:[%s2577_s13 + $0x214] ss:$36 sps:$4 sm:$0xff]  }
  0x39   : > { %1362 = vmatprep.mubr.bf16.mxu1 %v2331_v57  ;;  %2075 = vmatpush3.bf16.msra.mxu0 %v2347_v6  ;;  %v2434_v57 = vld [vmem:[%s2902_s1 + $0x238] sm:$0xff]   ;;  %v2432_v6 = vld [vmem:[%s2577_s13 + $0x208] ss:$36 sps:$4 sm:$0xff]  }
  0x3a   : > { %2139 = vmatpush3.bf16.msra.mxu1 %v2348_v7  ;;  %2076 = vmatprep.subr.bf16.mxu0 %v2355_v10  ;;  %v2433_v7 = vld [vmem:[%s2577_s13 + $0x210] ss:$36 sps:$4 sm:$0xff]   ;;  %v2437_v10 = vld [vmem:[%s2577_s13 + $0x68] ss:$36 sps:$4 sm:$0xff]  }
  0x3b   : > { %2140 = vmatprep.subr.bf16.mxu1 %v2356_v11  ;;  %v2438_v11 = vld [vmem:[%s2577_s13 + $0x188] ss:$36 sps:$4 sm:$0xff]  }
  0x3d   : > { %2077 = vmatpush3.bf16.msra.mxu0 %v2357_v13  ;;  %v2440_v13 = vld [vmem:[%s2577_s13 + $0x1d0] ss:$36 sps:$4 sm:$0xff]  }
  0x3e   : > { %2141 = vmatpush3.bf16.msra.mxu1 %v2358_v14  ;;  %2078 = vmatprep.subr.bf16.mxu0 %v2365_v18  ;;  %v2441_v14 = vld [vmem:[%s2577_s13 + $0xf8] ss:$36 sps:$4 sm:$0xff]   ;;  %v2780_v18 = vld [vmem:[%s2903_s2] ss:$0 sm:$0xff] }
  0x3f   : > { %1266 = vmatmul.mubr.bf16.gmra.mrb[12].mxu0 %v2333_v58  ;;  %2142 = vmatprep.subr.bf16.mxu1 %v2366_v19  ;;  %v2411_v58 = vld [vmem:[%s2577_s13 + $0x130] ss:$36 sps:$4 sm:$0xff]  }
  0x40   : > { %1363 = vmatmul.mubr.bf16.gmra.mrb[12].mxu1 %v2334_v59  ;;  %1273 = vmatprep.mubr.bf16.mxu0 %v2339_v0  ;;  %v2412_v59 = vld [vmem:[%s2577_s13 + $0x138] ss:$36 sps:$4 sm:$0xff]   ;;  %v2421_v0 = vld [vmem:[%s2577_s13 + $0x1c4] ss:$36 sps:$4 sm:$0xff]  }
  0x41   : > { %1370 = vmatprep.mubr.bf16.mxu1 %v2341_v1  ;;  %2079 = vmatpush3.bf16.msra.mxu0 %v2367_v20  ;;  %v2423_v1 = vld [vmem:[%s2577_s13 + $0x1cc] ss:$36 sps:$4 sm:$0xff]  }
  0x42   : > { %2143 = vmatpush3.bf16.msra.mxu1 %v2368_v21  ;;  %2080 = vmatprep.subr.bf16.mxu0 %v2375_v26 }
  0x43   : > { %2144 = vmatprep.subr.bf16.mxu1 %v2376_v27 }
  0x45   : > { %2081 = vmatpush3.bf16.msra.mxu0 %v2377_v28 }
  0x46   : > { %2145 = vmatpush3.bf16.msra.mxu1 %v2378_v29  ;;  %2210 = vmatprep.subr.bf16.mxu0 %v2385_v32 }
  0x47   : > { %1274 = vmatmul.mubr.bf16.gmra.mrb[16].mxu0 %v2343_v2  ;;  %2242 = vmatprep.subr.bf16.mxu1 %v2385_v32  ;;  %v2425_v2 = vld [vmem:[%s2577_s13 + $0x1c0] ss:$36 sps:$4 sm:$0xff]  }
  0x48   : > { %1371 = vmatmul.mubr.bf16.gmra.mrb[16].mxu1 %v2344_v4  ;;  %1281 = vmatprep.mubr.bf16.mxu0 %v2349_v8  ;;  %v2428_v4 = vld [vmem:[%s2577_s13 + $0x20c] ss:$36 sps:$4 sm:$0xff]   ;;  %v2435_v8 = vld [vmem:[%s2577_s13 + $0x20] ss:$36 sps:$4 sm:$0xff]  }
  0x49   : > { %1378 = vmatprep.mubr.bf16.mxu1 %v2351_v9  ;;  %v2436_v9 = vld [vmem:[%s2577_s13 + $0x140] ss:$36 sps:$4 sm:$0xff]  }
  0x4f   : > { %1282 = vmatmul.mubr.bf16.gmra.mrb[20].mxu0 %v2353_v12  ;;  %v2439_v12 = vld [vmem:[%s2577_s13 + $0xb0] ss:$36 sps:$4 sm:$0xff]  }
  0x50   : > { %1379 = vmatmul.mubr.bf16.gmra.mrb[20].mxu1 %v2354_v15  ;;  %1289 = vmatprep.mubr.bf16.mxu0 %v2359_v16  ;;  %v2442_v15 = vld [vmem:[%s2577_s13 + $0x218] ss:$36 sps:$4 sm:$0xff]   ;;  %s1790_s13 = sshll.u32 %s2906_s19, 3 }
  0x51   : > { %1386 = vmatprep.mubr.bf16.mxu1 %v2361_v17  ;;  %s2871_s20 = scalar_lea.vmem %s2904_s3, %s1790_s13 }
  0x57   : > { %1290 = vmatmul.mubr.bf16.gmra.mrb[24].mxu0 %v2363_v22 }
  0x58   : > { %1387 = vmatmul.mubr.bf16.gmra.mrb[24].mxu1 %v2364_v23  ;;  %1297 = vmatprep.mubr.bf16.mxu0 %v2369_v24 }
  0x59   : > { %1394 = vmatprep.mubr.bf16.mxu1 %v2371_v25 }
  0x5f   : > { %1298 = vmatmul.mubr.bf16.gmra.mrb[28].mxu0 %v2373_v30 }
  0x60   : > { %1395 = vmatmul.mubr.bf16.gmra.mrb[28].mxu1 %v2374_v31  ;;  %1435 = vmatprep.mubr.bf16.mxu0 %v2381_v33 }
  0x61   : > { %1532 = vmatprep.mubr.bf16.mxu1 %v2384_v34 }
  0x67   : > { %1436 = vmatmul.mubr.bf16.vlgmr.msra.gmra.mrb[32].mxu0 %v2379_v35 }
  0x68   : > { %1533 = vmatmul.mubr.bf16.vlgmr.msra.gmra.mrb[32].mxu1 %v2382_v36  ;;  %2211 = vmatpush3.bf16.msra.mxu0 %v2385_v32 }
  0x69   : > { %2250 = vmatpush3.bf16.msra.mxu1 %v2385_v32  ;;  %1443 = vmatprep.mubr.bf16.mxu0 %v2386_v37 }
  0x6a   : > { %1540 = vmatprep.mubr.bf16.mxu1 %v2388_v38  ;;  %2212 = vmatprep.subr.bf16.mxu0 %v2392_v39 }
  0x6b   : > { %2243 = vmatprep.subr.bf16.mxu1 %v2392_v39 }
  0x6c   : > { %2213 = vmatpush3.bf16.msra.mxu0 %v2392_v39 }
  0x6d   : > { %2251 = vmatpush3.bf16.msra.mxu1 %v2392_v39  ;;  %2214 = vmatprep.subr.bf16.mxu0 %v2399_v40 }
  0x6e   : > { %2244 = vmatprep.subr.bf16.mxu1 %v2399_v40 }
  0x6f   : > { %1444 = vmatmul.mubr.bf16.gmra.mrb[36].mxu0 %v2390_v41 }
  0x70   : > { %1541 = vmatmul.mubr.bf16.gmra.mrb[36].mxu1 %v2391_v42  ;;  %1451 = vmatprep.mubr.bf16.mxu0 %v2393_v43 }
  0x71   : > { %1548 = vmatprep.mubr.bf16.mxu1 %v2395_v44  ;;  %2215 = vmatpush3.bf16.msra.mxu0 %v2399_v40 }
  0x72   : > { %2252 = vmatpush3.bf16.msra.mxu1 %v2399_v40  ;;  %2216 = vmatprep.subr.bf16.mxu0 %v2406_v45 }
  0x73   : > { %2245 = vmatprep.subr.bf16.mxu1 %v2406_v45 }
  0x75   : > { %2217 = vmatpush3.bf16.msra.mxu0 %v2406_v45 }
  0x76   : > { %2253 = vmatpush3.bf16.msra.mxu1 %v2406_v45  ;;  %2218 = vmatprep.subr.bf16.mxu0 %v2413_v46 }
  0x77   : > { %1452 = vmatmul.mubr.bf16.gmra.mrb[40].mxu0 %v2397_v47  ;;  %2246 = vmatprep.subr.bf16.mxu1 %v2413_v46 }
  0x78   : > { %1549 = vmatmul.mubr.bf16.gmra.mrb[40].mxu1 %v2398_v48  ;;  %1459 = vmatprep.mubr.bf16.mxu0 %v2400_v49 }
  0x79   : > { %1556 = vmatprep.mubr.bf16.mxu1 %v2402_v50  ;;  %2219 = vmatpush3.bf16.msra.mxu0 %v2413_v46 }
  0x7a   : > { %2254 = vmatpush3.bf16.msra.mxu1 %v2413_v46  ;;  %2220 = vmatprep.subr.bf16.mxu0 %v2420_v51 }
  0x7b   : > { %2247 = vmatprep.subr.bf16.mxu1 %v2420_v51 }
  0x7d   : > { %2221 = vmatpush3.bf16.msra.mxu0 %v2420_v51 }
  0x7e   : > { %2255 = vmatpush3.bf16.msra.mxu1 %v2420_v51  ;;  %2222 = vmatprep.subr.bf16.mxu0 %v2427_v53 }
  0x7f   : > { %1460 = vmatmul.mubr.bf16.gmra.mrb[44].mxu0 %v2404_v52  ;;  %2248 = vmatprep.subr.bf16.mxu1 %v2427_v53 }
  0x80   : > { %1557 = vmatmul.mubr.bf16.gmra.mrb[44].mxu1 %v2405_v54  ;;  %1467 = vmatprep.mubr.bf16.mxu0 %v2407_v55 }
  0x81   : > { %1564 = vmatprep.mubr.bf16.mxu1 %v2409_v56  ;;  %2223 = vmatpush3.bf16.msra.mxu0 %v2427_v53 }
  0x82   : > { %2256 = vmatpush3.bf16.msra.mxu1 %v2427_v53  ;;  %2224 = vmatprep.subr.bf16.mxu0 %v2434_v57 }
  0x83   : > { %2249 = vmatprep.subr.bf16.mxu1 %v2434_v57 }
  0x85   : > { %2225 = vmatpush3.bf16.msra.mxu0 %v2434_v57 }
  0x86   : > { %2257 = vmatpush3.bf16.msra.mxu1 %v2434_v57 }
  0x87   : > { %1468 = vmatmul.mubr.bf16.gmra.mrb[48].mxu0 %v2411_v58 }
  0x88   : > { %1565 = vmatmul.mubr.bf16.gmra.mrb[48].mxu1 %v2412_v59  ;;  %1475 = vmatprep.mubr.bf16.mxu0 %v2414_v60 }
  0x89   : > { %1572 = vmatprep.mubr.bf16.mxu1 %v2416_v61 }
  0x8f   : > { %1476 = vmatmul.mubr.bf16.gmra.mrb[52].mxu0 %v2418_v62 }
  0x90   : > { %1573 = vmatmul.mubr.bf16.gmra.mrb[52].mxu1 %v2419_v63  ;;  %1483 = vmatprep.mubr.bf16.mxu0 %v2421_v0 }
  0x91   : > { %1580 = vmatprep.mubr.bf16.mxu1 %v2423_v1 }
  0x97   : > { %1484 = vmatmul.mubr.bf16.gmra.mrb[56].mxu0 %v2425_v2 }
  0x98   : > { %1581 = vmatmul.mubr.bf16.gmra.mrb[56].mxu1 %v2426_v3  ;;  %1491 = vmatprep.mubr.bf16.mxu0 %v2428_v4 }
  0x99   : > { %1588 = vmatprep.mubr.bf16.mxu1 %v2430_v5 }
  0x9f   : > { %1492 = vmatmul.mubr.bf16.gmra.mrb[60].mxu0 %v2432_v6 }
  0xa0   : > { %1589 = vmatmul.mubr.bf16.gmra.mrb[60].mxu1 %v2433_v7  ;;  %2226 = vmatprep.mubr.bf16.mxu0 %v2435_v8 }
  0xa1   : > { %2234 = vmatprep.mubr.bf16.mxu1 %v2436_v9 }
  0xa7   : > { %2227 = vmatmul.mubr.bf16.vlgmr.msra.gmra.mrb[64].mxu0 %v2437_v10 }
  0xa8   : > { %2235 = vmatmul.mubr.bf16.vlgmr.msra.gmra.mrb[64].mxu1 %v2438_v11  ;;  %2230 = vmatprep.mubr.bf16.mxu0 %v2439_v12 }
  0xa9   : > { %2238 = vmatprep.mubr.bf16.mxu1 %v2440_v13 }
  0xaf   : > { %2231 = vmatmul.mubr.bf16.gmra.mrb[68].mxu0 %v2441_v14 }
  0xb0   : > { %2239 = vmatmul.mubr.bf16.gmra.mrb[68].mxu1 %v2442_v15 }
  0xfa   : > { %v1954_v16 = vpop.f32.mrb[0].mxu0 }
  0xfb   : > { %v2018_v17 = vpop.f32.mrb[0].mxu1  ;;  %v1955_v19 = vpop.f32.mrb[1].mxu0 }
  0xfc   : > { %v1956_v20 = vadd.f32 %v1955_v19, %v1954_v16  ;;  %v2019_v21 = vpop.f32.mrb[1].mxu1  ;;  %v1957_v22 = vpop.f32.mrb[2].mxu0 }
  0xfd   : > { %v2020_v23 = vadd.f32 %v2019_v21, %v2018_v17  ;;  %v2021_v24 = vpop.f32.mrb[2].mxu1  ;;  %v1958_v25 = vpop.f32.mrb[3].mxu0 }
  0xfe   : > { %v1244_v26 = vadd.f32 %v1956_v20, %v2780_v18  ;;  %v1959_v27 = vadd.f32 %v1958_v25, %v1957_v22  ;;  %v2022_v28 = vpop.f32.mrb[3].mxu1 }
  0xff   : > { %v2023_v29 = vadd.f32 %v2022_v28, %v2021_v24 }
 0x100   : > { %v2783_v30 = vadd.f32 %v2020_v23, %v1244_v26  ;;  %v1247_v31 = vadd.f32 %v1959_v27, %v2780_v18 }
 0x102   : > { %v2786_v32 = vadd.f32 %v2023_v29, %v1247_v31  ;;  %v1960_v33 = vpop.f32.mrb[4].mxu0 }
 0x103   : > { %v2024_v34 = vpop.f32.mrb[4].mxu1  ;;  %v1961_v35 = vpop.f32.mrb[5].mxu0 }
 0x104   : > { %v1962_v36 = vadd.f32 %v1961_v35, %v1960_v33  ;;  %v2025_v37 = vpop.f32.mrb[5].mxu1  ;;  %v1963_v38 = vpop.f32.mrb[6].mxu0 }
 0x105   : > { %v2026_v39 = vadd.f32 %v2025_v37, %v2024_v34  ;;  %v2027_v40 = vpop.f32.mrb[6].mxu1  ;;  %v1964_v41 = vpop.f32.mrb[7].mxu0 }
 0x106   : > { %v1252_v42 = vadd.f32 %v1962_v36, %v2780_v18  ;;  %v1965_v43 = vadd.f32 %v1964_v41, %v1963_v38  ;;  %v2028_v44 = vpop.f32.mrb[7].mxu1 }
 0x107   : > { %v2029_v45 = vadd.f32 %v2028_v44, %v2027_v40 }
 0x108   : > { %v2789_v46 = vadd.f32 %v2026_v39, %v1252_v42  ;;  %v1255_v47 = vadd.f32 %v1965_v43, %v2780_v18 }
 0x10a   : > { %v2792_v48 = vadd.f32 %v2029_v45, %v1255_v47  ;;  %v1966_v49 = vpop.f32.mrb[8].mxu0 }
 0x10b   : > { %v2030_v50 = vpop.f32.mrb[8].mxu1  ;;  %v1967_v51 = vpop.f32.mrb[9].mxu0 }
 0x10c   : > { %v1968_v52 = vadd.f32 %v1967_v51, %v1966_v49  ;;  %v2031_v53 = vpop.f32.mrb[9].mxu1  ;;  %v1969_v54 = vpop.f32.mrb[10].mxu0 }
 0x10d   : > { %v2032_v55 = vadd.f32 %v2031_v53, %v2030_v50  ;;  %v2033_v56 = vpop.f32.mrb[10].mxu1  ;;  %v1970_v57 = vpop.f32.mrb[11].mxu0 }
 0x10e   : > { %v1260_v58 = vadd.f32 %v1968_v52, %v2780_v18  ;;  %v1971_v59 = vadd.f32 %v1970_v57, %v1969_v54  ;;  %v2034_v60 = vpop.f32.mrb[11].mxu1 }
 0x10f   : > { %v2035_v61 = vadd.f32 %v2034_v60, %v2033_v56 }
 0x110   : > { %v2795_v62 = vadd.f32 %v2032_v55, %v1260_v58  ;;  %v1263_v63 = vadd.f32 %v1971_v59, %v2780_v18 }
 0x112   : > { %v2798_v0 = vadd.f32 %v2035_v61, %v1263_v63  ;;  %v1972_v1 = vpop.f32.mrb[12].mxu0 }
 0x113   : > { %v2036_v2 = vpop.f32.mrb[12].mxu1  ;;  %v1973_v3 = vpop.f32.mrb[13].mxu0 }
 0x114   : > { %v1974_v4 = vadd.f32 %v1973_v3, %v1972_v1  ;;  %v2037_v5 = vpop.f32.mrb[13].mxu1  ;;  %v1975_v6 = vpop.f32.mrb[14].mxu0 }
 0x115   : > { %v2038_v7 = vadd.f32 %v2037_v5, %v2036_v2  ;;  %v2039_v8 = vpop.f32.mrb[14].mxu1  ;;  %v1976_v9 = vpop.f32.mrb[15].mxu0 }
 0x116   : > { %v1268_v10 = vadd.f32 %v1974_v4, %v2780_v18  ;;  %v1977_v11 = vadd.f32 %v1976_v9, %v1975_v6  ;;  %v2040_v12 = vpop.f32.mrb[15].mxu1 }
 0x117   : > { %v2041_v13 = vadd.f32 %v2040_v12, %v2039_v8 }
 0x118   : > { %v2801_v14 = vadd.f32 %v2038_v7, %v1268_v10  ;;  %v1271_v15 = vadd.f32 %v1977_v11, %v2780_v18 }
 0x11a   : > { %v2804_v16 = vadd.f32 %v2041_v13, %v1271_v15  ;;  %v1978_v17 = vpop.f32.mrb[16].mxu0 }
 0x11b   : > { %v2042_v19 = vpop.f32.mrb[16].mxu1  ;;  %v1979_v20 = vpop.f32.mrb[17].mxu0 }
 0x11c   : > { %v1980_v21 = vadd.f32 %v1979_v20, %v1978_v17  ;;  %v2043_v22 = vpop.f32.mrb[17].mxu1  ;;  %v1981_v23 = vpop.f32.mrb[18].mxu0 }
 0x11d   : > { %v2044_v24 = vadd.f32 %v2043_v22, %v2042_v19  ;;  %v2045_v25 = vpop.f32.mrb[18].mxu1  ;;  %v1982_v26 = vpop.f32.mrb[19].mxu0 }
 0x11e   : > { %v1276_v27 = vadd.f32 %v1980_v21, %v2780_v18  ;;  %v1983_v28 = vadd.f32 %v1982_v26, %v1981_v23  ;;  %v2046_v29 = vpop.f32.mrb[19].mxu1 }
 0x11f   : > { %v2047_v31 = vadd.f32 %v2046_v29, %v2045_v25 }
 0x120   : > { %v2807_v33 = vadd.f32 %v2044_v24, %v1276_v27  ;;  %v1279_v34 = vadd.f32 %v1983_v28, %v2780_v18 }
 0x122   : > { %v2810_v35 = vadd.f32 %v2047_v31, %v1279_v34  ;;  %v1984_v36 = vpop.f32.mrb[20].mxu0 }
 0x123   : > { %v2048_v37 = vpop.f32.mrb[20].mxu1  ;;  %v1985_v38 = vpop.f32.mrb[21].mxu0 }
 0x124   : > { %v1986_v39 = vadd.f32 %v1985_v38, %v1984_v36  ;;  %v2049_v40 = vpop.f32.mrb[21].mxu1  ;;  %v1987_v41 = vpop.f32.mrb[22].mxu0 }
 0x125   : > { %v2050_v42 = vadd.f32 %v2049_v40, %v2048_v37  ;;  %v2051_v43 = vpop.f32.mrb[22].mxu1  ;;  %v1988_v44 = vpop.f32.mrb[23].mxu0 }
 0x126   : > { %v1284_v45 = vadd.f32 %v1986_v39, %v2780_v18  ;;  %v1989_v47 = vadd.f32 %v1988_v44, %v1987_v41  ;;  %v2052_v49 = vpop.f32.mrb[23].mxu1 }
 0x127   : > { %v2053_v50 = vadd.f32 %v2052_v49, %v2051_v43 }
 0x128   : > { %v2813_v51 = vadd.f32 %v2050_v42, %v1284_v45  ;;  %v1287_v52 = vadd.f32 %v1989_v47, %v2780_v18 }
 0x12a   : > { %v2816_v53 = vadd.f32 %v2053_v50, %v1287_v52  ;;  %v1990_v54 = vpop.f32.mrb[24].mxu0 }
 0x12b   : > { %v2054_v55 = vpop.f32.mrb[24].mxu1  ;;  %v1991_v56 = vpop.f32.mrb[25].mxu0 }
 0x12c   : > { %v1992_v57 = vadd.f32 %v1991_v56, %v1990_v54  ;;  %v2055_v58 = vpop.f32.mrb[25].mxu1  ;;  %v1993_v59 = vpop.f32.mrb[26].mxu0 }
 0x12d   : > { %v2056_v60 = vadd.f32 %v2055_v58, %v2054_v55  ;;  %v2057_v61 = vpop.f32.mrb[26].mxu1  ;;  %v1994_v63 = vpop.f32.mrb[27].mxu0 }
 0x12e   : > { %v1292_v1 = vadd.f32 %v1992_v57, %v2780_v18  ;;  %v1995_v2 = vadd.f32 %v1994_v63, %v1993_v59  ;;  %v2058_v3 = vpop.f32.mrb[27].mxu1 }
 0x12f   : > { %v2059_v4 = vadd.f32 %v2058_v3, %v2057_v61 }
 0x130   : > { %v2819_v5 = vadd.f32 %v2056_v60, %v1292_v1  ;;  %v1295_v6 = vadd.f32 %v1995_v2, %v2780_v18 }
 0x132   : > { %v2822_v7 = vadd.f32 %v2059_v4, %v1295_v6  ;;  %v1996_v8 = vpop.f32.mrb[28].mxu0 }
 0x133   : > { %v2060_v9 = vpop.f32.mrb[28].mxu1  ;;  %v1997_v10 = vpop.f32.mrb[29].mxu0 }
 0x134   : > { %v1998_v11 = vadd.f32 %v1997_v10, %v1996_v8  ;;  %v2061_v12 = vpop.f32.mrb[29].mxu1  ;;  %v1999_v13 = vpop.f32.mrb[30].mxu0 }
 0x135   : > { %v2062_v15 = vadd.f32 %v2061_v12, %v2060_v9  ;;  %v2063_v17 = vpop.f32.mrb[30].mxu1  ;;  %v2000_v19 = vpop.f32.mrb[31].mxu0 }
 0x136   : > { %v1300_v20 = vadd.f32 %v1998_v11, %v2780_v18  ;;  %v2001_v21 = vadd.f32 %v2000_v19, %v1999_v13  ;;  %v2064_v22 = vpop.f32.mrb[31].mxu1 }
 0x137   : > { %v2065_v23 = vadd.f32 %v2064_v22, %v2063_v17 }
 0x138   : > { %v2825_v24 = vadd.f32 %v2062_v15, %v1300_v20  ;;  %v1303_v25 = vadd.f32 %v2001_v21, %v2780_v18 }
 0x13a   : > { %v2828_v26 = vadd.f32 %v2065_v23, %v1303_v25  ;;  %v2082_v27 = vpop.f32.mrb[32].mxu0 }
 0x13b   : > { %v2146_v28 = vpop.f32.mrb[32].mxu1  ;;  %v2083_v29 = vpop.f32.mrb[33].mxu0 }
 0x13c   : > { %v2084_v31 = vadd.f32 %v2083_v29, %v2082_v27  ;;  %v2147_v34 = vpop.f32.mrb[33].mxu1  ;;  %v2085_v36 = vpop.f32.mrb[34].mxu0 }
 0x13d   : > { %v2148_v37 = vadd.f32 %v2147_v34, %v2146_v28  ;;  %v2149_v38 = vpop.f32.mrb[34].mxu1  ;;  %v2086_v39 = vpop.f32.mrb[35].mxu0 }
 0x13e   : > { %v1438_v40 = vadd.f32 %v2084_v31, %v2783_v30  ;;  %v2087_v41 = vadd.f32 %v2086_v39, %v2085_v36  ;;  %v2150_v42 = vpop.f32.mrb[35].mxu1 }
 0x13f   : > { %v2151_v43 = vadd.f32 %v2150_v42, %v2149_v38 }
 0x140   : > { %v1441_v44 = vadd.f32 %v2087_v41, %v2786_v32  ;;  %v2832_v45 = vadd.f32 %v2148_v37, %v1438_v40 }
 0x142   : > { %v2088_v18 = vpop.f32.mrb[36].mxu0  ;;  %v2834_v47 = vadd.f32 %v2151_v43, %v1441_v44 }
 0x143   : > { %v2152_v49 = vpop.f32.mrb[36].mxu1  ;;  %v2089_v50 = vpop.f32.mrb[37].mxu0 }
 0x144   : > { %v2090_v52 = vadd.f32 %v2089_v50, %v2088_v18  ;;  %v2153_v54 = vpop.f32.mrb[37].mxu1  ;;  %v2091_v55 = vpop.f32.mrb[38].mxu0 }
 0x145   : > { %v2154_v56 = vadd.f32 %v2153_v54, %v2152_v49  ;;  %v2155_v57 = vpop.f32.mrb[38].mxu1  ;;  %v2092_v58 = vpop.f32.mrb[39].mxu0 }
 0x146   : > { %v1446_v30 = vadd.f32 %v2090_v52, %v2789_v46  ;;  %v2093_v59 = vadd.f32 %v2092_v58, %v2091_v55  ;;  %v2156_v60 = vpop.f32.mrb[39].mxu1 }
 0x147   : > { %v2157_v61 = vadd.f32 %v2156_v60, %v2155_v57 }
 0x148   : > { %v1449_v32 = vadd.f32 %v2093_v59, %v2792_v48  ;;  %v2838_v63 = vadd.f32 %v2154_v56, %v1446_v30 }
 0x14a   : > { %v2094_v1 = vpop.f32.mrb[40].mxu0  ;;  %v2840_v2 = vadd.f32 %v2157_v61, %v1449_v32 }
 0x14b   : > { %v2158_v3 = vpop.f32.mrb[40].mxu1  ;;  %v2095_v4 = vpop.f32.mrb[41].mxu0 }
 0x14c   : > { %v2096_v6 = vadd.f32 %v2095_v4, %v2094_v1  ;;  %v2159_v8 = vpop.f32.mrb[41].mxu1  ;;  %v2097_v9 = vpop.f32.mrb[42].mxu0 }
 0x14d   : > { %v2160_v10 = vadd.f32 %v2159_v8, %v2158_v3  ;;  %v2161_v11 = vpop.f32.mrb[42].mxu1  ;;  %v2098_v12 = vpop.f32.mrb[43].mxu0 }
 0x14e   : > { %v1454_v46 = vadd.f32 %v2096_v6, %v2795_v62  ;;  %v2099_v13 = vadd.f32 %v2098_v12, %v2097_v9  ;;  %v2162_v15 = vpop.f32.mrb[43].mxu1 }
 0x14f   : > { %v2163_v17 = vadd.f32 %v2162_v15, %v2161_v11 }
 0x150   : > { %v1457_v48 = vadd.f32 %v2099_v13, %v2798_v0  ;;  %v2844_v19 = vadd.f32 %v2160_v10, %v1454_v46 }
 0x152   : > { %v2100_v20 = vpop.f32.mrb[44].mxu0  ;;  %v2846_v21 = vadd.f32 %v2163_v17, %v1457_v48 }
 0x153   : > { %v2164_v22 = vpop.f32.mrb[44].mxu1  ;;  %v2101_v23 = vpop.f32.mrb[45].mxu0 }
 0x154   : > { %v2102_v25 = vadd.f32 %v2101_v23, %v2100_v20  ;;  %v2165_v27 = vpop.f32.mrb[45].mxu1  ;;  %v2103_v28 = vpop.f32.mrb[46].mxu0 }
 0x155   : > { %v2166_v29 = vadd.f32 %v2165_v27, %v2164_v22  ;;  %v2167_v31 = vpop.f32.mrb[46].mxu1  ;;  %v2104_v34 = vpop.f32.mrb[47].mxu0 }
 0x156   : > { %v1462_v62 = vadd.f32 %v2102_v25, %v2801_v14  ;;  %v2105_v36 = vadd.f32 %v2104_v34, %v2103_v28  ;;  %v2168_v37 = vpop.f32.mrb[47].mxu1 }
 0x157   : > { %v2169_v38 = vadd.f32 %v2168_v37, %v2167_v31 }
 0x158   : > { %v1465_v0 = vadd.f32 %v2105_v36, %v2804_v16  ;;  %v2850_v39 = vadd.f32 %v2166_v29, %v1462_v62 }
 0x15a   : > { %v2106_v40 = vpop.f32.mrb[48].mxu0  ;;  %v2852_v41 = vadd.f32 %v2169_v38, %v1465_v0 }
 0x15b   : > { %v2170_v42 = vpop.f32.mrb[48].mxu1  ;;  %v2107_v43 = vpop.f32.mrb[49].mxu0 }
 0x15c   : > { %v2108_v44 = vadd.f32 %v2107_v43, %v2106_v40  ;;  %v2171_v18 = vpop.f32.mrb[49].mxu1  ;;  %v2109_v49 = vpop.f32.mrb[50].mxu0 }
 0x15d   : > { %v2172_v50 = vadd.f32 %v2171_v18, %v2170_v42  ;;  %v2173_v52 = vpop.f32.mrb[50].mxu1  ;;  %v2110_v54 = vpop.f32.mrb[51].mxu0 }
 0x15e   : > { %v1470_v14 = vadd.f32 %v2108_v44, %v2807_v33  ;;  %v2111_v55 = vadd.f32 %v2110_v54, %v2109_v49  ;;  %v2174_v56 = vpop.f32.mrb[51].mxu1 }
 0x15f   : > { %v2175_v57 = vadd.f32 %v2174_v56, %v2173_v52 }
 0x160   : > { %v1473_v16 = vadd.f32 %v2111_v55, %v2810_v35  ;;  %v1567_v58 = vadd.f32 %v2172_v50, %v1470_v14 }
 0x162   : > { %v2112_v30 = vpop.f32.mrb[52].mxu0  ;;  %v2856_v59 = vadd.f32 %v2175_v57, %v1473_v16 }
 0x163   : > { %v2176_v60 = vpop.f32.mrb[52].mxu1  ;;  %v2113_v61 = vpop.f32.mrb[53].mxu0 }
 0x164   : > { %v2114_v32 = vadd.f32 %v2113_v61, %v2112_v30  ;;  %v2177_v1 = vpop.f32.mrb[53].mxu1  ;;  %v2115_v3 = vpop.f32.mrb[54].mxu0 }
 0x165   : > { %v2178_v4 = vadd.f32 %v2177_v1, %v2176_v60  ;;  %v2179_v6 = vpop.f32.mrb[54].mxu1  ;;  %v2116_v8 = vpop.f32.mrb[55].mxu0 }
 0x166   : > { %v1478_v9 = vadd.f32 %v2114_v32, %v2813_v51  ;;  %v2117_v33 = vadd.f32 %v2116_v8, %v2115_v3  ;;  %v2180_v10 = vpop.f32.mrb[55].mxu1 }
 0x167   : > { %v2181_v11 = vadd.f32 %v2180_v10, %v2179_v6 }
 0x168   : > { %v1481_v12 = vadd.f32 %v2117_v33, %v2816_v53  ;;  %v1575_v35 = vadd.f32 %v2178_v4, %v1478_v9 }
 0x16a   : > { %v2118_v46 = vpop.f32.mrb[56].mxu0  ;;  %v1578_v13 = vadd.f32 %v2181_v11, %v1481_v12 }
 0x16b   : > { %v2182_v15 = vpop.f32.mrb[56].mxu1  ;;  %v2119_v17 = vpop.f32.mrb[57].mxu0 }
 0x16c   : > { %v2120_v48 = vadd.f32 %v2119_v17, %v2118_v46  ;;  %v2183_v20 = vpop.f32.mrb[57].mxu1  ;;  %v2121_v22 = vpop.f32.mrb[58].mxu0 }
 0x16d   : > { %v2184_v23 = vadd.f32 %v2183_v20, %v2182_v15  ;;  %v2185_v25 = vpop.f32.mrb[58].mxu1  ;;  %v2122_v27 = vpop.f32.mrb[59].mxu0 }
 0x16e   : > { %v1486_v28 = vadd.f32 %v2120_v48, %v2819_v5  ;;  %v2123_v29 = vadd.f32 %v2122_v27, %v2121_v22  ;;  %v2186_v51 = vpop.f32.mrb[59].mxu1 }
 0x16f   : > { %v2187_v31 = vadd.f32 %v2186_v51, %v2185_v25 }
 0x170   : > { %v1489_v34 = vadd.f32 %v2123_v29, %v2822_v7  ;;  %v1583_v62 = vadd.f32 %v2184_v23, %v1486_v28 }
 0x172   : > { %v2124_v53 = vpop.f32.mrb[60].mxu0  ;;  %v2862_v36 = vadd.f32 %v2187_v31, %v1489_v34 }
 0x173   : > { %v2188_v37 = vpop.f32.mrb[60].mxu1  ;;  %v2125_v38 = vpop.f32.mrb[61].mxu0 }
 0x174   : > { %v2126_v0 = vadd.f32 %v2125_v38, %v2124_v53  ;;  %v2189_v40 = vpop.f32.mrb[61].mxu1  ;;  %v2127_v42 = vpop.f32.mrb[62].mxu0 }
 0x175   : > { %v2190_v43 = vadd.f32 %v2189_v40, %v2188_v37  ;;  %v2191_v44 = vpop.f32.mrb[62].mxu1  ;;  %v2128_v18 = vpop.f32.mrb[63].mxu0 }
 0x176   : > { %v1494_v5 = vadd.f32 %v2126_v0, %v2825_v24  ;;  %v2129_v49 = vadd.f32 %v2128_v18, %v2127_v42  ;;  %v2192_v50 = vpop.f32.mrb[63].mxu1 }
 0x177   : > { %v2193_v52 = vadd.f32 %v2192_v50, %v2191_v44 }
 0x178   : > { %v1497_v7 = vadd.f32 %v2129_v49, %v2828_v26  ;;  %v1591_v54 = vadd.f32 %v2190_v43, %v1494_v5 }
 0x17a   : > { %v2228_v14 = vpop.f32.mrb[64].mxu0  ;;  %v1594_v55 = vadd.f32 %v2193_v52, %v1497_v7 }
 0x17b   : > { %v1640_v56 = vadd.f32 %v2228_v14, %v2838_v63  ;;  %v2236_v57 = vpop.f32.mrb[64].mxu1  ;;  %v1631_v16 = vpop.f32.mrb[65].mxu0 }
 0x17c   : > { %v1672_v24 = vadd.f32 %v2236_v57, %v1575_v35  ;;  %v1632_v30 = vadd.f32 %v1631_v16, %v2832_v45  ;;  %v1663_v60 = vpop.f32.mrb[65].mxu1  ;;  %v2229_v26 = vpop.f32.mrb[66].mxu0 }
 0x17d   : > { %v1696_v61 = vmax.f32 %v1640_v56, 0.0  ;;  %v1664_v32 = vadd.f32 %v1663_v60, %v1567_v58  ;;  %v1643_v1 = vadd.f32 %v2229_v26, %v2840_v2  ;;  %v2237_v63 = vpop.f32.mrb[66].mxu1  ;;  %v1634_v3 = vpop.f32.mrb[67].mxu0 }
 0x17e   : > { %v1704_v4 = vmax.f32 %v1672_v24, 0.0  ;;  %v1694_v6 = vmax.f32 %v1632_v30, 0.0  ;;  %v1675_v8 = vadd.f32 %v2237_v63, %v1578_v13  ;;  %v1635_v9 = vadd.f32 %v1634_v3, %v2834_v47  ;;  %v1666_v45 = vpop.f32.mrb[67].mxu1 }
 0x17f   : > { %1712 = vst [vmem:[%s2871_s20 + $0x10] sm:$0xff] %v1696_v61  ;;  %v1702_v33 = vmax.f32 %v1664_v32, 0.0  ;;  %v1697_v10 = vmax.f32 %v1643_v1, 0.0  ;;  %v1667_v58 = vadd.f32 %v1666_v45, %v2856_v59 }
 0x180   : > { %1720 = vst [vmem:[%s2871_s20 + $0x50] sm:$0xff] %v1704_v4  ;;  %1710 = vst [vmem:[%s2871_s20] sm:$0xff] %v1694_v6  ;;  %v1705_v2 = vmax.f32 %v1675_v8, 0.0  ;;  %v1695_v11 = vmax.f32 %v1635_v9, 0.0 }
 0x181   : > { %1718 = vst [vmem:[%s2871_s20 + $0x40] sm:$0xff] %v1702_v33  ;;  %1713 = vst [vmem:[%s2871_s20 + $0x18] sm:$0xff] %v1697_v10  ;;  %v1703_v12 = vmax.f32 %v1667_v58, 0.0 }
 0x182   : > { %1721 = vst [vmem:[%s2871_s20 + $0x58] sm:$0xff] %v1705_v2  ;;  %1711 = vst [vmem:[%s2871_s20 + $0x8] sm:$0xff] %v1695_v11  ;;  %v2232_v35 = vpop.f32.mrb[68].mxu0 }
 0x183   : > { %1719 = vst [vmem:[%s2871_s20 + $0x48] sm:$0xff] %v1703_v12  ;;  %v1656_v47 = vadd.f32 %v2232_v35, %v2850_v39  ;;  %v2240_v46 = vpop.f32.mrb[68].mxu1  ;;  %v1647_v13 = vpop.f32.mrb[69].mxu0 }
 0x184   : > { %v1688_v15 = vadd.f32 %v2240_v46, %v1591_v54  ;;  %v1648_v17 = vadd.f32 %v1647_v13, %v2844_v19  ;;  %v1679_v59 = vpop.f32.mrb[69].mxu1  ;;  %v2233_v48 = vpop.f32.mrb[70].mxu0 }
 0x185   : > { %v1700_v20 = vmax.f32 %v1656_v47, 0.0  ;;  %v1680_v22 = vadd.f32 %v1679_v59, %v1583_v62  ;;  %v1659_v23 = vadd.f32 %v2233_v48, %v2852_v41  ;;  %v2241_v25 = vpop.f32.mrb[70].mxu1  ;;  %v1650_v27 = vpop.f32.mrb[71].mxu0 }
 0x186   : > { %v1708_v28 = vmax.f32 %v1688_v15, 0.0  ;;  %v1698_v39 = vmax.f32 %v1648_v17, 0.0  ;;  %v1691_v29 = vadd.f32 %v2241_v25, %v1594_v55  ;;  %v1651_v19 = vadd.f32 %v1650_v27, %v2846_v21  ;;  %v1682_v51 = vpop.f32.mrb[71].mxu1 }
 0x187   : > { %1716 = vst [vmem:[%s2871_s20 + $0x30] sm:$0xff] %v1700_v20  ;;  %v1706_v31 = vmax.f32 %v1680_v22, 0.0  ;;  %v1701_v34 = vmax.f32 %v1659_v23, 0.0  ;;  %v1683_v62 = vadd.f32 %v1682_v51, %v2862_v36 }
 0x188   : > { %1724 = vst [vmem:[%s2871_s20 + $0x70] sm:$0xff] %v1708_v28  ;;  %1714 = vst [vmem:[%s2871_s20 + $0x20] sm:$0xff] %v1698_v39  ;;  %v1709_v41 = vmax.f32 %v1691_v29, 0.0  ;;  %v1699_v53 = vmax.f32 %v1651_v19, 0.0 }
 0x189   : > { %1722 = vst [vmem:[%s2871_s20 + $0x60] sm:$0xff] %v1706_v31  ;;  %1717 = vst [vmem:[%s2871_s20 + $0x38] sm:$0xff] %v1701_v34  ;;  %v1707_v37 = vmax.f32 %v1683_v62, 0.0 }
 0x18a   : > { %1725 = vst [vmem:[%s2871_s20 + $0x78] sm:$0xff] %v1709_v41  ;;  %1715 = vst [vmem:[%s2871_s20 + $0x28] sm:$0xff] %v1699_v53 }
 0x18b   : > { %1723 = vst [vmem:[%s2871_s20 + $0x68] sm:$0xff] %v1707_v37 }
 0x18c PF: > { %s13_s12 = sadd.s32 1, %s2449_s12  }
 0x18d   : > { %p10_p4 = scmp.ge.s32.totalorder %s13_s12, 6  }
 0x18f   :  { %12 = sbr.rel (!%p10_p4) target bundleno = 1 (0x1), region = 62 }

// kernel: _lambda_.8
= control target key start
LH: loop header
LB: loop body
LE: loop exit
PB: predicated region body
PF: predicated region fallthrough
CT: control target
= control target key end

     0   :  { %s2571_s15 = smov 0   ;;  %s3035_s0 = inlined_call_operand.vmem [shape: bf16[512,1152], index: 0, kind: input, shape index: {}]   ;;  %s3036_s1 = inlined_call_operand.vmem [shape: bf16[1152,128], index: 1, kind: input, shape index: {}]   ;;  %s3037_s2 = inlined_call_operand.vmem [shape: f32[1,128], index: 2, kind: input, shape index: {}]   ;;  %s3038_s3 = inlined_call_operand.vmem [shape: f32[512,128], index: 3, kind: input, shape index: {}]   ;;  %s3039_s4 = inlined_call_operand.vmem [shape: f32[512,128], index: 4, kind: output, shape index: {}]  }
   0x1 LB: > { %s1875_s16 = sadd.s32 4294967295, %s2544_s15   ;;  %p1879_p0 = scmp.ge.s32.totalorder %s2544_s15, 1  ;;  %s2544_s15 = sphi %s2571_s15, %s14_s15  }
   0x2   : > { %p175_p1 = scmp.lt.s32.totalorder %s2544_s15, 5 }
   0x4   : > { %p176_p2 = pnand %p1879_p0, %p175_p1 }
   0x5   : > { %v2362_v0 = vld [vmem:[%s3036_s1 + $0x40] sm:$0xff] (!%p176_p2)   ;;  %v2366_v4 = vld [vmem:[%s3036_s1 + $0x48] sm:$0xff] (!%p176_p2)   ;;  %v2370_v8 = vld [vmem:[%s3036_s1 + $0x50] sm:$0xff] (!%p176_p2)   ;;  %s1880_s23 = sshll.u32 (!%p176_p2), %s1875_s16, 4 }
   0x6   : > { %179 = sbr.rel (%p176_p2) target bundleno = 398 (0x18e), region = 36  ;;  %v2363_v1 = vld [vmem:[%s3036_s1 + $0xc0] sm:$0xff] (!%p176_p2)   ;;  %2033 = vmatprep.subr.bf16.mxu0 (!%p176_p2), %v2362_v0  ;;  %v2367_v5 = vld [vmem:[%s3036_s1 + $0xc8] sm:$0xff] (!%p176_p2)   ;;  %v2371_v9 = vld [vmem:[%s3036_s1 + $0xd0] sm:$0xff] (!%p176_p2)   ;;  %p208_p3 = scmp.lt.s32.totalorder (!%p176_p2), %s1880_s23, 63 }
   0x7   : > { %v2364_v2 = vld [vmem:[%s3036_s1] sm:$0xff] (!%p176_p2)   ;;  %2097 = vmatprep.subr.bf16.mxu1 (!%p176_p2), %v2363_v1  ;;  %v2368_v6 = vld [vmem:[%s3036_s1 + $0x8] sm:$0xff] (!%p176_p2)   ;;  %v2372_v10 = vld [vmem:[%s3036_s1 + $0x10] sm:$0xff] (!%p176_p2)  }
   0x8   : > { %v2365_v3 = vld [vmem:[%s3036_s1 + $0x80] sm:$0xff] (!%p176_p2)   ;;  %2034 = vmatpush3.bf16.msra.mxu0 (!%p176_p2), %v2364_v2  ;;  %v2369_v7 = vld [vmem:[%s3036_s1 + $0x88] sm:$0xff] (!%p176_p2)   ;;  %v2373_v11 = vld [vmem:[%s3036_s1 + $0x90] sm:$0xff] (!%p176_p2)  }
   0x9   : > { %2098 = vmatpush3.bf16.msra.mxu1 (!%p176_p2), %v2365_v3  ;;  %2035 = vmatprep.subr.bf16.mxu0 (!%p176_p2), %v2366_v4  ;;  %v2374_v12 = vld [vmem:[%s3036_s1 + $0x58] sm:$0xff] (!%p176_p2)   ;;  %v2378_v16 = vld [vmem:[%s3036_s1 + $0x60] sm:$0xff] (!%p176_p2)   ;;  %v2382_v20 = vld [vmem:[%s3036_s1 + $0x68] sm:$0xff] (!%p176_p2)  }
   0xa   : > { %2099 = vmatprep.subr.bf16.mxu1 (!%p176_p2), %v2367_v5  ;;  %v2375_v13 = vld [vmem:[%s3036_s1 + $0xd8] sm:$0xff] (!%p176_p2)   ;;  %v2379_v17 = vld [vmem:[%s3036_s1 + $0xe0] sm:$0xff] (!%p176_p2)   ;;  %v2383_v21 = vld [vmem:[%s3036_s1 + $0xe8] sm:$0xff] (!%p176_p2)  }
   0xb   : > { %v2376_v14 = vld [vmem:[%s3036_s1 + $0x18] sm:$0xff] (!%p176_p2)   ;;  %v2380_v18 = vld [vmem:[%s3036_s1 + $0x20] sm:$0xff] (!%p176_p2)   ;;  %v2384_v22 = vld [vmem:[%s3036_s1 + $0x28] sm:$0xff] (!%p176_p2)  }
   0xc   : > { %2036 = vmatpush3.bf16.msra.mxu0 (!%p176_p2), %v2368_v6  ;;  %v2377_v15 = vld [vmem:[%s3036_s1 + $0x98] sm:$0xff] (!%p176_p2)   ;;  %v2381_v19 = vld [vmem:[%s3036_s1 + $0xa0] sm:$0xff] (!%p176_p2)   ;;  %v2385_v23 = vld [vmem:[%s3036_s1 + $0xa8] sm:$0xff] (!%p176_p2)  }
   0xd   : > { %2100 = vmatpush3.bf16.msra.mxu1 %v2369_v7  ;;  %2037 = vmatprep.subr.bf16.mxu0 %v2370_v8  ;;  %s3041_s23 = smov (!%p208_p3, %s1880_s23), 63  ;;  %v2386_v24 = vld [vmem:[%s3036_s1 + $0x70] sm:$0xff]   ;;  %v2390_v28 = vld [vmem:[%s3036_s1 + $0x78] sm:$0xff]   ;;  %v2400_v36 = vld [vmem:[%s3036_s1 + $0x140] sm:$0xff]  }
   0xe   : > { %2101 = vmatprep.subr.bf16.mxu1 %v2371_v9  ;;  %v2387_v25 = vld [vmem:[%s3036_s1 + $0xf0] sm:$0xff]   ;;  %s2353_s21 = smul.u32 36, %s3041_s23  ;;  %v2391_v29 = vld [vmem:[%s3036_s1 + $0xf8] sm:$0xff]   ;;  %v2401_v37 = vld [vmem:[%s3036_s1 + $0x1c0] sm:$0xff]  }
   0xf   : > { %v2388_v26 = vld [vmem:[%s3036_s1 + $0x30] sm:$0xff]   ;;  %v2392_v30 = vld [vmem:[%s3036_s1 + $0x38] sm:$0xff]   ;;  %v2402_v38 = vld [vmem:[%s3036_s1 + $0x100] sm:$0xff]  }
  0x10   : > { %2038 = vmatpush3.bf16.msra.mxu0 %v2372_v10  ;;  %v2389_v27 = vld [vmem:[%s3036_s1 + $0xb0] sm:$0xff]   ;;  %s2677_s6 = scalar_lea.vmem %s3035_s0, %s2353_s21  ;;  %v2393_v31 = vld [vmem:[%s3036_s1 + $0xb8] sm:$0xff]   ;;  %v2403_v39 = vld [vmem:[%s3036_s1 + $0x180] sm:$0xff]  }
  0x11   : > { %2102 = vmatpush3.bf16.msra.mxu1 %v2373_v11  ;;  %2039 = vmatprep.subr.bf16.mxu0 %v2374_v12  ;;  %v2394_v32 = vld [vmem:[%s2677_s6] ss:$36 sps:$4 sm:$0xff]   ;;  %v2397_v34 = vld [vmem:[%s2677_s6 + $0x8] ss:$36 sps:$4 sm:$0xff]   ;;  %v2406_v41 = vld [vmem:[%s2677_s6 + $0x54] ss:$36 sps:$4 sm:$0xff]  }
  0x12   : > { %2103 = vmatprep.subr.bf16.mxu1 %v2375_v13  ;;  %v2396_v33 = vld [vmem:[%s2677_s6 + $0x4] ss:$36 sps:$4 sm:$0xff]   ;;  %v2399_v35 = vld [vmem:[%s2677_s6 + $0xc] ss:$36 sps:$4 sm:$0xff]   ;;  %v2414_v48 = vld [vmem:[%s2677_s6 + $0x94] ss:$36 sps:$4 sm:$0xff]  }
  0x13   : > { %1290 = vmatprep.mubr.bf16.mxu0 %v2396_v33  ;;  %1387 = vmatprep.mubr.bf16.mxu1 %v2399_v35  ;;  %v2404_v40 = vld [vmem:[%s2677_s6 + $0x4c] ss:$36 sps:$4 sm:$0xff]   ;;  %v2416_v49 = vld [vmem:[%s2677_s6 + $0x9c] ss:$36 sps:$4 sm:$0xff]   ;;  %v2426_v57 = vld [vmem:[%s2677_s6 + $0xe4] ss:$36 sps:$4 sm:$0xff]  }
  0x14   : > { %2040 = vmatpush3.bf16.msra.mxu0 %v2376_v14  ;;  %v2408_v42 = vld [vmem:[%s2677_s6 + $0x48] ss:$36 sps:$4 sm:$0xff]   ;;  %v2409_v43 = vld [vmem:[%s2677_s6 + $0x50] ss:$36 sps:$4 sm:$0xff]   ;;  %v2419_v51 = vld [vmem:[%s2677_s6 + $0x98] ss:$36 sps:$4 sm:$0xff]  }
  0x15   : > { %2104 = vmatpush3.bf16.msra.mxu1 %v2377_v15  ;;  %2041 = vmatprep.subr.bf16.mxu0 %v2378_v16  ;;  %v2410_v44 = vld [vmem:[%s3036_s1 + $0x148] sm:$0xff]   ;;  %v2418_v50 = vld [vmem:[%s2677_s6 + $0x90] ss:$36 sps:$4 sm:$0xff]   ;;  %v2424_v56 = vld [vmem:[%s2677_s6 + $0xdc] ss:$36 sps:$4 sm:$0xff]  }
  0x16   : > { %2105 = vmatprep.subr.bf16.mxu1 %v2379_v17  ;;  %v2411_v45 = vld [vmem:[%s3036_s1 + $0x1c8] sm:$0xff]   ;;  %v2420_v52 = vld [vmem:[%s3036_s1 + $0x150] sm:$0xff]   ;;  %v2428_v58 = vld [vmem:[%s2677_s6 + $0xd8] ss:$36 sps:$4 sm:$0xff]  }
  0x17   : > { %v2412_v46 = vld [vmem:[%s3036_s1 + $0x108] sm:$0xff]   ;;  %v2421_v53 = vld [vmem:[%s3036_s1 + $0x1d0] sm:$0xff]   ;;  %v2429_v59 = vld [vmem:[%s2677_s6 + $0xe0] ss:$36 sps:$4 sm:$0xff]  }
  0x18   : > { %2042 = vmatpush3.bf16.msra.mxu0 %v2380_v18  ;;  %v2413_v47 = vld [vmem:[%s3036_s1 + $0x188] sm:$0xff]   ;;  %v2422_v54 = vld [vmem:[%s3036_s1 + $0x110] sm:$0xff]   ;;  %v2430_v60 = vld [vmem:[%s3036_s1 + $0x158] sm:$0xff]  }
  0x19   : > { %2106 = vmatpush3.bf16.msra.mxu1 %v2381_v19  ;;  %2043 = vmatprep.subr.bf16.mxu0 %v2382_v20  ;;  %v2423_v55 = vld [vmem:[%s3036_s1 + $0x190] sm:$0xff]   ;;  %v2431_v61 = vld [vmem:[%s3036_s1 + $0x1d8] sm:$0xff]   ;;  %v2434_v0 = vld [vmem:[%s2677_s6 + $0x124] ss:$36 sps:$4 sm:$0xff]  }
  0x1a   : > { %2107 = vmatprep.subr.bf16.mxu1 %v2383_v21  ;;  %v2432_v62 = vld [vmem:[%s3036_s1 + $0x118] sm:$0xff]   ;;  %v2436_v1 = vld [vmem:[%s2677_s6 + $0x12c] ss:$36 sps:$4 sm:$0xff]   ;;  %v2438_v2 = vld [vmem:[%s2677_s6 + $0x120] ss:$36 sps:$4 sm:$0xff]  }
  0x1b   : > { %v2433_v63 = vld [vmem:[%s3036_s1 + $0x198] sm:$0xff]   ;;  %v2440_v3 = vld [vmem:[%s3036_s1 + $0x160] sm:$0xff]   ;;  %v2439_v4 = vld [vmem:[%s2677_s6 + $0x128] ss:$36 sps:$4 sm:$0xff]  }
  0x1c   : > { %2044 = vmatpush3.bf16.msra.mxu0 %v2384_v22  ;;  %v2441_v5 = vld [vmem:[%s3036_s1 + $0x1e0] sm:$0xff]   ;;  %v2444_v8 = vld [vmem:[%s2677_s6 + $0x16c] ss:$36 sps:$4 sm:$0xff]   ;;  %v2446_v9 = vld [vmem:[%s2677_s6 + $0x174] ss:$36 sps:$4 sm:$0xff]  }
  0x1d   : > { %2108 = vmatpush3.bf16.msra.mxu1 %v2385_v23  ;;  %2045 = vmatprep.subr.bf16.mxu0 %v2386_v24  ;;  %v2442_v6 = vld [vmem:[%s3036_s1 + $0x120] sm:$0xff]   ;;  %v2450_v10 = vld [vmem:[%s3036_s1 + $0x168] sm:$0xff]   ;;  %v2449_v15 = vld [vmem:[%s2677_s6 + $0x170] ss:$36 sps:$4 sm:$0xff]  }
  0x1e   : > { %2109 = vmatprep.subr.bf16.mxu1 %v2387_v25  ;;  %v2443_v7 = vld [vmem:[%s3036_s1 + $0x1a0] sm:$0xff]   ;;  %v2451_v11 = vld [vmem:[%s3036_s1 + $0x1e8] sm:$0xff]   ;;  %v2454_v16 = vld [vmem:[%s2677_s6 + $0x1b4] ss:$36 sps:$4 sm:$0xff]  }
  0x1f   : > { %v2448_v12 = vld [vmem:[%s2677_s6 + $0x168] ss:$36 sps:$4 sm:$0xff]   ;;  %v2456_v17 = vld [vmem:[%s2677_s6 + $0x1bc] ss:$36 sps:$4 sm:$0xff]   ;;  %v2460_v18 = vld [vmem:[%s3036_s1 + $0x170] sm:$0xff]  }
  0x20   : > { %2046 = vmatpush3.bf16.msra.mxu0 %v2388_v26  ;;  %v2452_v13 = vld [vmem:[%s3036_s1 + $0x128] sm:$0xff]   ;;  %v2461_v19 = vld [vmem:[%s3036_s1 + $0x1f0] sm:$0xff]   ;;  %v2459_v23 = vld [vmem:[%s2677_s6 + $0x1b8] ss:$36 sps:$4 sm:$0xff]  }
  0x21   : > { %2110 = vmatpush3.bf16.msra.mxu1 %v2389_v27  ;;  %2047 = vmatprep.subr.bf16.mxu0 %v2390_v28  ;;  %v2453_v14 = vld [vmem:[%s3036_s1 + $0x1a8] sm:$0xff]   ;;  %v2462_v20 = vld [vmem:[%s3036_s1 + $0x130] sm:$0xff]   ;;  %v2464_v24 = vld [vmem:[%s2677_s6 + $0x1fc] ss:$36 sps:$4 sm:$0xff]  }
  0x22   : > { %2111 = vmatprep.subr.bf16.mxu1 %v2391_v29  ;;  %v2463_v21 = vld [vmem:[%s3036_s1 + $0x1b0] sm:$0xff]   ;;  %v2466_v25 = vld [vmem:[%s2677_s6 + $0x204] ss:$36 sps:$4 sm:$0xff]   ;;  %v2470_v26 = vld [vmem:[%s3036_s1 + $0x178] sm:$0xff]  }
  0x23   : > { %v2458_v22 = vld [vmem:[%s2677_s6 + $0x1b0] ss:$36 sps:$4 sm:$0xff]   ;;  %v2471_v27 = vld [vmem:[%s3036_s1 + $0x1f8] sm:$0xff]  }
  0x24   : > { %2048 = vmatpush3.bf16.msra.mxu0 %v2392_v30  ;;  %v2472_v28 = vld [vmem:[%s3036_s1 + $0x138] sm:$0xff]   ;;  %v2474_v35 = vld [vmem:[%s2677_s6 + $0x10] ss:$36 sps:$4 sm:$0xff]  }
  0x25   : > { %2112 = vmatpush3.bf16.msra.mxu1 %v2393_v31  ;;  %2161 = vmatprep.subr.bf16.mxu0 %v2400_v36  ;;  %v2473_v29 = vld [vmem:[%s3036_s1 + $0x1b8] sm:$0xff]   ;;  %v2469_v31 = vld [vmem:[%s2677_s6 + $0x200] ss:$36 sps:$4 sm:$0xff]  }
  0x26   : > { %2225 = vmatprep.subr.bf16.mxu1 %v2401_v37  ;;  %v2468_v30 = vld [vmem:[%s2677_s6 + $0x1f8] ss:$36 sps:$4 sm:$0xff]  }
  0x27   : > { %1291 = vmatmul.mubr.bf16.vlgmr.msra.gmra.mrb[0].mxu0 %v2394_v32  ;;  %v2480_v32 = vld [vmem:[%s3036_s1 + $0x200] sm:$0xff]   ;;  %v2476_v33 = vld [vmem:[%s2677_s6 + $0x14] ss:$36 sps:$4 sm:$0xff]  }
  0x28   : > { %1388 = vmatmul.mubr.bf16.vlgmr.msra.gmra.mrb[0].mxu1 %v2397_v34  ;;  %2162 = vmatpush3.bf16.msra.mxu0 %v2402_v38  ;;  %v2479_v34 = vld [vmem:[%s2677_s6 + $0x1c] ss:$36 sps:$4 sm:$0xff]   ;;  %v2483_v38 = vld [vmem:[%s2677_s6 + $0x64] ss:$36 sps:$4 sm:$0xff]  }
  0x29   : > { %2226 = vmatpush3.bf16.msra.mxu1 %v2403_v39  ;;  %1298 = vmatprep.mubr.bf16.mxu0 %v2404_v40  ;;  %v2477_v36 = vld [vmem:[%s2677_s6 + $0x18] ss:$36 sps:$4 sm:$0xff]   ;;  %v2487_v39 = vld [vmem:[%s3036_s1 + $0x208] sm:$0xff]   ;;  %v2494_v40 = vld [vmem:[%s3036_s1 + $0x210] sm:$0xff]  }
  0x2a   : > { %1395 = vmatprep.mubr.bf16.mxu1 %v2406_v41  ;;  %2163 = vmatprep.subr.bf16.mxu0 %v2410_v44  ;;  %v2481_v37 = vld [vmem:[%s2677_s6 + $0x5c] ss:$36 sps:$4 sm:$0xff]   ;;  %v2490_v44 = vld [vmem:[%s2677_s6 + $0xac] ss:$36 sps:$4 sm:$0xff]  }
  0x2b   : > { %2227 = vmatprep.subr.bf16.mxu1 %v2411_v45  ;;  %v2485_v41 = vld [vmem:[%s2677_s6 + $0x58] ss:$36 sps:$4 sm:$0xff]  }
  0x2c   : > { %2164 = vmatpush3.bf16.msra.mxu0 %v2412_v46  ;;  %v2501_v45 = vld [vmem:[%s3036_s1 + $0x218] sm:$0xff]   ;;  %v2508_v46 = vld [vmem:[%s3036_s1 + $0x220] sm:$0xff]  }
  0x2d   : > { %2228 = vmatpush3.bf16.msra.mxu1 %v2413_v47  ;;  %2165 = vmatprep.subr.bf16.mxu0 %v2420_v52  ;;  %v2492_v47 = vld [vmem:[%s2677_s6 + $0xa0] ss:$36 sps:$4 sm:$0xff]   ;;  %v2499_v52 = vld [vmem:[%s2677_s6 + $0xe8] ss:$36 sps:$4 sm:$0xff]  }
  0x2e   : > { %2229 = vmatprep.subr.bf16.mxu1 %v2421_v53  ;;  %v2522_v53 = vld [vmem:[%s3036_s1 + $0x230] sm:$0xff]  }
  0x2f   : > { %1299 = vmatmul.mubr.bf16.gmra.mrb[4].mxu0 %v2408_v42  ;;  %v2486_v42 = vld [vmem:[%s2677_s6 + $0x60] ss:$36 sps:$4 sm:$0xff]  }
  0x30   : > { %1396 = vmatmul.mubr.bf16.gmra.mrb[4].mxu1 %v2409_v43  ;;  %1306 = vmatprep.mubr.bf16.mxu0 %v2414_v48  ;;  %v2488_v43 = vld [vmem:[%s2677_s6 + $0xa4] ss:$36 sps:$4 sm:$0xff]  }
  0x31   : > { %1403 = vmatprep.mubr.bf16.mxu1 %v2416_v49  ;;  %2166 = vmatpush3.bf16.msra.mxu0 %v2422_v54  ;;  %v2493_v48 = vld [vmem:[%s2677_s6 + $0xa8] ss:$36 sps:$4 sm:$0xff]   ;;  %v2500_v54 = vld [vmem:[%s2677_s6 + $0xf0] ss:$36 sps:$4 sm:$0xff]  }
  0x32   : > { %2230 = vmatpush3.bf16.msra.mxu1 %v2423_v55  ;;  %2167 = vmatprep.subr.bf16.mxu0 %v2430_v60  ;;  %v2495_v49 = vld [vmem:[%s2677_s6 + $0xec] ss:$36 sps:$4 sm:$0xff]   ;;  %v2502_v55 = vld [vmem:[%s2677_s6 + $0x134] ss:$36 sps:$4 sm:$0xff]   ;;  %v2509_v60 = vld [vmem:[%s2677_s6 + $0x17c] ss:$36 sps:$4 sm:$0xff]  }
  0x33   : > { %2231 = vmatprep.subr.bf16.mxu1 %v2431_v61  ;;  %v2511_v61 = vld [vmem:[%s2677_s6 + $0x184] ss:$36 sps:$4 sm:$0xff]  }
  0x35   : > { %2168 = vmatpush3.bf16.msra.mxu0 %v2432_v62  ;;  %v2513_v62 = vld [vmem:[%s2677_s6 + $0x178] ss:$36 sps:$4 sm:$0xff]  }
  0x36   : > { %2232 = vmatpush3.bf16.msra.mxu1 %v2433_v63  ;;  %2169 = vmatprep.subr.bf16.mxu0 %v2440_v3  ;;  %v2514_v63 = vld [vmem:[%s2677_s6 + $0x180] ss:$36 sps:$4 sm:$0xff]   ;;  %v2521_v3 = vld [vmem:[%s2677_s6 + $0x1c8] ss:$36 sps:$4 sm:$0xff]  }
  0x37   : > { %1307 = vmatmul.mubr.bf16.gmra.mrb[8].mxu0 %v2418_v50  ;;  %2233 = vmatprep.subr.bf16.mxu1 %v2441_v5  ;;  %v2497_v50 = vld [vmem:[%s2677_s6 + $0xf4] ss:$36 sps:$4 sm:$0xff]  }
  0x38   : > { %1404 = vmatmul.mubr.bf16.gmra.mrb[8].mxu1 %v2419_v51  ;;  %1314 = vmatprep.mubr.bf16.mxu0 %v2424_v56  ;;  %v2515_v51 = vld [vmem:[%s3036_s1 + $0x228] sm:$0xff]   ;;  %v2504_v56 = vld [vmem:[%s2677_s6 + $0x13c] ss:$36 sps:$4 sm:$0xff]   ;;  %v2525_v5 = vld [vmem:[%s2677_s6 + $0x214] ss:$36 sps:$4 sm:$0xff]  }
  0x39   : > { %1411 = vmatprep.mubr.bf16.mxu1 %v2426_v57  ;;  %2170 = vmatpush3.bf16.msra.mxu0 %v2442_v6  ;;  %v2529_v57 = vld [vmem:[%s3036_s1 + $0x238] sm:$0xff]   ;;  %v2527_v6 = vld [vmem:[%s2677_s6 + $0x208] ss:$36 sps:$4 sm:$0xff]  }
  0x3a   : > { %2234 = vmatpush3.bf16.msra.mxu1 %v2443_v7  ;;  %2171 = vmatprep.subr.bf16.mxu0 %v2450_v10  ;;  %v2528_v7 = vld [vmem:[%s2677_s6 + $0x210] ss:$36 sps:$4 sm:$0xff]   ;;  %v2532_v10 = vld [vmem:[%s2677_s6 + $0x68] ss:$36 sps:$4 sm:$0xff]  }
  0x3b   : > { %2235 = vmatprep.subr.bf16.mxu1 %v2451_v11  ;;  %v2533_v11 = vld [vmem:[%s2677_s6 + $0x188] ss:$36 sps:$4 sm:$0xff]  }
  0x3d   : > { %2172 = vmatpush3.bf16.msra.mxu0 %v2452_v13  ;;  %v2535_v13 = vld [vmem:[%s2677_s6 + $0x1d0] ss:$36 sps:$4 sm:$0xff]  }
  0x3e   : > { %2236 = vmatpush3.bf16.msra.mxu1 %v2453_v14  ;;  %2173 = vmatprep.subr.bf16.mxu0 %v2460_v18  ;;  %v2536_v14 = vld [vmem:[%s2677_s6 + $0xf8] ss:$36 sps:$4 sm:$0xff]   ;;  %v2880_v18 = vld [vmem:[%s3037_s2] ss:$0 sm:$0xff] }
  0x3f   : > { %1315 = vmatmul.mubr.bf16.gmra.mrb[12].mxu0 %v2428_v58  ;;  %2237 = vmatprep.subr.bf16.mxu1 %v2461_v19  ;;  %v2506_v58 = vld [vmem:[%s2677_s6 + $0x130] ss:$36 sps:$4 sm:$0xff]  }
  0x40   : > { %1412 = vmatmul.mubr.bf16.gmra.mrb[12].mxu1 %v2429_v59  ;;  %1322 = vmatprep.mubr.bf16.mxu0 %v2434_v0  ;;  %v2507_v59 = vld [vmem:[%s2677_s6 + $0x138] ss:$36 sps:$4 sm:$0xff]   ;;  %v2516_v0 = vld [vmem:[%s2677_s6 + $0x1c4] ss:$36 sps:$4 sm:$0xff]  }
  0x41   : > { %1419 = vmatprep.mubr.bf16.mxu1 %v2436_v1  ;;  %2174 = vmatpush3.bf16.msra.mxu0 %v2462_v20  ;;  %v2518_v1 = vld [vmem:[%s2677_s6 + $0x1cc] ss:$36 sps:$4 sm:$0xff]  }
  0x42   : > { %2238 = vmatpush3.bf16.msra.mxu1 %v2463_v21  ;;  %2175 = vmatprep.subr.bf16.mxu0 %v2470_v26 }
  0x43   : > { %2239 = vmatprep.subr.bf16.mxu1 %v2471_v27 }
  0x45   : > { %2176 = vmatpush3.bf16.msra.mxu0 %v2472_v28 }
  0x46   : > { %2240 = vmatpush3.bf16.msra.mxu1 %v2473_v29  ;;  %2305 = vmatprep.subr.bf16.mxu0 %v2480_v32 }
  0x47   : > { %1323 = vmatmul.mubr.bf16.gmra.mrb[16].mxu0 %v2438_v2  ;;  %2337 = vmatprep.subr.bf16.mxu1 %v2480_v32  ;;  %v2520_v2 = vld [vmem:[%s2677_s6 + $0x1c0] ss:$36 sps:$4 sm:$0xff]  }
  0x48   : > { %1420 = vmatmul.mubr.bf16.gmra.mrb[16].mxu1 %v2439_v4  ;;  %1330 = vmatprep.mubr.bf16.mxu0 %v2444_v8  ;;  %v2523_v4 = vld [vmem:[%s2677_s6 + $0x20c] ss:$36 sps:$4 sm:$0xff]   ;;  %v2530_v8 = vld [vmem:[%s2677_s6 + $0x20] ss:$36 sps:$4 sm:$0xff]  }
  0x49   : > { %1427 = vmatprep.mubr.bf16.mxu1 %v2446_v9  ;;  %v2531_v9 = vld [vmem:[%s2677_s6 + $0x140] ss:$36 sps:$4 sm:$0xff]  }
  0x4f   : > { %1331 = vmatmul.mubr.bf16.gmra.mrb[20].mxu0 %v2448_v12  ;;  %v2534_v12 = vld [vmem:[%s2677_s6 + $0xb0] ss:$36 sps:$4 sm:$0xff]  }
  0x50   : > { %1428 = vmatmul.mubr.bf16.gmra.mrb[20].mxu1 %v2449_v15  ;;  %1338 = vmatprep.mubr.bf16.mxu0 %v2454_v16  ;;  %v2537_v15 = vld [vmem:[%s2677_s6 + $0x218] ss:$36 sps:$4 sm:$0xff]   ;;  %s1883_s6 = sshll.u32 %s3041_s23, 3 }
  0x51   : > { %1435 = vmatprep.mubr.bf16.mxu1 %v2456_v17  ;;  %s2975_s29 = scalar_lea.vmem %s3038_s3, %s1883_s6  ;;  %s2996_s16 = scalar_lea.vmem %s3039_s4, %s1883_s6 }
  0x57   : > { %1339 = vmatmul.mubr.bf16.gmra.mrb[24].mxu0 %v2458_v22 }
  0x58   : > { %1436 = vmatmul.mubr.bf16.gmra.mrb[24].mxu1 %v2459_v23  ;;  %1346 = vmatprep.mubr.bf16.mxu0 %v2464_v24 }
  0x59   : > { %1443 = vmatprep.mubr.bf16.mxu1 %v2466_v25 }
  0x5f   : > { %1347 = vmatmul.mubr.bf16.gmra.mrb[28].mxu0 %v2468_v30 }
  0x60   : > { %1444 = vmatmul.mubr.bf16.gmra.mrb[28].mxu1 %v2469_v31  ;;  %1484 = vmatprep.mubr.bf16.mxu0 %v2476_v33 }
  0x61   : > { %1581 = vmatprep.mubr.bf16.mxu1 %v2479_v34 }
  0x67   : > { %1485 = vmatmul.mubr.bf16.vlgmr.msra.gmra.mrb[32].mxu0 %v2474_v35 }
  0x68   : > { %1582 = vmatmul.mubr.bf16.vlgmr.msra.gmra.mrb[32].mxu1 %v2477_v36  ;;  %2306 = vmatpush3.bf16.msra.mxu0 %v2480_v32 }
  0x69   : > { %2345 = vmatpush3.bf16.msra.mxu1 %v2480_v32  ;;  %1492 = vmatprep.mubr.bf16.mxu0 %v2481_v37 }
  0x6a   : > { %1589 = vmatprep.mubr.bf16.mxu1 %v2483_v38  ;;  %2307 = vmatprep.subr.bf16.mxu0 %v2487_v39 }
  0x6b   : > { %2338 = vmatprep.subr.bf16.mxu1 %v2487_v39 }
  0x6c   : > { %2308 = vmatpush3.bf16.msra.mxu0 %v2487_v39 }
  0x6d   : > { %2346 = vmatpush3.bf16.msra.mxu1 %v2487_v39  ;;  %2309 = vmatprep.subr.bf16.mxu0 %v2494_v40 }
  0x6e   : > { %2339 = vmatprep.subr.bf16.mxu1 %v2494_v40 }
  0x6f   : > { %1493 = vmatmul.mubr.bf16.gmra.mrb[36].mxu0 %v2485_v41 }
  0x70   : > { %1590 = vmatmul.mubr.bf16.gmra.mrb[36].mxu1 %v2486_v42  ;;  %1500 = vmatprep.mubr.bf16.mxu0 %v2488_v43 }
  0x71   : > { %1597 = vmatprep.mubr.bf16.mxu1 %v2490_v44  ;;  %2310 = vmatpush3.bf16.msra.mxu0 %v2494_v40 }
  0x72   : > { %2347 = vmatpush3.bf16.msra.mxu1 %v2494_v40  ;;  %2311 = vmatprep.subr.bf16.mxu0 %v2501_v45 }
  0x73   : > { %2340 = vmatprep.subr.bf16.mxu1 %v2501_v45 }
  0x75   : > { %2312 = vmatpush3.bf16.msra.mxu0 %v2501_v45 }
  0x76   : > { %2348 = vmatpush3.bf16.msra.mxu1 %v2501_v45  ;;  %2313 = vmatprep.subr.bf16.mxu0 %v2508_v46 }
  0x77   : > { %1501 = vmatmul.mubr.bf16.gmra.mrb[40].mxu0 %v2492_v47  ;;  %2341 = vmatprep.subr.bf16.mxu1 %v2508_v46 }
  0x78   : > { %1598 = vmatmul.mubr.bf16.gmra.mrb[40].mxu1 %v2493_v48  ;;  %1508 = vmatprep.mubr.bf16.mxu0 %v2495_v49 }
  0x79   : > { %1605 = vmatprep.mubr.bf16.mxu1 %v2497_v50  ;;  %2314 = vmatpush3.bf16.msra.mxu0 %v2508_v46 }
  0x7a   : > { %2349 = vmatpush3.bf16.msra.mxu1 %v2508_v46  ;;  %2315 = vmatprep.subr.bf16.mxu0 %v2515_v51 }
  0x7b   : > { %2342 = vmatprep.subr.bf16.mxu1 %v2515_v51 }
  0x7d   : > { %2316 = vmatpush3.bf16.msra.mxu0 %v2515_v51 }
  0x7e   : > { %2350 = vmatpush3.bf16.msra.mxu1 %v2515_v51  ;;  %2317 = vmatprep.subr.bf16.mxu0 %v2522_v53 }
  0x7f   : > { %1509 = vmatmul.mubr.bf16.gmra.mrb[44].mxu0 %v2499_v52  ;;  %2343 = vmatprep.subr.bf16.mxu1 %v2522_v53 }
  0x80   : > { %1606 = vmatmul.mubr.bf16.gmra.mrb[44].mxu1 %v2500_v54  ;;  %1516 = vmatprep.mubr.bf16.mxu0 %v2502_v55 }
  0x81   : > { %1613 = vmatprep.mubr.bf16.mxu1 %v2504_v56  ;;  %2318 = vmatpush3.bf16.msra.mxu0 %v2522_v53 }
  0x82   : > { %2351 = vmatpush3.bf16.msra.mxu1 %v2522_v53  ;;  %2319 = vmatprep.subr.bf16.mxu0 %v2529_v57 }
  0x83   : > { %2344 = vmatprep.subr.bf16.mxu1 %v2529_v57 }
  0x85   : > { %2320 = vmatpush3.bf16.msra.mxu0 %v2529_v57 }
  0x86   : > { %2352 = vmatpush3.bf16.msra.mxu1 %v2529_v57 }
  0x87   : > { %1517 = vmatmul.mubr.bf16.gmra.mrb[48].mxu0 %v2506_v58 }
  0x88   : > { %1614 = vmatmul.mubr.bf16.gmra.mrb[48].mxu1 %v2507_v59  ;;  %1524 = vmatprep.mubr.bf16.mxu0 %v2509_v60 }
  0x89   : > { %1621 = vmatprep.mubr.bf16.mxu1 %v2511_v61 }
  0x8f   : > { %1525 = vmatmul.mubr.bf16.gmra.mrb[52].mxu0 %v2513_v62 }
  0x90   : > { %1622 = vmatmul.mubr.bf16.gmra.mrb[52].mxu1 %v2514_v63  ;;  %1532 = vmatprep.mubr.bf16.mxu0 %v2516_v0 }
  0x91   : > { %1629 = vmatprep.mubr.bf16.mxu1 %v2518_v1 }
  0x97   : > { %1533 = vmatmul.mubr.bf16.gmra.mrb[56].mxu0 %v2520_v2 }
  0x98   : > { %1630 = vmatmul.mubr.bf16.gmra.mrb[56].mxu1 %v2521_v3  ;;  %1540 = vmatprep.mubr.bf16.mxu0 %v2523_v4 }
  0x99   : > { %1637 = vmatprep.mubr.bf16.mxu1 %v2525_v5 }
  0x9f   : > { %1541 = vmatmul.mubr.bf16.gmra.mrb[60].mxu0 %v2527_v6 }
  0xa0   : > { %1638 = vmatmul.mubr.bf16.gmra.mrb[60].mxu1 %v2528_v7  ;;  %2321 = vmatprep.mubr.bf16.mxu0 %v2530_v8 }
  0xa1   : > { %2329 = vmatprep.mubr.bf16.mxu1 %v2531_v9 }
  0xa7   : > { %2322 = vmatmul.mubr.bf16.vlgmr.msra.gmra.mrb[64].mxu0 %v2532_v10 }
  0xa8   : > { %2330 = vmatmul.mubr.bf16.vlgmr.msra.gmra.mrb[64].mxu1 %v2533_v11  ;;  %2325 = vmatprep.mubr.bf16.mxu0 %v2534_v12 }
  0xa9   : > { %2333 = vmatprep.mubr.bf16.mxu1 %v2535_v13 }
  0xaf   : > { %2326 = vmatmul.mubr.bf16.gmra.mrb[68].mxu0 %v2536_v14 }
  0xb0   : > { %2334 = vmatmul.mubr.bf16.gmra.mrb[68].mxu1 %v2537_v15 }
  0xfa   : > { %v2049_v16 = vpop.f32.mrb[0].mxu0 }
  0xfb   : > { %v2113_v17 = vpop.f32.mrb[0].mxu1  ;;  %v2050_v19 = vpop.f32.mrb[1].mxu0 }
  0xfc   : > { %v2051_v20 = vadd.f32 %v2050_v19, %v2049_v16  ;;  %v2114_v21 = vpop.f32.mrb[1].mxu1  ;;  %v2052_v22 = vpop.f32.mrb[2].mxu0 }
  0xfd   : > { %v2115_v23 = vadd.f32 %v2114_v21, %v2113_v17  ;;  %v2116_v24 = vpop.f32.mrb[2].mxu1  ;;  %v2053_v25 = vpop.f32.mrb[3].mxu0 }
  0xfe   : > { %v1293_v26 = vadd.f32 %v2051_v20, %v2880_v18  ;;  %v2054_v27 = vadd.f32 %v2053_v25, %v2052_v22  ;;  %v2117_v28 = vpop.f32.mrb[3].mxu1 }
  0xff   : > { %v2118_v29 = vadd.f32 %v2117_v28, %v2116_v24 }
 0x100   : > { %v2883_v30 = vadd.f32 %v2115_v23, %v1293_v26  ;;  %v1296_v31 = vadd.f32 %v2054_v27, %v2880_v18 }
 0x102   : > { %v2886_v32 = vadd.f32 %v2118_v29, %v1296_v31  ;;  %v2055_v33 = vpop.f32.mrb[4].mxu0 }
 0x103   : > { %v2119_v34 = vpop.f32.mrb[4].mxu1  ;;  %v2056_v35 = vpop.f32.mrb[5].mxu0 }
 0x104   : > { %v2057_v36 = vadd.f32 %v2056_v35, %v2055_v33  ;;  %v2120_v37 = vpop.f32.mrb[5].mxu1  ;;  %v2058_v38 = vpop.f32.mrb[6].mxu0 }
 0x105   : > { %v2121_v39 = vadd.f32 %v2120_v37, %v2119_v34  ;;  %v2122_v40 = vpop.f32.mrb[6].mxu1  ;;  %v2059_v41 = vpop.f32.mrb[7].mxu0 }
 0x106   : > { %v1301_v42 = vadd.f32 %v2057_v36, %v2880_v18  ;;  %v2060_v43 = vadd.f32 %v2059_v41, %v2058_v38  ;;  %v2123_v44 = vpop.f32.mrb[7].mxu1 }
 0x107   : > { %v2124_v45 = vadd.f32 %v2123_v44, %v2122_v40 }
 0x108   : > { %v2889_v46 = vadd.f32 %v2121_v39, %v1301_v42  ;;  %v1304_v47 = vadd.f32 %v2060_v43, %v2880_v18 }
 0x10a   : > { %v2892_v48 = vadd.f32 %v2124_v45, %v1304_v47  ;;  %v2061_v49 = vpop.f32.mrb[8].mxu0 }
 0x10b   : > { %v2125_v50 = vpop.f32.mrb[8].mxu1  ;;  %v2062_v51 = vpop.f32.mrb[9].mxu0 }
 0x10c   : > { %v2063_v52 = vadd.f32 %v2062_v51, %v2061_v49  ;;  %v2126_v53 = vpop.f32.mrb[9].mxu1  ;;  %v2064_v54 = vpop.f32.mrb[10].mxu0 }
 0x10d   : > { %v2127_v55 = vadd.f32 %v2126_v53, %v2125_v50  ;;  %v2128_v56 = vpop.f32.mrb[10].mxu1  ;;  %v2065_v57 = vpop.f32.mrb[11].mxu0 }
 0x10e   : > { %v1309_v58 = vadd.f32 %v2063_v52, %v2880_v18  ;;  %v2066_v59 = vadd.f32 %v2065_v57, %v2064_v54  ;;  %v2129_v60 = vpop.f32.mrb[11].mxu1 }
 0x10f   : > { %v2130_v61 = vadd.f32 %v2129_v60, %v2128_v56 }
 0x110   : > { %v2895_v62 = vadd.f32 %v2127_v55, %v1309_v58  ;;  %v1312_v63 = vadd.f32 %v2066_v59, %v2880_v18 }
 0x112   : > { %v2898_v0 = vadd.f32 %v2130_v61, %v1312_v63  ;;  %v2067_v1 = vpop.f32.mrb[12].mxu0 }
 0x113   : > { %v2131_v2 = vpop.f32.mrb[12].mxu1  ;;  %v2068_v3 = vpop.f32.mrb[13].mxu0 }
 0x114   : > { %v2069_v4 = vadd.f32 %v2068_v3, %v2067_v1  ;;  %v2132_v5 = vpop.f32.mrb[13].mxu1  ;;  %v2070_v6 = vpop.f32.mrb[14].mxu0 }
 0x115   : > { %v2133_v7 = vadd.f32 %v2132_v5, %v2131_v2  ;;  %v2134_v8 = vpop.f32.mrb[14].mxu1  ;;  %v2071_v9 = vpop.f32.mrb[15].mxu0 }
 0x116   : > { %v1317_v10 = vadd.f32 %v2069_v4, %v2880_v18  ;;  %v2072_v11 = vadd.f32 %v2071_v9, %v2070_v6  ;;  %v2135_v12 = vpop.f32.mrb[15].mxu1 }
 0x117   : > { %v2136_v13 = vadd.f32 %v2135_v12, %v2134_v8 }
 0x118   : > { %v2901_v14 = vadd.f32 %v2133_v7, %v1317_v10  ;;  %v1320_v15 = vadd.f32 %v2072_v11, %v2880_v18 }
 0x11a   : > { %v2904_v16 = vadd.f32 %v2136_v13, %v1320_v15  ;;  %v2073_v17 = vpop.f32.mrb[16].mxu0 }
 0x11b   : > { %v2137_v19 = vpop.f32.mrb[16].mxu1  ;;  %v2074_v20 = vpop.f32.mrb[17].mxu0 }
 0x11c   : > { %v2075_v21 = vadd.f32 %v2074_v20, %v2073_v17  ;;  %v2138_v22 = vpop.f32.mrb[17].mxu1  ;;  %v2076_v23 = vpop.f32.mrb[18].mxu0 }
 0x11d   : > { %v2139_v24 = vadd.f32 %v2138_v22, %v2137_v19  ;;  %v2140_v25 = vpop.f32.mrb[18].mxu1  ;;  %v2077_v26 = vpop.f32.mrb[19].mxu0 }
 0x11e   : > { %v1325_v27 = vadd.f32 %v2075_v21, %v2880_v18  ;;  %v2078_v28 = vadd.f32 %v2077_v26, %v2076_v23  ;;  %v2141_v29 = vpop.f32.mrb[19].mxu1 }
 0x11f   : > { %v2142_v31 = vadd.f32 %v2141_v29, %v2140_v25 }
 0x120   : > { %v2907_v33 = vadd.f32 %v2139_v24, %v1325_v27  ;;  %v1328_v34 = vadd.f32 %v2078_v28, %v2880_v18 }
 0x122   : > { %v2910_v35 = vadd.f32 %v2142_v31, %v1328_v34  ;;  %v2079_v36 = vpop.f32.mrb[20].mxu0 }
 0x123   : > { %v2143_v37 = vpop.f32.mrb[20].mxu1  ;;  %v2080_v38 = vpop.f32.mrb[21].mxu0 }
 0x124   : > { %v2081_v39 = vadd.f32 %v2080_v38, %v2079_v36  ;;  %v2144_v40 = vpop.f32.mrb[21].mxu1  ;;  %v2082_v41 = vpop.f32.mrb[22].mxu0 }
 0x125   : > { %v2145_v42 = vadd.f32 %v2144_v40, %v2143_v37  ;;  %v2146_v43 = vpop.f32.mrb[22].mxu1  ;;  %v2083_v44 = vpop.f32.mrb[23].mxu0 }
 0x126   : > { %v1333_v45 = vadd.f32 %v2081_v39, %v2880_v18  ;;  %v2084_v47 = vadd.f32 %v2083_v44, %v2082_v41  ;;  %v2147_v49 = vpop.f32.mrb[23].mxu1 }
 0x127   : > { %v2148_v50 = vadd.f32 %v2147_v49, %v2146_v43 }
 0x128   : > { %v2913_v51 = vadd.f32 %v2145_v42, %v1333_v45  ;;  %v1336_v52 = vadd.f32 %v2084_v47, %v2880_v18 }
 0x12a   : > { %v2916_v53 = vadd.f32 %v2148_v50, %v1336_v52  ;;  %v2085_v54 = vpop.f32.mrb[24].mxu0 }
 0x12b   : > { %v2149_v55 = vpop.f32.mrb[24].mxu1  ;;  %v2086_v56 = vpop.f32.mrb[25].mxu0 }
 0x12c   : > { %v2087_v57 = vadd.f32 %v2086_v56, %v2085_v54  ;;  %v2150_v58 = vpop.f32.mrb[25].mxu1  ;;  %v2088_v59 = vpop.f32.mrb[26].mxu0 }
 0x12d   : > { %v2151_v60 = vadd.f32 %v2150_v58, %v2149_v55  ;;  %v2152_v61 = vpop.f32.mrb[26].mxu1  ;;  %v2089_v63 = vpop.f32.mrb[27].mxu0 }
 0x12e   : > { %v1341_v1 = vadd.f32 %v2087_v57, %v2880_v18  ;;  %v2090_v2 = vadd.f32 %v2089_v63, %v2088_v59  ;;  %v2153_v3 = vpop.f32.mrb[27].mxu1 }
 0x12f   : > { %v2154_v4 = vadd.f32 %v2153_v3, %v2152_v61 }
 0x130   : > { %v2919_v5 = vadd.f32 %v2151_v60, %v1341_v1  ;;  %v1344_v6 = vadd.f32 %v2090_v2, %v2880_v18 }
 0x132   : > { %v2922_v7 = vadd.f32 %v2154_v4, %v1344_v6  ;;  %v2091_v8 = vpop.f32.mrb[28].mxu0 }
 0x133   : > { %v2155_v9 = vpop.f32.mrb[28].mxu1  ;;  %v2092_v10 = vpop.f32.mrb[29].mxu0 }
 0x134   : > { %v2093_v11 = vadd.f32 %v2092_v10, %v2091_v8  ;;  %v2156_v12 = vpop.f32.mrb[29].mxu1  ;;  %v2094_v13 = vpop.f32.mrb[30].mxu0 }
 0x135   : > { %v2157_v15 = vadd.f32 %v2156_v12, %v2155_v9  ;;  %v2158_v17 = vpop.f32.mrb[30].mxu1  ;;  %v2095_v19 = vpop.f32.mrb[31].mxu0 }
 0x136   : > { %v1349_v20 = vadd.f32 %v2093_v11, %v2880_v18  ;;  %v2096_v21 = vadd.f32 %v2095_v19, %v2094_v13  ;;  %v2159_v22 = vpop.f32.mrb[31].mxu1 }
 0x137   : > { %v2160_v23 = vadd.f32 %v2159_v22, %v2158_v17 }
 0x138   : > { %v2925_v24 = vadd.f32 %v2157_v15, %v1349_v20  ;;  %v1352_v25 = vadd.f32 %v2096_v21, %v2880_v18 }
 0x13a   : > { %v2928_v26 = vadd.f32 %v2160_v23, %v1352_v25  ;;  %v2177_v27 = vpop.f32.mrb[32].mxu0 }
 0x13b   : > { %v2241_v28 = vpop.f32.mrb[32].mxu1  ;;  %v2178_v29 = vpop.f32.mrb[33].mxu0 }
 0x13c   : > { %v2179_v31 = vadd.f32 %v2178_v29, %v2177_v27  ;;  %v2242_v34 = vpop.f32.mrb[33].mxu1  ;;  %v2180_v36 = vpop.f32.mrb[34].mxu0 }
 0x13d   : > { %v2243_v37 = vadd.f32 %v2242_v34, %v2241_v28  ;;  %v2244_v38 = vpop.f32.mrb[34].mxu1  ;;  %v2181_v39 = vpop.f32.mrb[35].mxu0 }
 0x13e   : > { %v1487_v40 = vadd.f32 %v2179_v31, %v2883_v30  ;;  %v2182_v41 = vadd.f32 %v2181_v39, %v2180_v36  ;;  %v2245_v42 = vpop.f32.mrb[35].mxu1 }
 0x13f   : > { %v2246_v43 = vadd.f32 %v2245_v42, %v2244_v38 }
 0x140   : > { %v1490_v44 = vadd.f32 %v2182_v41, %v2886_v32  ;;  %v2932_v45 = vadd.f32 %v2243_v37, %v1487_v40 }
 0x142   : > { %v2183_v18 = vpop.f32.mrb[36].mxu0  ;;  %v2934_v47 = vadd.f32 %v2246_v43, %v1490_v44 }
 0x143   : > { %v2247_v49 = vpop.f32.mrb[36].mxu1  ;;  %v2184_v50 = vpop.f32.mrb[37].mxu0 }
 0x144   : > { %v2185_v52 = vadd.f32 %v2184_v50, %v2183_v18  ;;  %v2248_v54 = vpop.f32.mrb[37].mxu1  ;;  %v2186_v55 = vpop.f32.mrb[38].mxu0 }
 0x145   : > { %v2249_v56 = vadd.f32 %v2248_v54, %v2247_v49  ;;  %v2250_v57 = vpop.f32.mrb[38].mxu1  ;;  %v2187_v58 = vpop.f32.mrb[39].mxu0 }
 0x146   : > { %v1495_v30 = vadd.f32 %v2185_v52, %v2889_v46  ;;  %v2188_v59 = vadd.f32 %v2187_v58, %v2186_v55  ;;  %v2251_v60 = vpop.f32.mrb[39].mxu1 }
 0x147   : > { %v2252_v61 = vadd.f32 %v2251_v60, %v2250_v57 }
 0x148   : > { %v1498_v32 = vadd.f32 %v2188_v59, %v2892_v48  ;;  %v2938_v63 = vadd.f32 %v2249_v56, %v1495_v30 }
 0x14a   : > { %v2189_v1 = vpop.f32.mrb[40].mxu0  ;;  %v2940_v2 = vadd.f32 %v2252_v61, %v1498_v32 }
 0x14b   : > { %v2253_v3 = vpop.f32.mrb[40].mxu1  ;;  %v2190_v4 = vpop.f32.mrb[41].mxu0 }
 0x14c   : > { %v2191_v6 = vadd.f32 %v2190_v4, %v2189_v1  ;;  %v2254_v8 = vpop.f32.mrb[41].mxu1  ;;  %v2192_v9 = vpop.f32.mrb[42].mxu0 }
 0x14d   : > { %v2255_v10 = vadd.f32 %v2254_v8, %v2253_v3  ;;  %v2256_v11 = vpop.f32.mrb[42].mxu1  ;;  %v2193_v12 = vpop.f32.mrb[43].mxu0 }
 0x14e   : > { %v1503_v46 = vadd.f32 %v2191_v6, %v2895_v62  ;;  %v2194_v13 = vadd.f32 %v2193_v12, %v2192_v9  ;;  %v2257_v15 = vpop.f32.mrb[43].mxu1 }
 0x14f   : > { %v2258_v17 = vadd.f32 %v2257_v15, %v2256_v11 }
 0x150   : > { %v1506_v48 = vadd.f32 %v2194_v13, %v2898_v0  ;;  %v2944_v19 = vadd.f32 %v2255_v10, %v1503_v46 }
 0x152   : > { %v2195_v20 = vpop.f32.mrb[44].mxu0  ;;  %v2946_v21 = vadd.f32 %v2258_v17, %v1506_v48 }
 0x153   : > { %v2259_v22 = vpop.f32.mrb[44].mxu1  ;;  %v2196_v23 = vpop.f32.mrb[45].mxu0 }
 0x154   : > { %v2197_v25 = vadd.f32 %v2196_v23, %v2195_v20  ;;  %v2260_v27 = vpop.f32.mrb[45].mxu1  ;;  %v2198_v28 = vpop.f32.mrb[46].mxu0 }
 0x155   : > { %v2261_v29 = vadd.f32 %v2260_v27, %v2259_v22  ;;  %v2262_v31 = vpop.f32.mrb[46].mxu1  ;;  %v2199_v34 = vpop.f32.mrb[47].mxu0 }
 0x156   : > { %v1511_v62 = vadd.f32 %v2197_v25, %v2901_v14  ;;  %v2200_v36 = vadd.f32 %v2199_v34, %v2198_v28  ;;  %v2263_v37 = vpop.f32.mrb[47].mxu1 }
 0x157   : > { %v2264_v38 = vadd.f32 %v2263_v37, %v2262_v31 }
 0x158   : > { %v1514_v0 = vadd.f32 %v2200_v36, %v2904_v16  ;;  %v2950_v39 = vadd.f32 %v2261_v29, %v1511_v62 }
 0x15a   : > { %v2201_v40 = vpop.f32.mrb[48].mxu0  ;;  %v2952_v41 = vadd.f32 %v2264_v38, %v1514_v0 }
 0x15b   : > { %v2265_v42 = vpop.f32.mrb[48].mxu1  ;;  %v2202_v43 = vpop.f32.mrb[49].mxu0 }
 0x15c   : > { %v2203_v44 = vadd.f32 %v2202_v43, %v2201_v40  ;;  %v2266_v18 = vpop.f32.mrb[49].mxu1  ;;  %v2204_v49 = vpop.f32.mrb[50].mxu0 }
 0x15d   : > { %v2267_v50 = vadd.f32 %v2266_v18, %v2265_v42  ;;  %v2268_v52 = vpop.f32.mrb[50].mxu1  ;;  %v2205_v54 = vpop.f32.mrb[51].mxu0 }
 0x15e   : > { %v1519_v14 = vadd.f32 %v2203_v44, %v2907_v33  ;;  %v2206_v55 = vadd.f32 %v2205_v54, %v2204_v49  ;;  %v2269_v56 = vpop.f32.mrb[51].mxu1 }
 0x15f   : > { %v2270_v57 = vadd.f32 %v2269_v56, %v2268_v52 }
 0x160   : > { %v1522_v16 = vadd.f32 %v2206_v55, %v2910_v35  ;;  %v2956_v58 = vadd.f32 %v2267_v50, %v1519_v14  ;;  %v1745_v55 = vld [vmem:[%s2975_s29 + $0x10] sm:$0xff] }
 0x162   : > { %v2207_v30 = vpop.f32.mrb[52].mxu0  ;;  %v2958_v59 = vadd.f32 %v2270_v57, %v1522_v16  ;;  %v1753_v16 = vld [vmem:[%s2975_s29 + $0x50] sm:$0xff] }
 0x163   : > { %v2271_v60 = vpop.f32.mrb[52].mxu1  ;;  %v2208_v61 = vpop.f32.mrb[53].mxu0 }
 0x164   : > { %v2209_v32 = vadd.f32 %v2208_v61, %v2207_v30  ;;  %v2272_v1 = vpop.f32.mrb[53].mxu1  ;;  %v2210_v3 = vpop.f32.mrb[54].mxu0 }
 0x165   : > { %v2273_v4 = vadd.f32 %v2272_v1, %v2271_v60  ;;  %v2274_v6 = vpop.f32.mrb[54].mxu1  ;;  %v2211_v8 = vpop.f32.mrb[55].mxu0  ;;  %v1743_v60 = vld [vmem:[%s2975_s29] sm:$0xff] }
 0x166   : > { %v1527_v33 = vadd.f32 %v2209_v32, %v2913_v51  ;;  %v2212_v9 = vadd.f32 %v2211_v8, %v2210_v3  ;;  %v2275_v10 = vpop.f32.mrb[55].mxu1  ;;  %v1751_v3 = vld [vmem:[%s2975_s29 + $0x40] sm:$0xff] }
 0x167   : > { %v2276_v11 = vadd.f32 %v2275_v10, %v2274_v6 }
 0x168   : > { %v1530_v35 = vadd.f32 %v2212_v9, %v2916_v53  ;;  %v1624_v12 = vadd.f32 %v2273_v4, %v1527_v33  ;;  %v1746_v4 = vld [vmem:[%s2975_s29 + $0x18] sm:$0xff] }
 0x169   : > { %v1754_v9 = vld [vmem:[%s2975_s29 + $0x58] sm:$0xff] }
 0x16a   : > { %v2213_v46 = vpop.f32.mrb[56].mxu0  ;;  %v1627_v13 = vadd.f32 %v2276_v11, %v1530_v35  ;;  %v1744_v11 = vld [vmem:[%s2975_s29 + $0x8] sm:$0xff] }
 0x16b   : > { %v2277_v15 = vpop.f32.mrb[56].mxu1  ;;  %v2214_v17 = vpop.f32.mrb[57].mxu0 }
 0x16c   : > { %v2215_v48 = vadd.f32 %v2214_v17, %v2213_v46  ;;  %v2278_v20 = vpop.f32.mrb[57].mxu1  ;;  %v2216_v22 = vpop.f32.mrb[58].mxu0 }
 0x16d   : > { %v2279_v23 = vadd.f32 %v2278_v20, %v2277_v15  ;;  %v2280_v25 = vpop.f32.mrb[58].mxu1  ;;  %v2217_v27 = vpop.f32.mrb[59].mxu0 }
 0x16e   : > { %v1535_v28 = vadd.f32 %v2215_v48, %v2919_v5  ;;  %v2218_v51 = vadd.f32 %v2217_v27, %v2216_v22  ;;  %v2281_v29 = vpop.f32.mrb[59].mxu1 }
 0x16f   : > { %v2282_v31 = vadd.f32 %v2281_v29, %v2280_v25 }
 0x170   : > { %v1538_v34 = vadd.f32 %v2218_v51, %v2922_v7  ;;  %v2964_v53 = vadd.f32 %v2279_v23, %v1535_v28 }
 0x172   : > { %v2219_v62 = vpop.f32.mrb[60].mxu0  ;;  %v2966_v36 = vadd.f32 %v2282_v31, %v1538_v34 }
 0x173   : > { %v2283_v37 = vpop.f32.mrb[60].mxu1  ;;  %v2220_v38 = vpop.f32.mrb[61].mxu0 }
 0x174   : > { %v2221_v0 = vadd.f32 %v2220_v38, %v2219_v62  ;;  %v2284_v40 = vpop.f32.mrb[61].mxu1  ;;  %v2222_v42 = vpop.f32.mrb[62].mxu0  ;;  %v1757_v38 = vld [vmem:[%s2975_s29 + $0x70] sm:$0xff] }
 0x175   : > { %v2285_v43 = vadd.f32 %v2284_v40, %v2283_v37  ;;  %v2286_v44 = vpop.f32.mrb[62].mxu1  ;;  %v2223_v5 = vpop.f32.mrb[63].mxu0  ;;  %v1747_v40 = vld [vmem:[%s2975_s29 + $0x20] sm:$0xff] }
 0x176   : > { %v1543_v18 = vadd.f32 %v2221_v0, %v2925_v24  ;;  %v2224_v49 = vadd.f32 %v2223_v5, %v2222_v42  ;;  %v2287_v50 = vpop.f32.mrb[63].mxu1  ;;  %v1755_v5 = vld [vmem:[%s2975_s29 + $0x60] sm:$0xff] }
 0x177   : > { %v2288_v7 = vadd.f32 %v2287_v50, %v2286_v44 }
 0x178   : > { %v1546_v52 = vadd.f32 %v2224_v49, %v2928_v26  ;;  %v1640_v54 = vadd.f32 %v2285_v43, %v1543_v18  ;;  %v1750_v49 = vld [vmem:[%s2975_s29 + $0x38] sm:$0xff] }
 0x17a   : > { %v2323_v14 = vpop.f32.mrb[64].mxu0  ;;  %v2979_v24 = vadd.f32 %v2288_v7, %v1546_v52 }
 0x17b   : > { %v1689_v56 = vadd.f32 %v2323_v14, %v2938_v63  ;;  %v2331_v57 = vpop.f32.mrb[64].mxu1  ;;  %v1680_v30 = vpop.f32.mrb[65].mxu0  ;;  %v1758_v14 = vld [vmem:[%s2975_s29 + $0x78] sm:$0xff] }
 0x17c   : > { %v1721_v61 = vadd.f32 %v2331_v57, %v1624_v12  ;;  %v1681_v32 = vadd.f32 %v1680_v30, %v2932_v45  ;;  %v1712_v1 = vpop.f32.mrb[65].mxu1  ;;  %v2324_v26 = vpop.f32.mrb[66].mxu0 }
 0x17d   : > { %v1761_v6 = vadd.f32 %v1745_v55, %v1689_v56  ;;  %v1713_v8 = vadd.f32 %v1712_v1, %v2956_v58  ;;  %v1692_v33 = vadd.f32 %v2324_v26, %v2940_v2  ;;  %v2332_v63 = vpop.f32.mrb[66].mxu1  ;;  %v1683_v10 = vpop.f32.mrb[67].mxu0  ;;  %v1752_v2 = vld [vmem:[%s2975_s29 + $0x48] sm:$0xff] }
 0x17e   : > { %v1769_v45 = vadd.f32 %v1753_v16, %v1721_v61  ;;  %v1759_v35 = vadd.f32 %v1743_v60, %v1681_v32  ;;  %v1724_v12 = vadd.f32 %v2332_v63, %v1627_v13  ;;  %v1684_v46 = vadd.f32 %v1683_v10, %v2934_v47  ;;  %v1715_v58 = vpop.f32.mrb[67].mxu1  ;;  %v1748_v56 = vld [vmem:[%s2975_s29 + $0x28] sm:$0xff] }
 0x17f   : > { %v1777_v15 = vmax.f32 %v1761_v6, 0.0  ;;  %v1767_v17 = vadd.f32 %v1751_v3, %v1713_v8  ;;  %v1762_v48 = vadd.f32 %v1746_v4, %v1692_v33  ;;  %v1716_v20 = vadd.f32 %v1715_v58, %v2958_v59  ;;  %v1749_v59 = vld [vmem:[%s2975_s29 + $0x30] sm:$0xff]  ;;  %v1756_v60 = vld [vmem:[%s2975_s29 + $0x68] sm:$0xff] }
 0x180   : > { %v1785_v22 = vmax.f32 %v1769_v45, 0.0  ;;  %v1775_v23 = vmax.f32 %v1759_v35, 0.0  ;;  %v1770_v25 = vadd.f32 %v1754_v9, %v1724_v12  ;;  %v1760_v27 = vadd.f32 %v1744_v11, %v1684_v46 }
 0x181   : > { %1793 = vst [vmem:[%s2996_s16 + $0x10] sm:$0xff] %v1777_v15  ;;  %v1783_v13 = vmax.f32 %v1767_v17, 0.0  ;;  %v1778_v47 = vmax.f32 %v1762_v48, 0.0  ;;  %v1768_v28 = vadd.f32 %v1752_v2, %v1716_v20 }
 0x182   : > { %1801 = vst [vmem:[%s2996_s16 + $0x50] sm:$0xff] %v1785_v22  ;;  %1791 = vst [vmem:[%s2996_s16] sm:$0xff] %v1775_v23  ;;  %v1786_v51 = vmax.f32 %v1770_v25, 0.0  ;;  %v1776_v29 = vmax.f32 %v1760_v27, 0.0  ;;  %v2327_v31 = vpop.f32.mrb[68].mxu0 }
 0x183   : > { %1799 = vst [vmem:[%s2996_s16 + $0x40] sm:$0xff] %v1783_v13  ;;  %1794 = vst [vmem:[%s2996_s16 + $0x18] sm:$0xff] %v1778_v47  ;;  %v1784_v34 = vmax.f32 %v1768_v28, 0.0  ;;  %v1705_v62 = vadd.f32 %v2327_v31, %v2950_v39  ;;  %v2335_v37 = vpop.f32.mrb[68].mxu1  ;;  %v1696_v0 = vpop.f32.mrb[69].mxu0 }
 0x184   : > { %1802 = vst [vmem:[%s2996_s16 + $0x58] sm:$0xff] %v1786_v51  ;;  %1792 = vst [vmem:[%s2996_s16 + $0x8] sm:$0xff] %v1776_v29  ;;  %v1737_v42 = vadd.f32 %v2335_v37, %v1640_v54  ;;  %v1697_v43 = vadd.f32 %v1696_v0, %v2944_v19  ;;  %v1728_v44 = vpop.f32.mrb[69].mxu1  ;;  %v2328_v18 = vpop.f32.mrb[70].mxu0 }
 0x185   : > { %1800 = vst [vmem:[%s2996_s16 + $0x48] sm:$0xff] %v1784_v34  ;;  %v1765_v50 = vadd.f32 %v1749_v59, %v1705_v62  ;;  %v1729_v39 = vadd.f32 %v1728_v44, %v2964_v53  ;;  %v1708_v7 = vadd.f32 %v2328_v18, %v2952_v41  ;;  %v2336_v52 = vpop.f32.mrb[70].mxu1  ;;  %v1699_v55 = vpop.f32.mrb[71].mxu0 }
 0x186   : > { %v1773_v57 = vadd.f32 %v1757_v38, %v1737_v42  ;;  %v1763_v54 = vadd.f32 %v1747_v40, %v1697_v43  ;;  %v1740_v19 = vadd.f32 %v2336_v52, %v2979_v24  ;;  %v1700_v16 = vadd.f32 %v1699_v55, %v2946_v21  ;;  %v1731_v30 = vpop.f32.mrb[71].mxu1 }
 0x187   : > { %v1781_v61 = vmax.f32 %v1765_v50, 0.0  ;;  %v1771_v53 = vadd.f32 %v1755_v5, %v1729_v39  ;;  %v1766_v41 = vadd.f32 %v1750_v49, %v1708_v7  ;;  %v1732_v32 = vadd.f32 %v1731_v30, %v2966_v36 }
 0x188   : > { %v1789_v1 = vmax.f32 %v1773_v57, 0.0  ;;  %v1779_v3 = vmax.f32 %v1763_v54, 0.0  ;;  %v1774_v26 = vadd.f32 %v1758_v14, %v1740_v19  ;;  %v1764_v24 = vadd.f32 %v1748_v56, %v1700_v16 }
 0x189   : > { %1797 = vst [vmem:[%s2996_s16 + $0x30] sm:$0xff] %v1781_v61  ;;  %v1787_v4 = vmax.f32 %v1771_v53, 0.0  ;;  %v1782_v21 = vmax.f32 %v1766_v41, 0.0  ;;  %v1772_v6 = vadd.f32 %v1756_v60, %v1732_v32 }
 0x18a   : > { %1805 = vst [vmem:[%s2996_s16 + $0x70] sm:$0xff] %v1789_v1  ;;  %1795 = vst [vmem:[%s2996_s16 + $0x20] sm:$0xff] %v1779_v3  ;;  %v1790_v8 = vmax.f32 %v1774_v26, 0.0  ;;  %v1780_v33 = vmax.f32 %v1764_v24, 0.0 }
 0x18b   : > { %1803 = vst [vmem:[%s2996_s16 + $0x60] sm:$0xff] %v1787_v4  ;;  %1798 = vst [vmem:[%s2996_s16 + $0x38] sm:$0xff] %v1782_v21  ;;  %v1788_v63 = vmax.f32 %v1772_v6, 0.0 }
 0x18c   : > { %1806 = vst [vmem:[%s2996_s16 + $0x78] sm:$0xff] %v1790_v8  ;;  %1796 = vst [vmem:[%s2996_s16 + $0x28] sm:$0xff] %v1780_v33 }
 0x18d   : > { %1804 = vst [vmem:[%s2996_s16 + $0x68] sm:$0xff] %v1788_v63 }
 0x18e PF: > { %s14_s15 = sadd.s32 1, %s2544_s15  }
 0x18f   : > { %p11_p4 = scmp.ge.s32.totalorder %s14_s15, 6  }
 0x191   :  { %13 = sbr.rel (!%p11_p4) target bundleno = 1 (0x1), region = 69 }

// kernel: _lambda_.9
= control target key start
LH: loop header
LB: loop body
LE: loop exit
PB: predicated region body
PF: predicated region fallthrough
CT: control target
= control target key end

     0   :  { %s1875_s12 = smov 0   ;;  %s2158_s0 = inlined_call_operand.vmem [shape: bf16[128,1152], index: 0, kind: input, shape index: {}]   ;;  %s2159_s1 = inlined_call_operand.vmem [shape: bf16[1152,128], index: 1, kind: input, shape index: {}]   ;;  %s2160_s2 = inlined_call_operand.vmem [shape: f32[1,128], index: 2, kind: input, shape index: {}]   ;;  %s2161_s3 = inlined_call_operand.vmem [shape: f32[128,128], index: 3, kind: output, shape index: {}]  }
   0x1 LB: > { %s1382_s13 = sadd.s32 4294967295, %s1853_s12   ;;  %p1386_p0 = scmp.ge.s32.totalorder %s1853_s12, 1  ;;  %s1853_s12 = sphi %s1875_s12, %s13_s12  }
   0x2   : > { %p139_p1 = scmp.lt.s32.totalorder %s1853_s12, 3 }
   0x4   : > { %p140_p2 = pnand %p1386_p0, %p139_p1 }
   0x5   : > { %v1723_v0 = vld [vmem:[%s2159_s1 + $0x40] sm:$0xff] (!%p140_p2)   ;;  %v1727_v4 = vld [vmem:[%s2159_s1 + $0x48] sm:$0xff] (!%p140_p2)   ;;  %v1731_v8 = vld [vmem:[%s2159_s1 + $0x50] sm:$0xff] (!%p140_p2)   ;;  %s1387_s19 = sshll.u32 (!%p140_p2), %s1382_s13, 3 }
   0x6   : > { %143 = sbr.rel (%p140_p2) target bundleno = 325 (0x145), region = 32  ;;  %v1724_v1 = vld [vmem:[%s2159_s1 + $0xc0] sm:$0xff] (!%p140_p2)   ;;  %1502 = vmatprep.subr.bf16.mxu0 (!%p140_p2), %v1723_v0  ;;  %v1728_v5 = vld [vmem:[%s2159_s1 + $0xc8] sm:$0xff] (!%p140_p2)   ;;  %v1732_v9 = vld [vmem:[%s2159_s1 + $0xd0] sm:$0xff] (!%p140_p2)   ;;  %p165_p3 = scmp.lt.s32.totalorder (!%p140_p2), %s1387_s19, 15 }
   0x7   : > { %v1725_v2 = vld [vmem:[%s2159_s1] sm:$0xff] (!%p140_p2)   ;;  %1542 = vmatprep.subr.bf16.mxu1 (!%p140_p2), %v1724_v1  ;;  %v1729_v6 = vld [vmem:[%s2159_s1 + $0x8] sm:$0xff] (!%p140_p2)   ;;  %v1733_v10 = vld [vmem:[%s2159_s1 + $0x10] sm:$0xff] (!%p140_p2)  }
   0x8   : > { %v1726_v3 = vld [vmem:[%s2159_s1 + $0x80] sm:$0xff] (!%p140_p2)   ;;  %1503 = vmatpush3.bf16.msra.mxu0 (!%p140_p2), %v1725_v2  ;;  %v1730_v7 = vld [vmem:[%s2159_s1 + $0x88] sm:$0xff] (!%p140_p2)   ;;  %v1734_v11 = vld [vmem:[%s2159_s1 + $0x90] sm:$0xff] (!%p140_p2)  }
   0x9   : > { %1543 = vmatpush3.bf16.msra.mxu1 (!%p140_p2), %v1726_v3  ;;  %1504 = vmatprep.subr.bf16.mxu0 (!%p140_p2), %v1727_v4  ;;  %v1735_v12 = vld [vmem:[%s2159_s1 + $0x58] sm:$0xff] (!%p140_p2)   ;;  %v1739_v16 = vld [vmem:[%s2159_s1 + $0x60] sm:$0xff] (!%p140_p2)   ;;  %v1743_v20 = vld [vmem:[%s2159_s1 + $0x68] sm:$0xff] (!%p140_p2)  }
   0xa   : > { %1544 = vmatprep.subr.bf16.mxu1 (!%p140_p2), %v1728_v5  ;;  %v1736_v13 = vld [vmem:[%s2159_s1 + $0xd8] sm:$0xff] (!%p140_p2)   ;;  %v1740_v17 = vld [vmem:[%s2159_s1 + $0xe0] sm:$0xff] (!%p140_p2)   ;;  %v1744_v21 = vld [vmem:[%s2159_s1 + $0xe8] sm:$0xff] (!%p140_p2)  }
   0xb   : > { %v1737_v14 = vld [vmem:[%s2159_s1 + $0x18] sm:$0xff] (!%p140_p2)   ;;  %v1741_v18 = vld [vmem:[%s2159_s1 + $0x20] sm:$0xff] (!%p140_p2)   ;;  %v1745_v22 = vld [vmem:[%s2159_s1 + $0x28] sm:$0xff] (!%p140_p2)  }
   0xc   : > { %1505 = vmatpush3.bf16.msra.mxu0 (!%p140_p2), %v1729_v6  ;;  %v1738_v15 = vld [vmem:[%s2159_s1 + $0x98] sm:$0xff] (!%p140_p2)   ;;  %v1742_v19 = vld [vmem:[%s2159_s1 + $0xa0] sm:$0xff] (!%p140_p2)   ;;  %v1746_v23 = vld [vmem:[%s2159_s1 + $0xa8] sm:$0xff] (!%p140_p2)  }
   0xd   : > { %1545 = vmatpush3.bf16.msra.mxu1 %v1730_v7  ;;  %1506 = vmatprep.subr.bf16.mxu0 %v1731_v8  ;;  %s2163_s19 = smov (!%p165_p3, %s1387_s19), 15  ;;  %v1747_v24 = vld [vmem:[%s2159_s1 + $0x70] sm:$0xff]   ;;  %v1751_v28 = vld [vmem:[%s2159_s1 + $0x78] sm:$0xff]   ;;  %v1761_v36 = vld [vmem:[%s2159_s1 + $0x140] sm:$0xff]  }
   0xe   : > { %1546 = vmatprep.subr.bf16.mxu1 %v1732_v9  ;;  %v1748_v25 = vld [vmem:[%s2159_s1 + $0xf0] sm:$0xff]   ;;  %s1714_s16 = smul.u32 36, %s2163_s19  ;;  %v1752_v29 = vld [vmem:[%s2159_s1 + $0xf8] sm:$0xff]   ;;  %v1762_v37 = vld [vmem:[%s2159_s1 + $0x1c0] sm:$0xff]  }
   0xf   : > { %v1749_v26 = vld [vmem:[%s2159_s1 + $0x30] sm:$0xff]   ;;  %v1753_v30 = vld [vmem:[%s2159_s1 + $0x38] sm:$0xff]   ;;  %v1763_v38 = vld [vmem:[%s2159_s1 + $0x100] sm:$0xff]  }
  0x10   : > { %1507 = vmatpush3.bf16.msra.mxu0 %v1733_v10  ;;  %v1750_v27 = vld [vmem:[%s2159_s1 + $0xb0] sm:$0xff]   ;;  %s1981_s13 = scalar_lea.vmem %s2158_s0, %s1714_s16  ;;  %v1754_v31 = vld [vmem:[%s2159_s1 + $0xb8] sm:$0xff]   ;;  %v1764_v39 = vld [vmem:[%s2159_s1 + $0x180] sm:$0xff]  }
  0x11   : > { %1547 = vmatpush3.bf16.msra.mxu1 %v1734_v11  ;;  %1508 = vmatprep.subr.bf16.mxu0 %v1735_v12  ;;  %v1755_v32 = vld [vmem:[%s1981_s13] ss:$36 sps:$4 sm:$0xff]   ;;  %v1758_v34 = vld [vmem:[%s1981_s13 + $0x8] ss:$36 sps:$4 sm:$0xff]   ;;  %v1771_v45 = vld [vmem:[%s1981_s13 + $0x54] ss:$36 sps:$4 sm:$0xff]  }
  0x12   : > { %1548 = vmatprep.subr.bf16.mxu1 %v1736_v13  ;;  %v1757_v33 = vld [vmem:[%s1981_s13 + $0x4] ss:$36 sps:$4 sm:$0xff]   ;;  %v1760_v35 = vld [vmem:[%s1981_s13 + $0xc] ss:$36 sps:$4 sm:$0xff]   ;;  %v1779_v52 = vld [vmem:[%s2159_s1 + $0x158] sm:$0xff]  }
  0x13   : > { %1017 = vmatprep.mubr.bf16.mxu0 %v1757_v33  ;;  %1082 = vmatprep.mubr.bf16.mxu1 %v1760_v35  ;;  %v1765_v40 = vld [vmem:[%s2159_s1 + $0x148] sm:$0xff]   ;;  %v1774_v47 = vld [vmem:[%s1981_s13 + $0x50] ss:$36 sps:$4 sm:$0xff]   ;;  %v1780_v53 = vld [vmem:[%s2159_s1 + $0x1d8] sm:$0xff]  }
  0x14   : > { %1509 = vmatpush3.bf16.msra.mxu0 %v1737_v14  ;;  %v1766_v41 = vld [vmem:[%s2159_s1 + $0x1c8] sm:$0xff]   ;;  %v1775_v48 = vld [vmem:[%s2159_s1 + $0x150] sm:$0xff]   ;;  %v1781_v54 = vld [vmem:[%s2159_s1 + $0x118] sm:$0xff]  }
  0x15   : > { %1549 = vmatpush3.bf16.msra.mxu1 %v1738_v15  ;;  %1510 = vmatprep.subr.bf16.mxu0 %v1739_v16  ;;  %v1767_v42 = vld [vmem:[%s2159_s1 + $0x108] sm:$0xff]   ;;  %v1776_v49 = vld [vmem:[%s2159_s1 + $0x1d0] sm:$0xff]   ;;  %v1782_v55 = vld [vmem:[%s2159_s1 + $0x198] sm:$0xff]  }
  0x16   : > { %1550 = vmatprep.subr.bf16.mxu1 %v1740_v17  ;;  %v1768_v43 = vld [vmem:[%s2159_s1 + $0x188] sm:$0xff]   ;;  %v1777_v50 = vld [vmem:[%s2159_s1 + $0x110] sm:$0xff]   ;;  %v1785_v57 = vld [vmem:[%s1981_s13 + $0x9c] ss:$36 sps:$4 sm:$0xff]  }
  0x17   : > { %v1769_v44 = vld [vmem:[%s1981_s13 + $0x4c] ss:$36 sps:$4 sm:$0xff]   ;;  %v1783_v56 = vld [vmem:[%s1981_s13 + $0x94] ss:$36 sps:$4 sm:$0xff]   ;;  %v1789_v60 = vld [vmem:[%s2159_s1 + $0x160] sm:$0xff]  }
  0x18   : > { %1511 = vmatpush3.bf16.msra.mxu0 %v1741_v18  ;;  %v1773_v46 = vld [vmem:[%s1981_s13 + $0x48] ss:$36 sps:$4 sm:$0xff]   ;;  %v1778_v51 = vld [vmem:[%s2159_s1 + $0x190] sm:$0xff]   ;;  %v1788_v59 = vld [vmem:[%s1981_s13 + $0x98] ss:$36 sps:$4 sm:$0xff]  }
  0x19   : > { %1551 = vmatpush3.bf16.msra.mxu1 %v1742_v19  ;;  %1512 = vmatprep.subr.bf16.mxu0 %v1743_v20  ;;  %v1787_v58 = vld [vmem:[%s1981_s13 + $0x90] ss:$36 sps:$4 sm:$0xff]   ;;  %v1790_v61 = vld [vmem:[%s2159_s1 + $0x1e0] sm:$0xff]   ;;  %v1793_v0 = vld [vmem:[%s2159_s1 + $0x168] sm:$0xff]  }
  0x1a   : > { %1552 = vmatprep.subr.bf16.mxu1 %v1744_v21  ;;  %v1791_v62 = vld [vmem:[%s2159_s1 + $0x120] sm:$0xff]   ;;  %v1794_v1 = vld [vmem:[%s2159_s1 + $0x1e8] sm:$0xff]   ;;  %v1801_v6 = vld [vmem:[%s1981_s13 + $0xd8] ss:$36 sps:$4 sm:$0xff]  }
  0x1b   : > { %v1792_v63 = vld [vmem:[%s2159_s1 + $0x1a0] sm:$0xff]   ;;  %v1795_v2 = vld [vmem:[%s2159_s1 + $0x128] sm:$0xff]   ;;  %v1803_v8 = vld [vmem:[%s2159_s1 + $0x170] sm:$0xff]  }
  0x1c   : > { %1513 = vmatpush3.bf16.msra.mxu0 %v1745_v22  ;;  %v1796_v3 = vld [vmem:[%s2159_s1 + $0x1a8] sm:$0xff]   ;;  %v1797_v4 = vld [vmem:[%s1981_s13 + $0xdc] ss:$36 sps:$4 sm:$0xff]   ;;  %v1804_v9 = vld [vmem:[%s2159_s1 + $0x1f0] sm:$0xff]  }
  0x1d   : > { %1553 = vmatpush3.bf16.msra.mxu1 %v1746_v23  ;;  %1514 = vmatprep.subr.bf16.mxu0 %v1747_v24  ;;  %v1799_v5 = vld [vmem:[%s1981_s13 + $0xe4] ss:$36 sps:$4 sm:$0xff]   ;;  %v1805_v10 = vld [vmem:[%s2159_s1 + $0x130] sm:$0xff]   ;;  %v1807_v12 = vld [vmem:[%s2159_s1 + $0x178] sm:$0xff]  }
  0x1e   : > { %1554 = vmatprep.subr.bf16.mxu1 %v1748_v25  ;;  %v1802_v7 = vld [vmem:[%s1981_s13 + $0xe0] ss:$36 sps:$4 sm:$0xff]   ;;  %v1806_v11 = vld [vmem:[%s2159_s1 + $0x1b0] sm:$0xff]   ;;  %v1808_v13 = vld [vmem:[%s2159_s1 + $0x1f8] sm:$0xff]  }
  0x1f   : > { %v1809_v14 = vld [vmem:[%s2159_s1 + $0x138] sm:$0xff]   ;;  %v1811_v16 = vld [vmem:[%s1981_s13 + $0x10] ss:$36 sps:$4 sm:$0xff]   ;;  %v1817_v20 = vld [vmem:[%s2159_s1 + $0x200] sm:$0xff]  }
  0x20   : > { %1515 = vmatpush3.bf16.msra.mxu0 %v1749_v26  ;;  %v1810_v15 = vld [vmem:[%s2159_s1 + $0x1b8] sm:$0xff]   ;;  %v1818_v21 = vld [vmem:[%s2159_s1 + $0x208] sm:$0xff]   ;;  %v1824_v25 = vld [vmem:[%s1981_s13 + $0x60] ss:$36 sps:$4 sm:$0xff]  }
  0x21   : > { %1555 = vmatpush3.bf16.msra.mxu1 %v1750_v27  ;;  %1516 = vmatprep.subr.bf16.mxu0 %v1751_v28  ;;  %v1813_v17 = vld [vmem:[%s1981_s13 + $0x14] ss:$36 sps:$4 sm:$0xff]   ;;  %v1816_v19 = vld [vmem:[%s1981_s13 + $0x1c] ss:$36 sps:$4 sm:$0xff]   ;;  %v1821_v23 = vld [vmem:[%s1981_s13 + $0x64] ss:$36 sps:$4 sm:$0xff]  }
  0x22   : > { %1556 = vmatprep.subr.bf16.mxu1 %v1752_v29  ;;  %v1814_v18 = vld [vmem:[%s1981_s13 + $0x18] ss:$36 sps:$4 sm:$0xff]   ;;  %v1825_v26 = vld [vmem:[%s2159_s1 + $0x210] sm:$0xff]   ;;  %v1827_v27 = vld [vmem:[%s1981_s13 + $0xa4] ss:$36 sps:$4 sm:$0xff]  }
  0x23   : > { %v1819_v22 = vld [vmem:[%s1981_s13 + $0x5c] ss:$36 sps:$4 sm:$0xff]   ;;  %v1829_v28 = vld [vmem:[%s1981_s13 + $0xac] ss:$36 sps:$4 sm:$0xff]  }
  0x24   : > { %1517 = vmatpush3.bf16.msra.mxu0 %v1753_v30  ;;  %v1823_v24 = vld [vmem:[%s1981_s13 + $0x58] ss:$36 sps:$4 sm:$0xff]   ;;  %v1831_v30 = vld [vmem:[%s1981_s13 + $0xa0] ss:$36 sps:$4 sm:$0xff]   ;;  %v1835_v33 = vld [vmem:[%s1981_s13 + $0xec] ss:$36 sps:$4 sm:$0xff]  }
  0x25   : > { %1557 = vmatpush3.bf16.msra.mxu1 %v1754_v31  ;;  %1582 = vmatprep.subr.bf16.mxu0 %v1761_v36  ;;  %v1826_v29 = vld [vmem:[%s2159_s1 + $0x218] sm:$0xff]   ;;  %v1832_v31 = vld [vmem:[%s1981_s13 + $0xa8] ss:$36 sps:$4 sm:$0xff]  }
  0x26   : > { %1622 = vmatprep.subr.bf16.mxu1 %v1762_v37  ;;  %v1834_v35 = vld [vmem:[%s2159_s1 + $0x228] sm:$0xff]   ;;  %v1841_v37 = vld [vmem:[%s2159_s1 + $0x230] sm:$0xff]  }
  0x27   : > { %1018 = vmatmul.mubr.bf16.vlgmr.msra.gmra.mrb[0].mxu0 %v1755_v32  ;;  %v1833_v32 = vld [vmem:[%s2159_s1 + $0x220] sm:$0xff]   ;;  %v1839_v36 = vld [vmem:[%s1981_s13 + $0xe8] ss:$36 sps:$4 sm:$0xff]  }
  0x28   : > { %1083 = vmatmul.mubr.bf16.vlgmr.msra.gmra.mrb[0].mxu1 %v1758_v34  ;;  %1583 = vmatpush3.bf16.msra.mxu0 %v1763_v38  ;;  %v1837_v34 = vld [vmem:[%s1981_s13 + $0xf4] ss:$36 sps:$4 sm:$0xff]  }
  0x29   : > { %1623 = vmatpush3.bf16.msra.mxu1 %v1764_v39  ;;  %1584 = vmatprep.subr.bf16.mxu0 %v1765_v40  ;;  %v1840_v38 = vld [vmem:[%s1981_s13 + $0xf0] ss:$36 sps:$4 sm:$0xff]   ;;  %v1843_v39 = vld [vmem:[%s1981_s13 + $0x20] ss:$36 sps:$4 sm:$0xff]  }
  0x2a   : > { %1624 = vmatprep.subr.bf16.mxu1 %v1766_v41  ;;  %1025 = vmatprep.mubr.bf16.mxu0 %v1769_v44  ;;  %v1844_v40 = vld [vmem:[%s1981_s13 + $0xb0] ss:$36 sps:$4 sm:$0xff]   ;;  %v1842_v41 = vld [vmem:[%s2159_s1 + $0x238] sm:$0xff]  }
  0x2b   : > { %1090 = vmatprep.mubr.bf16.mxu1 %v1771_v45 }
  0x2c   : > { %1585 = vmatpush3.bf16.msra.mxu0 %v1767_v42  ;;  %v1845_v42 = vld [vmem:[%s1981_s13 + $0x68] ss:$36 sps:$4 sm:$0xff]  }
  0x2d   : > { %1625 = vmatpush3.bf16.msra.mxu1 %v1768_v43  ;;  %1586 = vmatprep.subr.bf16.mxu0 %v1775_v48  ;;  %v1846_v43 = vld [vmem:[%s1981_s13 + $0xf8] ss:$36 sps:$4 sm:$0xff]   ;;  %s1390_s13 = sshll.u32 %s2163_s19, 3 }
  0x2e   : > { %1626 = vmatprep.subr.bf16.mxu1 %v1776_v49  ;;  %s175_s20 = scalar_lea.vmem %s2161_s3, %s1390_s13 }
  0x2f   : > { %1026 = vmatmul.mubr.bf16.gmra.mrb[4].mxu0 %v1773_v46  ;;  %v1391_v46 = vld [vmem:[%s2160_s2] ss:$0 sm:$0xff] }
  0x30   : > { %1091 = vmatmul.mubr.bf16.gmra.mrb[4].mxu1 %v1774_v47  ;;  %1587 = vmatpush3.bf16.msra.mxu0 %v1777_v50 }
  0x31   : > { %1627 = vmatpush3.bf16.msra.mxu1 %v1778_v51  ;;  %1588 = vmatprep.subr.bf16.mxu0 %v1779_v52 }
  0x32   : > { %1628 = vmatprep.subr.bf16.mxu1 %v1780_v53  ;;  %1033 = vmatprep.mubr.bf16.mxu0 %v1783_v56 }
  0x33   : > { %1098 = vmatprep.mubr.bf16.mxu1 %v1785_v57 }
  0x34   : > { %1589 = vmatpush3.bf16.msra.mxu0 %v1781_v54 }
  0x35   : > { %1629 = vmatpush3.bf16.msra.mxu1 %v1782_v55  ;;  %1590 = vmatprep.subr.bf16.mxu0 %v1789_v60 }
  0x36   : > { %1630 = vmatprep.subr.bf16.mxu1 %v1790_v61 }
  0x37   : > { %1034 = vmatmul.mubr.bf16.gmra.mrb[8].mxu0 %v1787_v58 }
  0x38   : > { %1099 = vmatmul.mubr.bf16.gmra.mrb[8].mxu1 %v1788_v59  ;;  %1591 = vmatpush3.bf16.msra.mxu0 %v1791_v62 }
  0x39   : > { %1631 = vmatpush3.bf16.msra.mxu1 %v1792_v63  ;;  %1592 = vmatprep.subr.bf16.mxu0 %v1793_v0 }
  0x3a   : > { %1632 = vmatprep.subr.bf16.mxu1 %v1794_v1  ;;  %1041 = vmatprep.mubr.bf16.mxu0 %v1797_v4 }
  0x3b   : > { %1106 = vmatprep.mubr.bf16.mxu1 %v1799_v5 }
  0x3c   : > { %1593 = vmatpush3.bf16.msra.mxu0 %v1795_v2 }
  0x3d   : > { %1633 = vmatpush3.bf16.msra.mxu1 %v1796_v3  ;;  %1594 = vmatprep.subr.bf16.mxu0 %v1803_v8 }
  0x3e   : > { %1634 = vmatprep.subr.bf16.mxu1 %v1804_v9 }
  0x3f   : > { %1042 = vmatmul.mubr.bf16.gmra.mrb[12].mxu0 %v1801_v6 }
  0x40   : > { %1107 = vmatmul.mubr.bf16.gmra.mrb[12].mxu1 %v1802_v7  ;;  %1595 = vmatpush3.bf16.msra.mxu0 %v1805_v10 }
  0x41   : > { %1635 = vmatpush3.bf16.msra.mxu1 %v1806_v11  ;;  %1596 = vmatprep.subr.bf16.mxu0 %v1807_v12 }
  0x42   : > { %1636 = vmatprep.subr.bf16.mxu1 %v1808_v13  ;;  %1147 = vmatprep.mubr.bf16.mxu0 %v1813_v17 }
  0x43   : > { %1212 = vmatprep.mubr.bf16.mxu1 %v1816_v19 }
  0x44   : > { %1597 = vmatpush3.bf16.msra.mxu0 %v1809_v14 }
  0x45   : > { %1637 = vmatpush3.bf16.msra.mxu1 %v1810_v15  ;;  %1674 = vmatprep.subr.bf16.mxu0 %v1817_v20 }
  0x46   : > { %1698 = vmatprep.subr.bf16.mxu1 %v1817_v20 }
  0x47   : > { %1148 = vmatmul.mubr.bf16.vlgmr.msra.gmra.mrb[16].mxu0 %v1811_v16 }
  0x48   : > { %1213 = vmatmul.mubr.bf16.vlgmr.msra.gmra.mrb[16].mxu1 %v1814_v18  ;;  %1675 = vmatpush3.bf16.msra.mxu0 %v1817_v20 }
  0x49   : > { %1706 = vmatpush3.bf16.msra.mxu1 %v1817_v20  ;;  %1676 = vmatprep.subr.bf16.mxu0 %v1818_v21 }
  0x4a   : > { %1699 = vmatprep.subr.bf16.mxu1 %v1818_v21  ;;  %1155 = vmatprep.mubr.bf16.mxu0 %v1819_v22 }
  0x4b   : > { %1220 = vmatprep.mubr.bf16.mxu1 %v1821_v23 }
  0x4c   : > { %1677 = vmatpush3.bf16.msra.mxu0 %v1818_v21 }
  0x4d   : > { %1707 = vmatpush3.bf16.msra.mxu1 %v1818_v21  ;;  %1678 = vmatprep.subr.bf16.mxu0 %v1825_v26 }
  0x4e   : > { %1700 = vmatprep.subr.bf16.mxu1 %v1825_v26 }
  0x4f   : > { %1156 = vmatmul.mubr.bf16.gmra.mrb[20].mxu0 %v1823_v24 }
  0x50   : > { %1221 = vmatmul.mubr.bf16.gmra.mrb[20].mxu1 %v1824_v25  ;;  %1163 = vmatprep.mubr.bf16.mxu0 %v1827_v27 }
  0x51   : > { %1679 = vmatpush3.bf16.msra.mxu0 %v1825_v26  ;;  %1228 = vmatprep.mubr.bf16.mxu1 %v1829_v28 }
  0x52   : > { %1708 = vmatpush3.bf16.msra.mxu1 %v1825_v26  ;;  %1680 = vmatprep.subr.bf16.mxu0 %v1826_v29 }
  0x53   : > { %1701 = vmatprep.subr.bf16.mxu1 %v1826_v29 }
  0x55   : > { %1681 = vmatpush3.bf16.msra.mxu0 %v1826_v29 }
  0x56   : > { %1709 = vmatpush3.bf16.msra.mxu1 %v1826_v29  ;;  %1682 = vmatprep.subr.bf16.mxu0 %v1833_v32 }
  0x57   : > { %1164 = vmatmul.mubr.bf16.gmra.mrb[24].mxu0 %v1831_v30  ;;  %1702 = vmatprep.subr.bf16.mxu1 %v1833_v32 }
  0x58   : > { %1229 = vmatmul.mubr.bf16.gmra.mrb[24].mxu1 %v1832_v31  ;;  %1171 = vmatprep.mubr.bf16.mxu0 %v1835_v33 }
  0x59   : > { %1683 = vmatpush3.bf16.msra.mxu0 %v1833_v32  ;;  %1236 = vmatprep.mubr.bf16.mxu1 %v1837_v34 }
  0x5a   : > { %1710 = vmatpush3.bf16.msra.mxu1 %v1833_v32  ;;  %1684 = vmatprep.subr.bf16.mxu0 %v1834_v35 }
  0x5b   : > { %1703 = vmatprep.subr.bf16.mxu1 %v1834_v35 }
  0x5d   : > { %1685 = vmatpush3.bf16.msra.mxu0 %v1834_v35 }
  0x5e   : > { %1711 = vmatpush3.bf16.msra.mxu1 %v1834_v35  ;;  %1686 = vmatprep.subr.bf16.mxu0 %v1841_v37 }
  0x5f   : > { %1172 = vmatmul.mubr.bf16.gmra.mrb[28].mxu0 %v1839_v36  ;;  %1704 = vmatprep.subr.bf16.mxu1 %v1841_v37 }
  0x60   : > { %1237 = vmatmul.mubr.bf16.gmra.mrb[28].mxu1 %v1840_v38  ;;  %1690 = vmatprep.mubr.bf16.mxu0 %v1843_v39 }
  0x61   : > { %1687 = vmatpush3.bf16.msra.mxu0 %v1841_v37  ;;  %1694 = vmatprep.mubr.bf16.mxu1 %v1844_v40 }
  0x62   : > { %1712 = vmatpush3.bf16.msra.mxu1 %v1841_v37  ;;  %1688 = vmatprep.subr.bf16.mxu0 %v1842_v41 }
  0x63   : > { %1705 = vmatprep.subr.bf16.mxu1 %v1842_v41 }
  0x65   : > { %1689 = vmatpush3.bf16.msra.mxu0 %v1842_v41 }
  0x66   : > { %1713 = vmatpush3.bf16.msra.mxu1 %v1842_v41 }
  0x68   : > { %1691 = vmatmul.mubr.bf16.vlgmr.msra.gmra.mrb[32].mxu0 %v1845_v42 }
  0x69   : > { %1695 = vmatmul.mubr.bf16.vlgmr.msra.gmra.mrb[32].mxu1 %v1846_v43 }
  0xfa   : > { %v1518_v44 = vpop.f32.mrb[0].mxu0 }
  0xfb   : > { %v1558_v45 = vpop.f32.mrb[0].mxu1  ;;  %v1519_v47 = vpop.f32.mrb[1].mxu0 }
  0xfc   : > { %v1520_v48 = vadd.f32 %v1519_v47, %v1518_v44  ;;  %v1559_v49 = vpop.f32.mrb[1].mxu1  ;;  %v1521_v50 = vpop.f32.mrb[2].mxu0 }
  0xfd   : > { %v1560_v51 = vadd.f32 %v1559_v49, %v1558_v45  ;;  %v1561_v52 = vpop.f32.mrb[2].mxu1  ;;  %v1522_v53 = vpop.f32.mrb[3].mxu0 }
  0xfe   : > { %v1020_v54 = vadd.f32 %v1520_v48, %v1391_v46  ;;  %v1523_v55 = vadd.f32 %v1522_v53, %v1521_v50  ;;  %v1562_v56 = vpop.f32.mrb[3].mxu1 }
  0xff   : > { %v1563_v57 = vadd.f32 %v1562_v56, %v1561_v52 }
 0x100   : > { %v1085_v58 = vadd.f32 %v1560_v51, %v1020_v54  ;;  %v1023_v59 = vadd.f32 %v1523_v55, %v1391_v46 }
 0x102   : > { %v1088_v60 = vadd.f32 %v1563_v57, %v1023_v59  ;;  %v1524_v61 = vpop.f32.mrb[4].mxu0 }
 0x103   : > { %v1564_v62 = vpop.f32.mrb[4].mxu1  ;;  %v1525_v63 = vpop.f32.mrb[5].mxu0 }
 0x104   : > { %v1526_v0 = vadd.f32 %v1525_v63, %v1524_v61  ;;  %v1565_v1 = vpop.f32.mrb[5].mxu1  ;;  %v1527_v2 = vpop.f32.mrb[6].mxu0 }
 0x105   : > { %v1566_v3 = vadd.f32 %v1565_v1, %v1564_v62  ;;  %v1567_v4 = vpop.f32.mrb[6].mxu1  ;;  %v1528_v5 = vpop.f32.mrb[7].mxu0 }
 0x106   : > { %v1028_v6 = vadd.f32 %v1526_v0, %v1391_v46  ;;  %v1529_v7 = vadd.f32 %v1528_v5, %v1527_v2  ;;  %v1568_v8 = vpop.f32.mrb[7].mxu1 }
 0x107   : > { %v1569_v9 = vadd.f32 %v1568_v8, %v1567_v4 }
 0x108   : > { %v1093_v10 = vadd.f32 %v1566_v3, %v1028_v6  ;;  %v1031_v11 = vadd.f32 %v1529_v7, %v1391_v46 }
 0x10a   : > { %v1096_v12 = vadd.f32 %v1569_v9, %v1031_v11  ;;  %v1530_v13 = vpop.f32.mrb[8].mxu0 }
 0x10b   : > { %v1570_v14 = vpop.f32.mrb[8].mxu1  ;;  %v1531_v15 = vpop.f32.mrb[9].mxu0 }
 0x10c   : > { %v1532_v16 = vadd.f32 %v1531_v15, %v1530_v13  ;;  %v1571_v17 = vpop.f32.mrb[9].mxu1  ;;  %v1533_v18 = vpop.f32.mrb[10].mxu0 }
 0x10d   : > { %v1572_v19 = vadd.f32 %v1571_v17, %v1570_v14  ;;  %v1573_v20 = vpop.f32.mrb[10].mxu1  ;;  %v1534_v21 = vpop.f32.mrb[11].mxu0 }
 0x10e   : > { %v1036_v22 = vadd.f32 %v1532_v16, %v1391_v46  ;;  %v1535_v23 = vadd.f32 %v1534_v21, %v1533_v18  ;;  %v1574_v24 = vpop.f32.mrb[11].mxu1 }
 0x10f   : > { %v1575_v25 = vadd.f32 %v1574_v24, %v1573_v20 }
 0x110   : > { %v1101_v26 = vadd.f32 %v1572_v19, %v1036_v22  ;;  %v1039_v27 = vadd.f32 %v1535_v23, %v1391_v46 }
 0x112   : > { %v1104_v28 = vadd.f32 %v1575_v25, %v1039_v27  ;;  %v1536_v29 = vpop.f32.mrb[12].mxu0 }
 0x113   : > { %v1576_v30 = vpop.f32.mrb[12].mxu1  ;;  %v1537_v31 = vpop.f32.mrb[13].mxu0 }
 0x114   : > { %v1577_v32 = vpop.f32.mrb[13].mxu1  ;;  %v1538_v33 = vadd.f32 %v1537_v31, %v1536_v29  ;;  %v1539_v35 = vpop.f32.mrb[14].mxu0 }
 0x115   : > { %v1578_v34 = vadd.f32 %v1577_v32, %v1576_v30  ;;  %v1579_v36 = vpop.f32.mrb[14].mxu1  ;;  %v1540_v37 = vpop.f32.mrb[15].mxu0 }
 0x116   : > { %v1580_v38 = vpop.f32.mrb[15].mxu1  ;;  %v1044_v39 = vadd.f32 %v1538_v33, %v1391_v46  ;;  %v1541_v40 = vadd.f32 %v1540_v37, %v1539_v35 }
 0x117   : > { %v1581_v41 = vadd.f32 %v1580_v38, %v1579_v36 }
 0x118   : > { %v1109_v42 = vadd.f32 %v1578_v34, %v1044_v39  ;;  %v1047_v43 = vadd.f32 %v1541_v40, %v1391_v46 }
 0x11a   : > { %v1112_v44 = vadd.f32 %v1581_v41, %v1047_v43  ;;  %v1598_v45 = vpop.f32.mrb[16].mxu0 }
 0x11b   : > { %v1599_v47 = vpop.f32.mrb[17].mxu0  ;;  %v1638_v48 = vpop.f32.mrb[16].mxu1 }
 0x11c   : > { %v1600_v49 = vadd.f32 %v1599_v47, %v1598_v45  ;;  %v1601_v50 = vpop.f32.mrb[18].mxu0  ;;  %v1639_v51 = vpop.f32.mrb[17].mxu1 }
 0x11d   : > { %v1602_v52 = vpop.f32.mrb[19].mxu0  ;;  %v1640_v54 = vadd.f32 %v1639_v51, %v1638_v48  ;;  %v1641_v55 = vpop.f32.mrb[18].mxu1 }
 0x11e   : > { %v1150_v53 = vadd.f32 %v1600_v49, %v1085_v58  ;;  %v1603_v56 = vadd.f32 %v1602_v52, %v1601_v50  ;;  %v1642_v57 = vpop.f32.mrb[19].mxu1 }
 0x11f   : > { %v1643_v61 = vadd.f32 %v1642_v57, %v1641_v55 }
 0x120   : > { %v1153_v59 = vadd.f32 %v1603_v56, %v1088_v60  ;;  %v1215_v62 = vadd.f32 %v1640_v54, %v1150_v53 }
 0x122   : > { %v1604_v63 = vpop.f32.mrb[20].mxu0  ;;  %v2148_v0 = vadd.f32 %v1643_v61, %v1153_v59 }
 0x123   : > { %v1605_v46 = vpop.f32.mrb[21].mxu0  ;;  %v1644_v1 = vpop.f32.mrb[20].mxu1 }
 0x124   : > { %v1606_v2 = vadd.f32 %v1605_v46, %v1604_v63  ;;  %v1607_v3 = vpop.f32.mrb[22].mxu0  ;;  %v1645_v4 = vpop.f32.mrb[21].mxu1 }
 0x125   : > { %v1608_v5 = vpop.f32.mrb[23].mxu0  ;;  %v1646_v7 = vadd.f32 %v1645_v4, %v1644_v1  ;;  %v1647_v8 = vpop.f32.mrb[22].mxu1 }
 0x126   : > { %v1158_v6 = vadd.f32 %v1606_v2, %v1093_v10  ;;  %v1609_v58 = vadd.f32 %v1608_v5, %v1607_v3  ;;  %v1648_v9 = vpop.f32.mrb[23].mxu1 }
 0x127   : > { %v1649_v13 = vadd.f32 %v1648_v9, %v1647_v8 }
 0x128   : > { %v1161_v11 = vadd.f32 %v1609_v58, %v1096_v12  ;;  %v1223_v14 = vadd.f32 %v1646_v7, %v1158_v6 }
 0x12a   : > { %v1610_v60 = vpop.f32.mrb[24].mxu0  ;;  %v1226_v15 = vadd.f32 %v1649_v13, %v1161_v11 }
 0x12b   : > { %v1611_v16 = vpop.f32.mrb[25].mxu0  ;;  %v1650_v17 = vpop.f32.mrb[24].mxu1 }
 0x12c   : > { %v1612_v18 = vadd.f32 %v1611_v16, %v1610_v60  ;;  %v1613_v19 = vpop.f32.mrb[26].mxu0  ;;  %v1651_v20 = vpop.f32.mrb[25].mxu1 }
 0x12d   : > { %v1614_v21 = vpop.f32.mrb[27].mxu0  ;;  %v1652_v23 = vadd.f32 %v1651_v20, %v1650_v17  ;;  %v1653_v24 = vpop.f32.mrb[26].mxu1 }
 0x12e   : > { %v1166_v22 = vadd.f32 %v1612_v18, %v1101_v26  ;;  %v1615_v25 = vadd.f32 %v1614_v21, %v1613_v19  ;;  %v1654_v10 = vpop.f32.mrb[27].mxu1 }
 0x12f   : > { %v1655_v29 = vadd.f32 %v1654_v10, %v1653_v24 }
 0x130   : > { %v1169_v27 = vadd.f32 %v1615_v25, %v1104_v28  ;;  %v1231_v30 = vadd.f32 %v1652_v23, %v1166_v22 }
 0x132   : > { %v1616_v31 = vpop.f32.mrb[28].mxu0  ;;  %v1234_v12 = vadd.f32 %v1655_v29, %v1169_v27 }
 0x133   : > { %v1617_v32 = vpop.f32.mrb[29].mxu0  ;;  %v1656_v33 = vpop.f32.mrb[28].mxu1 }
 0x134   : > { %v1618_v34 = vadd.f32 %v1617_v32, %v1616_v31  ;;  %v1619_v35 = vpop.f32.mrb[30].mxu0  ;;  %v1657_v36 = vpop.f32.mrb[29].mxu1 }
 0x135   : > { %v1620_v37 = vpop.f32.mrb[31].mxu0  ;;  %v1658_v39 = vadd.f32 %v1657_v36, %v1656_v33  ;;  %v1659_v40 = vpop.f32.mrb[30].mxu1 }
 0x136   : > { %v1174_v38 = vadd.f32 %v1618_v34, %v1109_v42  ;;  %v1621_v26 = vadd.f32 %v1620_v37, %v1619_v35  ;;  %v1660_v41 = vpop.f32.mrb[31].mxu1 }
 0x137   : > { %v1661_v45 = vadd.f32 %v1660_v41, %v1659_v40 }
 0x138   : > { %v1177_v43 = vadd.f32 %v1621_v26, %v1112_v44  ;;  %v1239_v47 = vadd.f32 %v1658_v39, %v1174_v38 }
 0x13a   : > { %v1242_v28 = vadd.f32 %v1661_v45, %v1177_v43 }
 0x13b   : > { %v1692_v48 = vpop.f32.mrb[32].mxu0 }
 0x13c   : > { %v1288_v49 = vadd.f32 %v1692_v48, %v1223_v14  ;;  %v1696_v50 = vpop.f32.mrb[32].mxu1  ;;  %v1279_v51 = vpop.f32.mrb[33].mxu0 }
 0x13d   : > { %v1304_v52 = vadd.f32 %v1696_v50, %v1239_v47  ;;  %v1280_v53 = vadd.f32 %v1279_v51, %v1215_v62  ;;  %v1295_v42 = vpop.f32.mrb[33].mxu1  ;;  %v1693_v54 = vpop.f32.mrb[34].mxu0 }
 0x13e   : > { %v1312_v55 = vmax.f32 %v1288_v49, 0.0  ;;  %v1296_v56 = vadd.f32 %v1295_v42, %v1231_v30  ;;  %v1291_v57 = vadd.f32 %v1693_v54, %v1226_v15  ;;  %v1697_v44 = vpop.f32.mrb[34].mxu1  ;;  %v1282_v59 = vpop.f32.mrb[35].mxu0 }
 0x13f   : > { %v1316_v61 = vmax.f32 %v1304_v52, 0.0  ;;  %v1310_v63 = vmax.f32 %v1280_v53, 0.0  ;;  %v1307_v46 = vadd.f32 %v1697_v44, %v1242_v28  ;;  %v1283_v1 = vadd.f32 %v1282_v59, %v2148_v0  ;;  %v1298_v2 = vpop.f32.mrb[35].mxu1 }
 0x140   : > { %1320 = vst [vmem:[%s175_s20 + $0x10] sm:$0xff] %v1312_v55  ;;  %v1314_v3 = vmax.f32 %v1296_v56, 0.0  ;;  %v1313_v4 = vmax.f32 %v1291_v57, 0.0  ;;  %v1299_v5 = vadd.f32 %v1298_v2, %v1234_v12 }
 0x141   : > { %1324 = vst [vmem:[%s175_s20 + $0x30] sm:$0xff] %v1316_v61  ;;  %1318 = vst [vmem:[%s175_s20] sm:$0xff] %v1310_v63  ;;  %v1317_v62 = vmax.f32 %v1307_v46, 0.0  ;;  %v1311_v6 = vmax.f32 %v1283_v1, 0.0 }
 0x142   : > { %1322 = vst [vmem:[%s175_s20 + $0x20] sm:$0xff] %v1314_v3  ;;  %1321 = vst [vmem:[%s175_s20 + $0x18] sm:$0xff] %v1313_v4  ;;  %v1315_v7 = vmax.f32 %v1299_v5, 0.0 }
 0x143   : > { %1325 = vst [vmem:[%s175_s20 + $0x38] sm:$0xff] %v1317_v62  ;;  %1319 = vst [vmem:[%s175_s20 + $0x8] sm:$0xff] %v1311_v6 }
 0x144   : > { %1323 = vst [vmem:[%s175_s20 + $0x28] sm:$0xff] %v1315_v7 }
 0x145 PF: > { %s13_s12 = sadd.s32 1, %s1853_s12  }
 0x146   : > { %p10_p4 = scmp.ge.s32.totalorder %s13_s12, 4  }
 0x148   :  { %12 = sbr.rel (!%p10_p4) target bundleno = 1 (0x1), region = 62 }

// kernel: _lambda_.11
= control target key start
LH: loop header
LB: loop body
LE: loop exit
PB: predicated region body
PF: predicated region fallthrough
CT: control target
= control target key end

     0   :  { %v369_v1 = vmov 0.0   ;;  %vm370_vm0 = vmmov 0   ;;  %s463_s0 = inlined_call_operand.vmem [shape: bf16[2,128], index: 0, kind: input, shape index: {}]   ;;  %s464_s1 = inlined_call_operand.vmem [shape: bf16[128,128], index: 1, kind: input, shape index: {}]   ;;  %s465_s2 = inlined_call_operand.vmem [shape: bf16[128,128], index: 2, kind: input, shape index: {}]   ;;  %s466_s3 = inlined_call_operand.vmem [shape: f32[1,128], index: 3, kind: input, shape index: {}]   ;;  %s467_s4 = inlined_call_operand.hbm [shape: f32[2,128], index: 4, kind: output, shape index: {}]  }
   0x1   :  { %v329_v0 = vld [vmem:[%s464_s1] sm:$0xff]   ;;  %286 = vmatprep.subr.bf16.mxu0 %v369_v1  ;;  %306 = vmatprep.subr.bf16.mxu1 %v369_v1  ;;  %v330_v2 = vld [vmem:[%s464_s1 + $0x8] sm:$0xff]   ;;  %v331_v3 = vld [vmem:[%s464_s1 + $0x10] sm:$0xff]  }
   0x2   :  { %287 = vmatpush3.bf16.msra.mxu0 %v329_v0  ;;  %302 = vmatprep.mubr.msk.bf16.mxu0 %vm370_vm0, %v369_v1  ;;  %v337_v4 = vld [vmem:[%s465_s2] sm:$0xff]   ;;  %v332_v5 = vld [vmem:[%s464_s1 + $0x18] sm:$0xff]   ;;  %v338_v6 = vld [vmem:[%s465_s2 + $0x8] sm:$0xff]  }
   0x3   :  { %288 = vmatprep.subr.bf16.mxu0 %v369_v1  ;;  %322 = vmatprep.mubr.msk.bf16.mxu1 %vm370_vm0, %v369_v1  ;;  %v333_v7 = vld [vmem:[%s464_s1 + $0x20] sm:$0xff]   ;;  %v339_v8 = vld [vmem:[%s465_s2 + $0x10] sm:$0xff]  }
   0x4   :  { %307 = vmatpush3.bf16.msra.mxu1 %v337_v4 }
   0x5   :  { %308 = vmatprep.subr.bf16.mxu1 %v369_v1 }
   0x6   :  { %289 = vmatpush3.bf16.msra.mxu0 %v330_v2 }
   0x7   :  { %290 = vmatprep.subr.bf16.mxu0 %v369_v1 }
   0x8   :  { %309 = vmatpush3.bf16.msra.mxu1 %v338_v6 }
   0x9   :  { %310 = vmatprep.subr.bf16.mxu1 %v369_v1 }
   0xa   :  { %291 = vmatpush3.bf16.msra.mxu0 %v331_v3 }
   0xb   :  { %292 = vmatprep.subr.bf16.mxu0 %v369_v1 }
   0xe   :  { %293 = vmatpush3.bf16.msra.mxu0 %v332_v5 }
   0xf   :  { %294 = vmatprep.subr.bf16.mxu0 %v369_v1 }
  0x10   :  { %9 = vsyncpa [#allocation3], 0  ;;  %v334_v9 = vld [vmem:[%s464_s1 + $0x28] sm:$0xff]   ;;  %311 = vmatpush3.bf16.msra.mxu1 %v339_v8  ;;  %v340_v10 = vld [vmem:[%s465_s2 + $0x18] sm:$0xff]   ;;  %s371_s23 = smov [#allocation2]  }
  0x11   :  { %312 = vmatprep.subr.bf16.mxu1 %v369_v1  ;;  %v335_v11 = vld [vmem:[%s464_s1 + $0x30] sm:$0xff]   ;;  %v341_v12 = vld [vmem:[%s465_s2 + $0x20] sm:$0xff]   ;;  %v336_v13 = vld [vmem:[%s464_s1 + $0x38] sm:$0xff]   ;;  %s243_s24 = sshll.u32 %s371_s23, 4  ;;  %s244_s24 = int_to_ptr.vmem [resolvable:$true] %s243_s24 }
  0x12   :  { %295 = vmatpush3.bf16.msra.mxu0 %v333_v7  ;;  %v342_v14 = vld [vmem:[%s465_s2 + $0x28] sm:$0xff]   ;;  %v19_v15 = vld [vmem:[%s463_s0] sm:$0x1]  ;;  %v343_v16 = vld [vmem:[%s465_s2 + $0x30] sm:$0xff]   ;;  %p350_p1 = scmp.lt.s32.totalorder %s244_s24, %s244_s24 }
  0x13   :  { %296 = vmatprep.subr.bf16.mxu0 %v369_v1  ;;  %v344_v17 = vld [vmem:[%s465_s2 + $0x38] sm:$0xff]   ;;  %v259_v23 = vld [vmem:[%s466_s3] ss:$0 sm:$0xff]  ;;  %s345_s2 = scalar_lea.vmem %s244_s24, 32 }
  0x14   :  { %313 = vmatpush3.bf16.msra.mxu1 %v340_v10  ;;  %p346_p0 = scmp.ne.s32.totalorder %s244_s24, %s345_s2  ;;  %p351_p2 = scmp.lt.s32.totalorder %s345_s2, %s345_s2 }
  0x15   :  { %314 = vmatprep.subr.bf16.mxu1 %v369_v1 }
  0x16   :  { %297 = vmatpush3.bf16.msra.mxu0 %v334_v9  ;;  %p352_p3 = por %p351_p2, %p350_p1 }
  0x17   :  { %298 = vmatprep.subr.bf16.mxu0 %v369_v1 }
  0x18   :  { %315 = vmatpush3.bf16.msra.mxu1 %v341_v12  ;;  %p353_p4 = pnand %p352_p3, %p346_p0 }
  0x19   :  { %316 = vmatprep.subr.bf16.mxu1 %v369_v1 }
  0x1a   :  { %299 = vmatpush3.bf16.msra.mxu0 %v335_v11 }
  0x1b   :  { %300 = vmatprep.subr.bf16.mxu0 %v369_v1 }
  0x1c   :  { %317 = vmatpush3.bf16.msra.mxu1 %v342_v14 }
  0x1d   :  { %318 = vmatprep.subr.bf16.mxu1 %v369_v1 }
  0x1e   :  { %301 = vmatpush3.bf16.msra.mxu0 %v336_v13 }
  0x20   :  { %319 = vmatpush3.bf16.msra.mxu1 %v343_v16 }
  0x21   :  { %303 = vmatmul.mubr.bf16.vlgmr.msra.gmra.mrb[0].mxu0 %v19_v15  ;;  %320 = vmatprep.subr.bf16.mxu1 %v369_v1 }
  0x24   :  { %321 = vmatpush3.bf16.msra.mxu1 %v344_v17 }
  0xf4   :  { %v118_v18 = vpop.f32.mrb[0].mxu0 }
  0xf5   :  { %v124_v19 = vpack.c.bf16 %v118_v18, %v118_v18  ;;  %v304_v20 = vpop.f32.mrb[1].mxu0 }
  0xf6   :  { %v121_v21 = vpop.f32.mrb[2].mxu0 }
  0xf7   :  { %v305_v22 = vpop.f32.mrb[3].mxu0  ;;  %323 = vmatmul.mubr.bf16.vlgmr.msra.gmra.mrb[0].mxu1 %v124_v19 }
 0x1ca   :  { %v230_v24 = vpop.f32.mrb[0].mxu1 }
 0x1cb   :  { %v231_v25 = vadd.f32 %v259_v23, %v230_v24  ;;  %v324_v26 = vpop.f32.mrb[1].mxu1 }
 0x1cc   :  { %v233_v27 = vpop.f32.mrb[2].mxu1 }
 0x1cd   :  { %236 = vst [vmem:[#allocation2] sm:$0x3] %v231_v25  ;;  %v325_v28 = vpop.f32.mrb[3].mxu1 }
 0x1ce   :  { %356 = shalt.err (!%p353_p4)
}
 0x1cf   :  { %s357_s3 = scalar_lea.hbm %s467_s4, 32 }
 0x1d0   :  { %p358_p5 = scmp.ne.s32.totalorder %s467_s4, %s357_s3  ;;  %p361_p6 = scmp.lt.u32.totalorder %s357_s3, %s467_s4 }
 0x1d2   :  { %p363_p7 = pnand %p361_p6, %p358_p5 }
 0x1d4   :  { %366 = shalt.err (!%p363_p7)
}
 0x1d5   :  { %246 = dma.vmem_to_hbm [thread:$0]  %s244_s24, 32, %s467_s4, [#allocation3]  }
 0x1d6   :  { %367 = dma.done.wait [#allocation3], 32  }
 0x1d7   :  { %368 = vsyncadd [#allocation3], 4294967264 }
 0x1d8   :  { %250 = vsyncpa [#allocation3], 1 }

// kernel: _lambda_.10
= control target key start
LH: loop header
LB: loop body
LE: loop exit
PB: predicated region body
PF: predicated region fallthrough
CT: control target
= control target key end

     0   :  { %s2252_s21 = smov 0   ;;  %s2573_s0 = inlined_call_operand.vmem [shape: bf16[128,1152], index: 0, kind: input, shape index: {}]   ;;  %s2574_s1 = inlined_call_operand.vmem [shape: bf16[1152,128], index: 1, kind: input, shape index: {}]   ;;  %s2575_s2 = inlined_call_operand.vmem [shape: f32[1,128], index: 2, kind: input, shape index: {}]   ;;  %s2576_s3 = inlined_call_operand.vmem [shape: bf16[128,128], index: 3, kind: input, shape index: {}]   ;;  %s2577_s4 = inlined_call_operand.vmem [shape: bf16[128,128], index: 4, kind: input, shape index: {}]   ;;  %s2578_s5 = inlined_call_operand.vmem [shape: f32[1,128], index: 5, kind: input, shape index: {}]   ;;  %s2579_s6 = inlined_call_operand.vmem [shape: f32[128,128], index: 6, kind: output, shape index: {}]  }
   0x1 LB: > { %s1673_s22 = sadd.s32 4294967295, %s2215_s21   ;;  %p1677_p0 = scmp.ge.s32.totalorder %s2215_s21, 1  ;;  %s2215_s21 = sphi %s2252_s21, %s16_s21  }
   0x2   : > { %p225_p1 = scmp.lt.s32.totalorder %s2215_s21, 3 }
   0x4   : > { %p226_p2 = pnand %p1677_p0, %p225_p1 }
   0x5   : > { %v2073_v0 = vld [vmem:[%s2574_s1 + $0x40] sm:$0xff] (!%p226_p2)   ;;  %v2077_v4 = vld [vmem:[%s2574_s1 + $0x48] sm:$0xff] (!%p226_p2)   ;;  %v2081_v8 = vld [vmem:[%s2574_s1 + $0x50] sm:$0xff] (!%p226_p2)   ;;  %s1678_s7 = sshll.u32 (!%p226_p2), %s1673_s22, 3 }
   0x6   : > { %229 = sbr.rel (%p226_p2) target bundleno = 336 (0x150), region = 44  ;;  %v2074_v1 = vld [vmem:[%s2574_s1 + $0xc0] sm:$0xff] (!%p226_p2)   ;;  %1808 = vmatprep.subr.bf16.mxu0 (!%p226_p2), %v2073_v0  ;;  %v2078_v5 = vld [vmem:[%s2574_s1 + $0xc8] sm:$0xff] (!%p226_p2)   ;;  %v2082_v9 = vld [vmem:[%s2574_s1 + $0xd0] sm:$0xff] (!%p226_p2)   ;;  %p262_p3 = scmp.lt.s32.totalorder (!%p226_p2), %s1678_s7, 15 }
   0x7   : > { %v2075_v2 = vld [vmem:[%s2574_s1] sm:$0xff] (!%p226_p2)   ;;  %1848 = vmatprep.subr.bf16.mxu1 (!%p226_p2), %v2074_v1  ;;  %v2079_v6 = vld [vmem:[%s2574_s1 + $0x8] sm:$0xff] (!%p226_p2)   ;;  %v2083_v10 = vld [vmem:[%s2574_s1 + $0x10] sm:$0xff] (!%p226_p2)  }
   0x8   : > { %v2076_v3 = vld [vmem:[%s2574_s1 + $0x80] sm:$0xff] (!%p226_p2)   ;;  %1809 = vmatpush3.bf16.msra.mxu0 (!%p226_p2), %v2075_v2  ;;  %v2080_v7 = vld [vmem:[%s2574_s1 + $0x88] sm:$0xff] (!%p226_p2)   ;;  %v2084_v11 = vld [vmem:[%s2574_s1 + $0x90] sm:$0xff] (!%p226_p2)  }
   0x9   : > { %1849 = vmatpush3.bf16.msra.mxu1 (!%p226_p2), %v2076_v3  ;;  %1810 = vmatprep.subr.bf16.mxu0 (!%p226_p2), %v2077_v4  ;;  %v2085_v12 = vld [vmem:[%s2574_s1 + $0x58] sm:$0xff] (!%p226_p2)   ;;  %v2089_v16 = vld [vmem:[%s2574_s1 + $0x60] sm:$0xff] (!%p226_p2)   ;;  %v2093_v20 = vld [vmem:[%s2574_s1 + $0x68] sm:$0xff] (!%p226_p2)  }
   0xa   : > { %1850 = vmatprep.subr.bf16.mxu1 (!%p226_p2), %v2078_v5  ;;  %v2086_v13 = vld [vmem:[%s2574_s1 + $0xd8] sm:$0xff] (!%p226_p2)   ;;  %v2090_v17 = vld [vmem:[%s2574_s1 + $0xe0] sm:$0xff] (!%p226_p2)   ;;  %v2094_v21 = vld [vmem:[%s2574_s1 + $0xe8] sm:$0xff] (!%p226_p2)  }
   0xb   : > { %v2087_v14 = vld [vmem:[%s2574_s1 + $0x18] sm:$0xff] (!%p226_p2)   ;;  %v2091_v18 = vld [vmem:[%s2574_s1 + $0x20] sm:$0xff] (!%p226_p2)   ;;  %v2095_v22 = vld [vmem:[%s2574_s1 + $0x28] sm:$0xff] (!%p226_p2)  }
   0xc   : > { %1811 = vmatpush3.bf16.msra.mxu0 (!%p226_p2), %v2079_v6  ;;  %v2088_v15 = vld [vmem:[%s2574_s1 + $0x98] sm:$0xff] (!%p226_p2)   ;;  %v2092_v19 = vld [vmem:[%s2574_s1 + $0xa0] sm:$0xff] (!%p226_p2)   ;;  %v2096_v23 = vld [vmem:[%s2574_s1 + $0xa8] sm:$0xff] (!%p226_p2)  }
   0xd   : > { %1851 = vmatpush3.bf16.msra.mxu1 %v2080_v7  ;;  %1812 = vmatprep.subr.bf16.mxu0 %v2081_v8  ;;  %s2581_s7 = smov (!%p262_p3, %s1678_s7), 15  ;;  %v2097_v24 = vld [vmem:[%s2574_s1 + $0x70] sm:$0xff]   ;;  %v2101_v28 = vld [vmem:[%s2574_s1 + $0x78] sm:$0xff]   ;;  %v2111_v36 = vld [vmem:[%s2574_s1 + $0x140] sm:$0xff]  }
   0xe   : > { %1852 = vmatprep.subr.bf16.mxu1 %v2082_v9  ;;  %v2098_v25 = vld [vmem:[%s2574_s1 + $0xf0] sm:$0xff]   ;;  %s2064_s8 = smul.u32 36, %s2581_s7  ;;  %v2102_v29 = vld [vmem:[%s2574_s1 + $0xf8] sm:$0xff]   ;;  %v2112_v37 = vld [vmem:[%s2574_s1 + $0x1c0] sm:$0xff]   ;;  %s1683_s23 = sshll.u32 %s2581_s7, 3 }
   0xf   : > { %v2099_v26 = vld [vmem:[%s2574_s1 + $0x30] sm:$0xff]   ;;  %v2103_v30 = vld [vmem:[%s2574_s1 + $0x38] sm:$0xff]   ;;  %v2113_v38 = vld [vmem:[%s2574_s1 + $0x100] sm:$0xff]   ;;  %s2560_s26 = scalar_lea.vmem %s2579_s6, %s1683_s23 }
  0x10   : > { %1813 = vmatpush3.bf16.msra.mxu0 %v2083_v10  ;;  %v2100_v27 = vld [vmem:[%s2574_s1 + $0xb0] sm:$0xff]   ;;  %s2358_s18 = scalar_lea.vmem %s2573_s0, %s2064_s8  ;;  %v2104_v31 = vld [vmem:[%s2574_s1 + $0xb8] sm:$0xff]   ;;  %v2114_v39 = vld [vmem:[%s2574_s1 + $0x180] sm:$0xff]   ;;  %s1681_s8 = sshll.u32 %s2581_s7, 2 }
  0x11   : > { %1853 = vmatpush3.bf16.msra.mxu1 %v2084_v11  ;;  %1814 = vmatprep.subr.bf16.mxu0 %v2085_v12  ;;  %v2105_v32 = vld [vmem:[%s2358_s18] ss:$36 sps:$4 sm:$0xff]   ;;  %v2108_v34 = vld [vmem:[%s2358_s18 + $0x8] ss:$36 sps:$4 sm:$0xff]   ;;  %v2121_v45 = vld [vmem:[%s2358_s18 + $0x54] ss:$36 sps:$4 sm:$0xff]   ;;  %s272_s15 = scalar_lea.vmem %s2576_s3, %s1681_s8 }
  0x12   : > { %1854 = vmatprep.subr.bf16.mxu1 %v2086_v13  ;;  %v2107_v33 = vld [vmem:[%s2358_s18 + $0x4] ss:$36 sps:$4 sm:$0xff]   ;;  %v2110_v35 = vld [vmem:[%s2358_s18 + $0xc] ss:$36 sps:$4 sm:$0xff]   ;;  %v2129_v52 = vld [vmem:[%s2574_s1 + $0x158] sm:$0xff]  }
  0x13   : > { %1120 = vmatprep.mubr.bf16.mxu0 %v2107_v33  ;;  %1185 = vmatprep.mubr.bf16.mxu1 %v2110_v35  ;;  %v2115_v40 = vld [vmem:[%s2574_s1 + $0x148] sm:$0xff]   ;;  %v2124_v47 = vld [vmem:[%s2358_s18 + $0x50] ss:$36 sps:$4 sm:$0xff]   ;;  %v2130_v53 = vld [vmem:[%s2574_s1 + $0x1d8] sm:$0xff]  }
  0x14   : > { %1815 = vmatpush3.bf16.msra.mxu0 %v2087_v14  ;;  %v2116_v41 = vld [vmem:[%s2574_s1 + $0x1c8] sm:$0xff]   ;;  %v2125_v48 = vld [vmem:[%s2574_s1 + $0x150] sm:$0xff]   ;;  %v2131_v54 = vld [vmem:[%s2574_s1 + $0x118] sm:$0xff]  }
  0x15   : > { %1855 = vmatpush3.bf16.msra.mxu1 %v2088_v15  ;;  %1816 = vmatprep.subr.bf16.mxu0 %v2089_v16  ;;  %v2117_v42 = vld [vmem:[%s2574_s1 + $0x108] sm:$0xff]   ;;  %v2126_v49 = vld [vmem:[%s2574_s1 + $0x1d0] sm:$0xff]   ;;  %v2132_v55 = vld [vmem:[%s2574_s1 + $0x198] sm:$0xff]  }
  0x16   : > { %1856 = vmatprep.subr.bf16.mxu1 %v2090_v17  ;;  %v2118_v43 = vld [vmem:[%s2574_s1 + $0x188] sm:$0xff]   ;;  %v2127_v50 = vld [vmem:[%s2574_s1 + $0x110] sm:$0xff]   ;;  %v2135_v57 = vld [vmem:[%s2358_s18 + $0x9c] ss:$36 sps:$4 sm:$0xff]  }
  0x17   : > { %v2119_v44 = vld [vmem:[%s2358_s18 + $0x4c] ss:$36 sps:$4 sm:$0xff]   ;;  %v2133_v56 = vld [vmem:[%s2358_s18 + $0x94] ss:$36 sps:$4 sm:$0xff]   ;;  %v2139_v60 = vld [vmem:[%s2574_s1 + $0x160] sm:$0xff]  }
  0x18   : > { %1817 = vmatpush3.bf16.msra.mxu0 %v2091_v18  ;;  %v2123_v46 = vld [vmem:[%s2358_s18 + $0x48] ss:$36 sps:$4 sm:$0xff]   ;;  %v2128_v51 = vld [vmem:[%s2574_s1 + $0x190] sm:$0xff]   ;;  %v2138_v59 = vld [vmem:[%s2358_s18 + $0x98] ss:$36 sps:$4 sm:$0xff]  }
  0x19   : > { %1857 = vmatpush3.bf16.msra.mxu1 %v2092_v19  ;;  %1818 = vmatprep.subr.bf16.mxu0 %v2093_v20  ;;  %v2137_v58 = vld [vmem:[%s2358_s18 + $0x90] ss:$36 sps:$4 sm:$0xff]   ;;  %v2140_v61 = vld [vmem:[%s2574_s1 + $0x1e0] sm:$0xff]   ;;  %v2143_v0 = vld [vmem:[%s2574_s1 + $0x168] sm:$0xff]  }
  0x1a   : > { %1858 = vmatprep.subr.bf16.mxu1 %v2094_v21  ;;  %v2141_v62 = vld [vmem:[%s2574_s1 + $0x120] sm:$0xff]   ;;  %v2144_v1 = vld [vmem:[%s2574_s1 + $0x1e8] sm:$0xff]   ;;  %v2151_v6 = vld [vmem:[%s2358_s18 + $0xd8] ss:$36 sps:$4 sm:$0xff]  }
  0x1b   : > { %v2142_v63 = vld [vmem:[%s2574_s1 + $0x1a0] sm:$0xff]   ;;  %v2145_v2 = vld [vmem:[%s2574_s1 + $0x128] sm:$0xff]   ;;  %v2153_v8 = vld [vmem:[%s2574_s1 + $0x170] sm:$0xff]  }
  0x1c   : > { %1819 = vmatpush3.bf16.msra.mxu0 %v2095_v22  ;;  %v2146_v3 = vld [vmem:[%s2574_s1 + $0x1a8] sm:$0xff]   ;;  %v2147_v4 = vld [vmem:[%s2358_s18 + $0xdc] ss:$36 sps:$4 sm:$0xff]   ;;  %v2154_v9 = vld [vmem:[%s2574_s1 + $0x1f0] sm:$0xff]  }
  0x1d   : > { %1859 = vmatpush3.bf16.msra.mxu1 %v2096_v23  ;;  %1820 = vmatprep.subr.bf16.mxu0 %v2097_v24  ;;  %v2149_v5 = vld [vmem:[%s2358_s18 + $0xe4] ss:$36 sps:$4 sm:$0xff]   ;;  %v2155_v10 = vld [vmem:[%s2574_s1 + $0x130] sm:$0xff]   ;;  %v2157_v12 = vld [vmem:[%s2574_s1 + $0x178] sm:$0xff]  }
  0x1e   : > { %1860 = vmatprep.subr.bf16.mxu1 %v2098_v25  ;;  %v2152_v7 = vld [vmem:[%s2358_s18 + $0xe0] ss:$36 sps:$4 sm:$0xff]   ;;  %v2156_v11 = vld [vmem:[%s2574_s1 + $0x1b0] sm:$0xff]   ;;  %v2158_v13 = vld [vmem:[%s2574_s1 + $0x1f8] sm:$0xff]  }
  0x1f   : > { %v2159_v14 = vld [vmem:[%s2574_s1 + $0x138] sm:$0xff]   ;;  %v2161_v16 = vld [vmem:[%s2358_s18 + $0x10] ss:$36 sps:$4 sm:$0xff]   ;;  %v2167_v20 = vld [vmem:[%s2574_s1 + $0x200] sm:$0xff]  }
  0x20   : > { %1821 = vmatpush3.bf16.msra.mxu0 %v2099_v26  ;;  %v2160_v15 = vld [vmem:[%s2574_s1 + $0x1b8] sm:$0xff]   ;;  %v2168_v21 = vld [vmem:[%s2577_s4] sm:$0xff]   ;;  %v2169_v22 = vld [vmem:[%s2574_s1 + $0x208] sm:$0xff]  }
  0x21   : > { %1861 = vmatpush3.bf16.msra.mxu1 %v2100_v27  ;;  %1822 = vmatprep.subr.bf16.mxu0 %v2101_v28  ;;  %v2163_v17 = vld [vmem:[%s2358_s18 + $0x14] ss:$36 sps:$4 sm:$0xff]   ;;  %v2166_v19 = vld [vmem:[%s2358_s18 + $0x1c] ss:$36 sps:$4 sm:$0xff]   ;;  %v2170_v23 = vld [vmem:[%s2577_s4 + $0x8] sm:$0xff]  }
  0x22   : > { %1862 = vmatprep.subr.bf16.mxu1 %v2102_v29  ;;  %v2164_v18 = vld [vmem:[%s2358_s18 + $0x18] ss:$36 sps:$4 sm:$0xff]   ;;  %v2173_v25 = vld [vmem:[%s2358_s18 + $0x64] ss:$36 sps:$4 sm:$0xff]   ;;  %v2177_v28 = vld [vmem:[%s2574_s1 + $0x210] sm:$0xff]  }
  0x23   : > { %v2171_v24 = vld [vmem:[%s2358_s18 + $0x5c] ss:$36 sps:$4 sm:$0xff]   ;;  %v2178_v29 = vld [vmem:[%s2577_s4 + $0x10] sm:$0xff]   ;;  %v2186_v35 = vld [vmem:[%s2358_s18 + $0xa8] ss:$36 sps:$4 sm:$0xff]  }
  0x24   : > { %1823 = vmatpush3.bf16.msra.mxu0 %v2103_v30  ;;  %v2175_v26 = vld [vmem:[%s2358_s18 + $0x58] ss:$36 sps:$4 sm:$0xff]   ;;  %v2176_v27 = vld [vmem:[%s2358_s18 + $0x60] ss:$36 sps:$4 sm:$0xff]   ;;  %v2183_v33 = vld [vmem:[%s2358_s18 + $0xac] ss:$36 sps:$4 sm:$0xff]  }
  0x25   : > { %1863 = vmatpush3.bf16.msra.mxu1 %v2104_v31  ;;  %1888 = vmatprep.subr.bf16.mxu0 %v2111_v36  ;;  %v2179_v30 = vld [vmem:[%s2574_s1 + $0x218] sm:$0xff]   ;;  %v2187_v36 = vld [vmem:[%s2574_s1 + $0x220] sm:$0xff]  }
  0x26   : > { %1928 = vmatprep.subr.bf16.mxu1 %v2112_v37  ;;  %v2180_v31 = vld [vmem:[%s2577_s4 + $0x18] sm:$0xff]   ;;  %v2188_v37 = vld [vmem:[%s2577_s4 + $0x20] sm:$0xff]  }
  0x27   : > { %1121 = vmatmul.mubr.bf16.vlgmr.msra.gmra.mrb[0].mxu0 %v2105_v32  ;;  %v2181_v32 = vld [vmem:[%s2358_s18 + $0xa4] ss:$36 sps:$4 sm:$0xff]  }
  0x28   : > { %1186 = vmatmul.mubr.bf16.vlgmr.msra.gmra.mrb[0].mxu1 %v2108_v34  ;;  %1889 = vmatpush3.bf16.msra.mxu0 %v2113_v38  ;;  %v2185_v34 = vld [vmem:[%s2358_s18 + $0xa0] ss:$36 sps:$4 sm:$0xff]   ;;  %v2189_v38 = vld [vmem:[%s2574_s1 + $0x228] sm:$0xff]  }
  0x29   : > { %1929 = vmatpush3.bf16.msra.mxu1 %v2114_v39  ;;  %1890 = vmatprep.subr.bf16.mxu0 %v2115_v40  ;;  %v2190_v39 = vld [vmem:[%s2577_s4 + $0x28] sm:$0xff]  }
  0x2a   : > { %1930 = vmatprep.subr.bf16.mxu1 %v2116_v41  ;;  %1128 = vmatprep.mubr.bf16.mxu0 %v2119_v44  ;;  %v2191_v40 = vld [vmem:[%s2358_s18 + $0xec] ss:$36 sps:$4 sm:$0xff]   ;;  %v2193_v41 = vld [vmem:[%s2358_s18 + $0xf4] ss:$36 sps:$4 sm:$0xff]  }
  0x2b   : > { %1193 = vmatprep.mubr.bf16.mxu1 %v2121_v45  ;;  %v2198_v44 = vld [vmem:[%s2577_s4 + $0x30] sm:$0xff]  }
  0x2c   : > { %1891 = vmatpush3.bf16.msra.mxu0 %v2117_v42  ;;  %v2195_v42 = vld [vmem:[%s2358_s18 + $0xe8] ss:$36 sps:$4 sm:$0xff]   ;;  %v2196_v45 = vld [vmem:[%s2358_s18 + $0xf0] ss:$36 sps:$4 sm:$0xff]  }
  0x2d   : > { %1931 = vmatpush3.bf16.msra.mxu1 %v2118_v43  ;;  %1892 = vmatprep.subr.bf16.mxu0 %v2125_v48  ;;  %v2197_v43 = vld [vmem:[%s2574_s1 + $0x230] sm:$0xff]   ;;  %v2200_v48 = vld [vmem:[%s2577_s4 + $0x38] sm:$0xff]  }
  0x2e   : > { %1932 = vmatprep.subr.bf16.mxu1 %v2126_v49  ;;  %v2203_v49 = vld [vmem:[%s272_s15] sm:$0xff]  }
  0x2f   : > { %1129 = vmatmul.mubr.bf16.gmra.mrb[4].mxu0 %v2123_v46  ;;  %v2199_v46 = vld [vmem:[%s2574_s1 + $0x238] sm:$0xff]  }
  0x30   : > { %1194 = vmatmul.mubr.bf16.gmra.mrb[4].mxu1 %v2124_v47  ;;  %1893 = vmatpush3.bf16.msra.mxu0 %v2127_v50  ;;  %v2201_v47 = vld [vmem:[%s2358_s18 + $0x20] ss:$36 sps:$4 sm:$0xff]   ;;  %v2202_v50 = vld [vmem:[%s2358_s18 + $0x68] ss:$36 sps:$4 sm:$0xff]  }
  0x31   : > { %1933 = vmatpush3.bf16.msra.mxu1 %v2128_v51  ;;  %1894 = vmatprep.subr.bf16.mxu0 %v2129_v52  ;;  %v2204_v51 = vld [vmem:[%s272_s15 + $0x8] sm:$0xff]   ;;  %v2205_v52 = vld [vmem:[%s2358_s18 + $0xb0] ss:$36 sps:$4 sm:$0xff]  }
  0x32   : > { %1934 = vmatprep.subr.bf16.mxu1 %v2130_v53  ;;  %1136 = vmatprep.mubr.bf16.mxu0 %v2133_v56  ;;  %v2207_v53 = vld [vmem:[%s272_s15 + $0x10] sm:$0xff]  }
  0x33   : > { %1201 = vmatprep.mubr.bf16.mxu1 %v2135_v57 }
  0x34   : > { %1895 = vmatpush3.bf16.msra.mxu0 %v2131_v54  ;;  %v2206_v54 = vld [vmem:[%s2358_s18 + $0xf8] ss:$36 sps:$4 sm:$0xff]  }
  0x35   : > { %1935 = vmatpush3.bf16.msra.mxu1 %v2132_v55  ;;  %1896 = vmatprep.subr.bf16.mxu0 %v2139_v60  ;;  %v2208_v55 = vld [vmem:[%s272_s15 + $0x18] sm:$0xff]  }
  0x36   : > { %1936 = vmatprep.subr.bf16.mxu1 %v2140_v61 }
  0x37   : > { %1137 = vmatmul.mubr.bf16.gmra.mrb[8].mxu0 %v2137_v58  ;;  %v1684_v58 = vld [vmem:[%s2575_s2] ss:$0 sm:$0xff] }
  0x38   : > { %1202 = vmatmul.mubr.bf16.gmra.mrb[8].mxu1 %v2138_v59  ;;  %1897 = vmatpush3.bf16.msra.mxu0 %v2141_v62 }
  0x39   : > { %1937 = vmatpush3.bf16.msra.mxu1 %v2142_v63  ;;  %1898 = vmatprep.subr.bf16.mxu0 %v2143_v0 }
  0x3a   : > { %1938 = vmatprep.subr.bf16.mxu1 %v2144_v1  ;;  %1144 = vmatprep.mubr.bf16.mxu0 %v2147_v4 }
  0x3b   : > { %1209 = vmatprep.mubr.bf16.mxu1 %v2149_v5 }
  0x3c   : > { %1899 = vmatpush3.bf16.msra.mxu0 %v2145_v2 }
  0x3d   : > { %1939 = vmatpush3.bf16.msra.mxu1 %v2146_v3  ;;  %1900 = vmatprep.subr.bf16.mxu0 %v2153_v8 }
  0x3e   : > { %1940 = vmatprep.subr.bf16.mxu1 %v2154_v9 }
  0x3f   : > { %1145 = vmatmul.mubr.bf16.gmra.mrb[12].mxu0 %v2151_v6 }
  0x40   : > { %1210 = vmatmul.mubr.bf16.gmra.mrb[12].mxu1 %v2152_v7  ;;  %1901 = vmatpush3.bf16.msra.mxu0 %v2155_v10 }
  0x41   : > { %1941 = vmatpush3.bf16.msra.mxu1 %v2156_v11  ;;  %1902 = vmatprep.subr.bf16.mxu0 %v2157_v12 }
  0x42   : > { %1942 = vmatprep.subr.bf16.mxu1 %v2158_v13  ;;  %1250 = vmatprep.mubr.bf16.mxu0 %v2163_v17 }
  0x43   : > { %1315 = vmatprep.mubr.bf16.mxu1 %v2166_v19 }
  0x44   : > { %1903 = vmatpush3.bf16.msra.mxu0 %v2159_v14 }
  0x45   : > { %1943 = vmatpush3.bf16.msra.mxu1 %v2160_v15  ;;  %2016 = vmatprep.subr.bf16.mxu0 %v2168_v21 }
  0x46   : > { %1992 = vmatprep.subr.bf16.mxu1 %v2167_v20 }
  0x47   : > { %1251 = vmatmul.mubr.bf16.vlgmr.msra.gmra.mrb[16].mxu0 %v2161_v16 }
  0x48   : > { %1316 = vmatmul.mubr.bf16.vlgmr.msra.gmra.mrb[16].mxu1 %v2164_v18  ;;  %2017 = vmatpush3.bf16.msra.mxu0 %v2168_v21 }
  0x49   : > { %1993 = vmatpush3.bf16.msra.mxu1 %v2167_v20  ;;  %2018 = vmatprep.subr.bf16.mxu0 %v2170_v23 }
  0x4a   : > { %1994 = vmatprep.subr.bf16.mxu1 %v2169_v22  ;;  %1258 = vmatprep.mubr.bf16.mxu0 %v2171_v24 }
  0x4b   : > { %1323 = vmatprep.mubr.bf16.mxu1 %v2173_v25 }
  0x4c   : > { %2019 = vmatpush3.bf16.msra.mxu0 %v2170_v23 }
  0x4d   : > { %1995 = vmatpush3.bf16.msra.mxu1 %v2169_v22  ;;  %2020 = vmatprep.subr.bf16.mxu0 %v2178_v29 }
  0x4e   : > { %1996 = vmatprep.subr.bf16.mxu1 %v2177_v28 }
  0x4f   : > { %1259 = vmatmul.mubr.bf16.gmra.mrb[20].mxu0 %v2175_v26 }
  0x50   : > { %1324 = vmatmul.mubr.bf16.gmra.mrb[20].mxu1 %v2176_v27  ;;  %2021 = vmatpush3.bf16.msra.mxu0 %v2178_v29 }
  0x51   : > { %1997 = vmatpush3.bf16.msra.mxu1 %v2177_v28  ;;  %2022 = vmatprep.subr.bf16.mxu0 %v2180_v31 }
  0x52   : > { %1998 = vmatprep.subr.bf16.mxu1 %v2179_v30  ;;  %1266 = vmatprep.mubr.bf16.mxu0 %v2181_v32 }
  0x53   : > { %1331 = vmatprep.mubr.bf16.mxu1 %v2183_v33 }
  0x54   : > { %2023 = vmatpush3.bf16.msra.mxu0 %v2180_v31 }
  0x55   : > { %1999 = vmatpush3.bf16.msra.mxu1 %v2179_v30  ;;  %2024 = vmatprep.subr.bf16.mxu0 %v2188_v37 }
  0x56   : > { %2000 = vmatprep.subr.bf16.mxu1 %v2187_v36 }
  0x57   : > { %1267 = vmatmul.mubr.bf16.gmra.mrb[24].mxu0 %v2185_v34 }
  0x58   : > { %1332 = vmatmul.mubr.bf16.gmra.mrb[24].mxu1 %v2186_v35  ;;  %1274 = vmatprep.mubr.bf16.mxu0 %v2191_v40 }
  0x59   : > { %2001 = vmatpush3.bf16.msra.mxu1 %v2187_v36  ;;  %2025 = vmatpush3.bf16.msra.mxu0 %v2188_v37 }
  0x5a   : > { %2002 = vmatprep.subr.bf16.mxu1 %v2189_v38  ;;  %2026 = vmatprep.subr.bf16.mxu0 %v2190_v39 }
  0x5b   : > { %1339 = vmatprep.mubr.bf16.mxu1 %v2193_v41 }
  0x5d   : > { %2003 = vmatpush3.bf16.msra.mxu1 %v2189_v38  ;;  %2027 = vmatpush3.bf16.msra.mxu0 %v2190_v39 }
  0x5e   : > { %2004 = vmatprep.subr.bf16.mxu1 %v2197_v43  ;;  %2028 = vmatprep.subr.bf16.mxu0 %v2198_v44 }
  0x5f   : > { %1275 = vmatmul.mubr.bf16.gmra.mrb[28].mxu0 %v2195_v42 }
  0x60   : > { %1340 = vmatmul.mubr.bf16.gmra.mrb[28].mxu1 %v2196_v45  ;;  %2032 = vmatprep.mubr.bf16.mxu0 %v2203_v49 }
  0x61   : > { %2005 = vmatpush3.bf16.msra.mxu1 %v2197_v43  ;;  %2008 = vmatprep.mubr.bf16.mxu1 %v2201_v47 }
  0x62   : > { %2029 = vmatpush3.bf16.msra.mxu0 %v2198_v44  ;;  %2006 = vmatprep.subr.bf16.mxu1 %v2199_v46 }
  0x63   : > { %2030 = vmatprep.subr.bf16.mxu0 %v2200_v48 }
  0x65   : > { %2007 = vmatpush3.bf16.msra.mxu1 %v2199_v46 }
  0x66   : > { %2031 = vmatpush3.bf16.msra.mxu0 %v2200_v48 }
  0x68   : > { %2009 = vmatmul.mubr.bf16.vlgmr.msra.gmra.mrb[32].mxu1 %v2202_v50 }
  0x69   : > { %2033 = vmatmul.mubr.bf16.vlgmr.msra.gmra.mrb[32].mxu0 %v2204_v51  ;;  %2012 = vmatprep.mubr.bf16.mxu1 %v2205_v52 }
  0x6a   : > { %2036 = vmatprep.mubr.bf16.mxu0 %v2207_v53 }
  0x70   : > { %2013 = vmatmul.mubr.bf16.gmra.mrb[36].mxu1 %v2206_v54 }
  0x71   : > { %2037 = vmatmul.mubr.bf16.gmra.mrb[36].mxu0 %v2208_v55 }
  0xfa   : > { %v1824_v56 = vpop.f32.mrb[0].mxu0 }
  0xfb   : > { %v1864_v57 = vpop.f32.mrb[0].mxu1  ;;  %v1825_v59 = vpop.f32.mrb[1].mxu0 }
  0xfc   : > { %v1826_v60 = vadd.f32 %v1825_v59, %v1824_v56  ;;  %v1865_v61 = vpop.f32.mrb[1].mxu1  ;;  %v1827_v62 = vpop.f32.mrb[2].mxu0 }
  0xfd   : > { %v1866_v63 = vadd.f32 %v1865_v61, %v1864_v57  ;;  %v1867_v0 = vpop.f32.mrb[2].mxu1  ;;  %v1828_v1 = vpop.f32.mrb[3].mxu0 }
  0xfe   : > { %v1123_v2 = vadd.f32 %v1826_v60, %v1684_v58  ;;  %v1829_v3 = vadd.f32 %v1828_v1, %v1827_v62  ;;  %v1868_v4 = vpop.f32.mrb[3].mxu1 }
  0xff   : > { %v1869_v5 = vadd.f32 %v1868_v4, %v1867_v0 }
 0x100   : > { %v1188_v6 = vadd.f32 %v1866_v63, %v1123_v2  ;;  %v1126_v7 = vadd.f32 %v1829_v3, %v1684_v58 }
 0x102   : > { %v1191_v8 = vadd.f32 %v1869_v5, %v1126_v7  ;;  %v1830_v9 = vpop.f32.mrb[4].mxu0 }
 0x103   : > { %v1870_v10 = vpop.f32.mrb[4].mxu1  ;;  %v1831_v11 = vpop.f32.mrb[5].mxu0 }
 0x104   : > { %v1832_v12 = vadd.f32 %v1831_v11, %v1830_v9  ;;  %v1871_v13 = vpop.f32.mrb[5].mxu1  ;;  %v1833_v14 = vpop.f32.mrb[6].mxu0 }
 0x105   : > { %v1872_v15 = vadd.f32 %v1871_v13, %v1870_v10  ;;  %v1873_v16 = vpop.f32.mrb[6].mxu1  ;;  %v1834_v17 = vpop.f32.mrb[7].mxu0 }
 0x106   : > { %v1131_v18 = vadd.f32 %v1832_v12, %v1684_v58  ;;  %v1835_v19 = vadd.f32 %v1834_v17, %v1833_v14  ;;  %v1874_v20 = vpop.f32.mrb[7].mxu1 }
 0x107   : > { %v1875_v21 = vadd.f32 %v1874_v20, %v1873_v16 }
 0x108   : > { %v1196_v22 = vadd.f32 %v1872_v15, %v1131_v18  ;;  %v1134_v23 = vadd.f32 %v1835_v19, %v1684_v58 }
 0x10a   : > { %v1199_v24 = vadd.f32 %v1875_v21, %v1134_v23  ;;  %v1836_v25 = vpop.f32.mrb[8].mxu0 }
 0x10b   : > { %v1876_v26 = vpop.f32.mrb[8].mxu1  ;;  %v1837_v27 = vpop.f32.mrb[9].mxu0 }
 0x10c   : > { %v1838_v28 = vadd.f32 %v1837_v27, %v1836_v25  ;;  %v1877_v29 = vpop.f32.mrb[9].mxu1  ;;  %v1839_v30 = vpop.f32.mrb[10].mxu0 }
 0x10d   : > { %v1878_v31 = vadd.f32 %v1877_v29, %v1876_v26  ;;  %v1879_v32 = vpop.f32.mrb[10].mxu1  ;;  %v1840_v33 = vpop.f32.mrb[11].mxu0 }
 0x10e   : > { %v1139_v34 = vadd.f32 %v1838_v28, %v1684_v58  ;;  %v1841_v35 = vadd.f32 %v1840_v33, %v1839_v30  ;;  %v1880_v36 = vpop.f32.mrb[11].mxu1 }
 0x10f   : > { %v1881_v37 = vadd.f32 %v1880_v36, %v1879_v32 }
 0x110   : > { %v1204_v38 = vadd.f32 %v1878_v31, %v1139_v34  ;;  %v1142_v39 = vadd.f32 %v1841_v35, %v1684_v58 }
 0x112   : > { %v1207_v40 = vadd.f32 %v1881_v37, %v1142_v39  ;;  %v1842_v41 = vpop.f32.mrb[12].mxu0 }
 0x113   : > { %v1882_v42 = vpop.f32.mrb[12].mxu1  ;;  %v1843_v43 = vpop.f32.mrb[13].mxu0 }
 0x114   : > { %v1883_v44 = vpop.f32.mrb[13].mxu1  ;;  %v1844_v45 = vadd.f32 %v1843_v43, %v1842_v41  ;;  %v1845_v47 = vpop.f32.mrb[14].mxu0 }
 0x115   : > { %v1884_v46 = vadd.f32 %v1883_v44, %v1882_v42  ;;  %v1885_v48 = vpop.f32.mrb[14].mxu1  ;;  %v1846_v49 = vpop.f32.mrb[15].mxu0 }
 0x116   : > { %v1886_v50 = vpop.f32.mrb[15].mxu1  ;;  %v1147_v51 = vadd.f32 %v1844_v45, %v1684_v58  ;;  %v1847_v52 = vadd.f32 %v1846_v49, %v1845_v47 }
 0x117   : > { %v1887_v53 = vadd.f32 %v1886_v50, %v1885_v48 }
 0x118   : > { %v1212_v54 = vadd.f32 %v1884_v46, %v1147_v51  ;;  %v1150_v55 = vadd.f32 %v1847_v52, %v1684_v58 }
 0x11a   : > { %v1215_v56 = vadd.f32 %v1887_v53, %v1150_v55  ;;  %v1904_v57 = vpop.f32.mrb[16].mxu0 }
 0x11b   : > { %v1905_v59 = vpop.f32.mrb[17].mxu0  ;;  %v1944_v60 = vpop.f32.mrb[16].mxu1 }
 0x11c   : > { %v1906_v61 = vadd.f32 %v1905_v59, %v1904_v57  ;;  %v1907_v62 = vpop.f32.mrb[18].mxu0  ;;  %v1945_v63 = vpop.f32.mrb[17].mxu1 }
 0x11d   : > { %v1908_v0 = vpop.f32.mrb[19].mxu0  ;;  %v1946_v2 = vadd.f32 %v1945_v63, %v1944_v60  ;;  %v1947_v3 = vpop.f32.mrb[18].mxu1 }
 0x11e   : > { %v1253_v1 = vadd.f32 %v1906_v61, %v1188_v6  ;;  %v1909_v4 = vadd.f32 %v1908_v0, %v1907_v62  ;;  %v1948_v5 = vpop.f32.mrb[19].mxu1 }
 0x11f   : > { %v1949_v9 = vadd.f32 %v1948_v5, %v1947_v3 }
 0x120   : > { %v1256_v7 = vadd.f32 %v1909_v4, %v1191_v8  ;;  %v1318_v10 = vadd.f32 %v1946_v2, %v1253_v1  ;;  %v1793_v2 = vld [vmem:[%s2578_s5] ss:$0 sm:$0xff] }
 0x122   : > { %v1321_v11 = vadd.f32 %v1949_v9, %v1256_v7  ;;  %v1910_v12 = vpop.f32.mrb[20].mxu0 }
 0x123   : > { %v1950_v13 = vpop.f32.mrb[20].mxu1  ;;  %v1911_v58 = vpop.f32.mrb[21].mxu0 }
 0x124   : > { %v1912_v14 = vadd.f32 %v1911_v58, %v1910_v12  ;;  %v1951_v15 = vpop.f32.mrb[21].mxu1  ;;  %v1913_v16 = vpop.f32.mrb[22].mxu0 }
 0x125   : > { %v1952_v17 = vadd.f32 %v1951_v15, %v1950_v13  ;;  %v1953_v18 = vpop.f32.mrb[22].mxu1  ;;  %v1914_v19 = vpop.f32.mrb[23].mxu0 }
 0x126   : > { %v1261_v20 = vadd.f32 %v1912_v14, %v1196_v22  ;;  %v1915_v21 = vadd.f32 %v1914_v19, %v1913_v16  ;;  %v1954_v6 = vpop.f32.mrb[23].mxu1 }
 0x127   : > { %v1955_v23 = vadd.f32 %v1954_v6, %v1953_v18 }
 0x128   : > { %v1264_v25 = vadd.f32 %v1915_v21, %v1199_v24  ;;  %v1326_v26 = vadd.f32 %v1952_v17, %v1261_v20 }
 0x12a   : > { %v1916_v27 = vpop.f32.mrb[24].mxu0  ;;  %v1329_v8 = vadd.f32 %v1955_v23, %v1264_v25 }
 0x12b   : > { %v1956_v28 = vpop.f32.mrb[24].mxu1  ;;  %v1917_v29 = vpop.f32.mrb[25].mxu0 }
 0x12c   : > { %v1918_v30 = vadd.f32 %v1917_v29, %v1916_v27  ;;  %v1957_v31 = vpop.f32.mrb[25].mxu1  ;;  %v1919_v32 = vpop.f32.mrb[26].mxu0 }
 0x12d   : > { %v1958_v33 = vadd.f32 %v1957_v31, %v1956_v28  ;;  %v1959_v34 = vpop.f32.mrb[26].mxu1  ;;  %v1920_v35 = vpop.f32.mrb[27].mxu0 }
 0x12e   : > { %v1269_v36 = vadd.f32 %v1918_v30, %v1204_v38  ;;  %v1921_v37 = vadd.f32 %v1920_v35, %v1919_v32  ;;  %v1960_v39 = vpop.f32.mrb[27].mxu1 }
 0x12f   : > { %v1961_v41 = vadd.f32 %v1960_v39, %v1959_v34 }
 0x130   : > { %v1272_v22 = vadd.f32 %v1921_v37, %v1207_v40  ;;  %v1334_v42 = vadd.f32 %v1958_v33, %v1269_v36 }
 0x132   : > { %v1922_v43 = vpop.f32.mrb[28].mxu0  ;;  %v1337_v44 = vadd.f32 %v1961_v41, %v1272_v22 }
 0x133   : > { %v1962_v24 = vpop.f32.mrb[28].mxu1  ;;  %v1923_v45 = vpop.f32.mrb[29].mxu0 }
 0x134   : > { %v1924_v46 = vadd.f32 %v1923_v45, %v1922_v43  ;;  %v1963_v47 = vpop.f32.mrb[29].mxu1  ;;  %v1925_v48 = vpop.f32.mrb[30].mxu0 }
 0x135   : > { %v1964_v49 = vadd.f32 %v1963_v47, %v1962_v24  ;;  %v1965_v50 = vpop.f32.mrb[30].mxu1  ;;  %v1926_v51 = vpop.f32.mrb[31].mxu0 }
 0x136   : > { %v1277_v52 = vadd.f32 %v1924_v46, %v1212_v54  ;;  %v1927_v53 = vadd.f32 %v1926_v51, %v1925_v48  ;;  %v1966_v55 = vpop.f32.mrb[31].mxu1 }
 0x137   : > { %v1967_v38 = vadd.f32 %v1966_v55, %v1965_v50 }
 0x138   : > { %v1280_v57 = vadd.f32 %v1927_v53, %v1215_v56  ;;  %v1342_v59 = vadd.f32 %v1964_v49, %v1277_v52 }
 0x13a   : > { %v1345_v60 = vadd.f32 %v1967_v38, %v1280_v57 }
 0x13b   : > { %v2010_v40 = vpop.f32.mrb[32].mxu1 }
 0x13c   : > { %v1391_v61 = vadd.f32 %v2010_v40, %v1326_v26  ;;  %v1382_v62 = vpop.f32.mrb[33].mxu1  ;;  %v2034_v63 = vpop.f32.mrb[32].mxu0 }
 0x13d   : > { %v1383_v0 = vadd.f32 %v1382_v62, %v1318_v10  ;;  %v2011_v1 = vpop.f32.mrb[34].mxu1  ;;  %v1550_v3 = vpop.f32.mrb[33].mxu0 }
 0x13e   : > { %v1394_v4 = vadd.f32 %v2011_v1, %v1329_v8  ;;  %v2041_v54 = vadd.f32 %v2034_v63, %v1391_v61  ;;  %v1385_v5 = vpop.f32.mrb[35].mxu1  ;;  %v2035_v7 = vpop.f32.mrb[34].mxu0 }
 0x13f   : > { %v1386_v9 = vadd.f32 %v1385_v5, %v1321_v11  ;;  %v2044_v56 = vadd.f32 %v1550_v3, %v1383_v0  ;;  %v1553_v12 = vpop.f32.mrb[35].mxu0 }
 0x140   : > { %v2042_v13 = vadd.f32 %v2041_v54, %v1793_v2  ;;  %v2047_v58 = vadd.f32 %v1793_v2, %v1394_v4 }
 0x141   : > { %v2045_v10 = vadd.f32 %v2044_v56, %v1793_v2  ;;  %v2050_v14 = vadd.f32 %v1793_v2, %v1386_v9 }
 0x142   : > { %v1591_v15 = vmax.f32 %v2042_v13, 0.0  ;;  %v2048_v16 = vadd.f32 %v2047_v58, %v2035_v7 }
 0x143   : > { %v1589_v17 = vmax.f32 %v2045_v10, 0.0  ;;  %v2051_v18 = vadd.f32 %v2050_v14, %v1553_v12  ;;  %v2014_v19 = vpop.f32.mrb[36].mxu1 }
 0x144   : > { %1599 = vst [vmem:[%s2560_s26 + $0x10] sm:$0xff] %v1591_v15  ;;  %v1592_v11 = vmax.f32 %v2048_v16, 0.0  ;;  %v1407_v20 = vadd.f32 %v2014_v19, %v1342_v59  ;;  %v1398_v21 = vpop.f32.mrb[37].mxu1  ;;  %v2038_v6 = vpop.f32.mrb[36].mxu0 }
 0x145   : > { %1597 = vst [vmem:[%s2560_s26] sm:$0xff] %v1589_v17  ;;  %v1590_v23 = vmax.f32 %v2051_v18, 0.0  ;;  %v1399_v25 = vadd.f32 %v1398_v21, %v1334_v42  ;;  %v2015_v26 = vpop.f32.mrb[38].mxu1  ;;  %v1566_v27 = vpop.f32.mrb[37].mxu0 }
 0x146   : > { %1600 = vst [vmem:[%s2560_s26 + $0x18] sm:$0xff] %v1592_v11  ;;  %v1410_v8 = vadd.f32 %v2015_v26, %v1345_v60  ;;  %v2053_v28 = vadd.f32 %v1793_v2, %v1407_v20  ;;  %v1401_v29 = vpop.f32.mrb[39].mxu1  ;;  %v2039_v30 = vpop.f32.mrb[38].mxu0 }
 0x147   : > { %1598 = vst [vmem:[%s2560_s26 + $0x8] sm:$0xff] %v1590_v23  ;;  %v1402_v31 = vadd.f32 %v1401_v29, %v1337_v44  ;;  %v2056_v32 = vadd.f32 %v1793_v2, %v1399_v25  ;;  %v1569_v33 = vpop.f32.mrb[39].mxu0 }
 0x148   : > { %v2054_v34 = vadd.f32 %v2053_v28, %v2038_v6  ;;  %v2059_v35 = vadd.f32 %v1793_v2, %v1410_v8 }
 0x149   : > { %v2057_v36 = vadd.f32 %v2056_v32, %v1566_v27  ;;  %v2062_v37 = vadd.f32 %v1793_v2, %v1402_v31 }
 0x14a   : > { %v1595_v39 = vmax.f32 %v2054_v34, 0.0  ;;  %v2060_v41 = vadd.f32 %v2059_v35, %v2039_v30 }
 0x14b   : > { %v1593_v22 = vmax.f32 %v2057_v36, 0.0  ;;  %v2063_v42 = vadd.f32 %v2062_v37, %v1569_v33 }
 0x14c   : > { %1603 = vst [vmem:[%s2560_s26 + $0x30] sm:$0xff] %v1595_v39  ;;  %v1596_v43 = vmax.f32 %v2060_v41, 0.0 }
 0x14d   : > { %1601 = vst [vmem:[%s2560_s26 + $0x20] sm:$0xff] %v1593_v22  ;;  %v1594_v24 = vmax.f32 %v2063_v42, 0.0 }
 0x14e   : > { %1604 = vst [vmem:[%s2560_s26 + $0x38] sm:$0xff] %v1596_v43 }
 0x14f   : > { %1602 = vst [vmem:[%s2560_s26 + $0x28] sm:$0xff] %v1594_v24 }
 0x150 PF: > { %s16_s21 = sadd.s32 1, %s2215_s21  }
 0x151   : > { %p13_p4 = scmp.ge.s32.totalorder %s16_s21, 4  }
 0x153   :  { %15 = sbr.rel (!%p13_p4) target bundleno = 1 (0x1), region = 77 }

</bundles_post_ra>
